<compile_context>
chip_gen: v7x
topology: tpu7x:2x2x1
jax: 0.10.0
libtpu: 0.0.40
codegen_flags: <defaults>
</compile_context>

<pallas_src>
import functools

import jax
import jax.numpy as jnp
import numpy as np
from jax.experimental import pallas as pl
from jax.experimental.pallas import tpu as pltpu

_LANE = 128
_NEG = -1e30


def _vmem_spec():
    return pl.BlockSpec(memory_space=pltpu.MemorySpace.VMEM)


# ----------------------------------------------------------------------------
# Host-side slab packing (static offsets, row starts aligned to 8 sublanes)
# ----------------------------------------------------------------------------

def _pack_rows(entries, lane_width=_LANE, row_align=8):
    """Pack named 2-D arrays into one (R, lane_width) f32 slab.

    Returns (slab, {name: (row0, nrows, ncols)}); offsets are python ints.
    """
    offs = {}
    parts = []
    r = 0
    for name, a in entries:
        a = jnp.asarray(a, jnp.float32)
        nr, nc = a.shape
        assert nc <= lane_width, (name, (nr, nc))
        pad = (-r) % row_align
        if pad:
            parts.append(jnp.zeros((pad, lane_width), jnp.float32))
            r += pad
        if nc < lane_width:
            a = jnp.concatenate(
                [a, jnp.zeros((nr, lane_width - nc), jnp.float32)], axis=1)
        parts.append(a)
        offs[name] = (r, nr, nc)
        r += nr
    pad = (-r) % row_align
    if pad:
        parts.append(jnp.zeros((pad, lane_width), jnp.float32))
    return jnp.concatenate(parts, axis=0), offs


def _take(ref, off):
    r, nr, nc = off
    return ref[r:r + nr, :nc]        # static slice of a VMEM ref (free view)


# ----------------------------------------------------------------------------
# Single fused kernel
# ----------------------------------------------------------------------------

def fused_pgnt_kernel(*refs, n_layers, num_heads, elu_flags, layer_offs,
                      misc_offs, neg_slope, num_graphs, out1_dim, slab_cols):
    feat_ref, kpgt_ref, misc_ref = refs[0:3]
    layer_refs = refs[3:3 + n_layers]
    fw1_hbm = refs[3 + n_layers]
    out_ref = refs[4 + n_layers]
    fw1_vmem = refs[5 + n_layers]
    dma_sem = refs[6 + n_layers]

    # Kick off the (dominant) FPN fc1 weight DMA immediately; it overlaps the
    # whole GAT stack and is awaited right before the FPN matmul.
    fw1_copy = pltpu.make_async_copy(fw1_hbm, fw1_vmem, dma_sem.at[0])
    fw1_copy.start()

    h = feat_ref[...]                                      # (N, Fin) f32

    # ---------------- GAT stack (DGL GATConv semantics) ----------------------
    for li in range(n_layers):
        lref = layer_refs[li]
        offs = layer_offs[li]
        H = num_heads[li]

        z = jnp.dot(h, _take(lref, offs["w"]),
                    preferred_element_type=jnp.float32)    # (N, HD)
        if "res_w" in offs:                                 # linear residual
            res = jnp.dot(h, _take(lref, offs["res_w"]),
                          preferred_element_type=jnp.float32)
        else:                                               # identity residual
            res = h

        # block-diagonal z (heads stacked along sublanes) via preloaded mask
        z_bd = jnp.concatenate([z] * H, axis=0) * _take(lref, offs["bd_mask"])

        # packed logits, all heads side by side along lanes:
        #   e[dst, h*N+src] = er[dst, h] + el[h, src]
        er = jnp.dot(z, _take(lref, offs["ar_expand"]),
                     preferred_element_type=jnp.float32)    # (N, H*N)
        el = jax.lax.dot_general(_take(lref, offs["al_flat"]), z_bd,
                                 (((1,), (1,)), ((), ())),
                                 preferred_element_type=jnp.float32)  # (1, H*N)
        e = er + el
        e = jnp.maximum(e, neg_slope * e)                   # leaky relu
        e = e + _take(lref, offs["adj_bias"])               # -1e30 off-edge

        # edge softmax for all heads at once (shared row max; masked entries
        # underflow to exactly 0 -- self-loops guarantee a nonzero denominator)
        m = jnp.max(e, axis=1, keepdims=True)
        p = jnp.exp(e - m)
        denom = jnp.dot(p, _take(lref, offs["block_ones"]),
                        preferred_element_type=jnp.float32)  # per-head sums
        alpha = p * pl.reciprocal(denom + 1e-30, approx=True)

        o = jnp.dot(alpha, z_bd, preferred_element_type=jnp.float32)  # (N, HD)
        o = o + res + _take(lref, offs["bias"])

        if "mean_mat" in offs:                              # head mean on MXU
            o = jnp.dot(o, _take(lref, offs["mean_mat"]),
                        preferred_element_type=jnp.float32)  # (N, D)
        if elu_flags[li]:
            o = jnp.where(o > 0, o, jnp.exp(jnp.minimum(o, 0.0)) - 1.0)
        h = o

    # ---------------- WeightedSumAndMax readout ------------------------------
    feats = h                                               # (N, F)
    seg = _take(misc_ref, misc_offs["seg"])                 # (G, N)
    seg_neg = _take(misc_ref, misc_offs["seg_neg"])         # (N, G) additive mask
    ro_w = _take(misc_ref, misc_offs["ro_w"])               # (1, F)
    ro_b = _take(misc_ref, misc_offs["ro_b"])               # (1, 1)

    logit = jnp.sum(feats * ro_w, axis=1, keepdims=True) + ro_b
    gate = pl.reciprocal(1.0 + jnp.exp(-logit), approx=True)          # sigmoid
    h_sum = jnp.dot(seg, feats * gate, preferred_element_type=jnp.float32)

    maxes = []
    for g in range(num_graphs):                             # static small loop
        maxes.append(jnp.max(feats + seg_neg[:, g:g + 1], axis=0, keepdims=True))
    h_max = jnp.concatenate(maxes, axis=0)                  # (G, F)
    gat_out = jnp.concatenate([h_sum, h_max], axis=1)       # (G, 2F)

    # ---------------- FPN : fc1 -> relu -> fc2 -------------------------------
    fw1_copy.wait()                                         # bf16 fc1 weight ready
    f1 = jnp.dot(kpgt_ref[...], fw1_vmem[...],
                 preferred_element_type=jnp.float32)        # bf16 x bf16 -> f32
    f1 = jnp.maximum(f1 + _take(misc_ref, misc_offs["fpn_b1"]), 0.0)
    fpn_out = (jnp.dot(f1, _take(misc_ref, misc_offs["fpn_w2"]),
                       preferred_element_type=jnp.float32)
               + _take(misc_ref, misc_offs["fpn_b2"]))

    # ---------------- fc_gat / fc_fpn + ReLU + concat ------------------------
    gat_branch = jnp.maximum(
        jnp.dot(gat_out, _take(misc_ref, misc_offs["fcgat_w"]),
                preferred_element_type=jnp.float32)
        + _take(misc_ref, misc_offs["fcgat_b"]), 0.0)
    fpn_branch = jnp.maximum(
        jnp.dot(fpn_out, _take(misc_ref, misc_offs["fcfpn_w"]),
                preferred_element_type=jnp.float32)
        + _take(misc_ref, misc_offs["fcfpn_b"]), 0.0)
    merged = jnp.concatenate([gat_branch, fpn_branch], axis=1)   # (G, 2*ld)

    # ---------------- MLP -----------------------------------------------------
    m1 = jnp.maximum(
        jnp.dot(merged, _take(misc_ref, misc_offs["mlp_w1"]),
                preferred_element_type=jnp.float32)
        + _take(misc_ref, misc_offs["mlp_b1"]), 0.0)
    output = (jnp.dot(m1, _take(misc_ref, misc_offs["mlp_w2"]),
                      preferred_element_type=jnp.float32)
              + _take(misc_ref, misc_offs["mlp_b2"]))

    # ---------------- FFN head ------------------------------------------------
    f2 = jnp.maximum(
        jnp.dot(output, _take(misc_ref, misc_offs["ffn_w1"]),
                preferred_element_type=jnp.float32)
        + _take(misc_ref, misc_offs["ffn_b1"]), 0.0)
    out2 = (jnp.dot(f2, _take(misc_ref, misc_offs["ffn_w2"]),
                    preferred_element_type=jnp.float32)
            + _take(misc_ref, misc_offs["ffn_b2"]))

    # lane-dense packed output slab: [:, :out1_dim] = output, [:, out1_dim] = out
    pad_cols = slab_cols - out1_dim - 1
    slab = jnp.concatenate(
        [output, out2, jnp.zeros((num_graphs, pad_cols), jnp.float32)], axis=1)
    out_ref[...] = slab.astype(out_ref.dtype)


# ----------------------------------------------------------------------------
# Forward wrapper (one pallas_call for the entire network)
# ----------------------------------------------------------------------------

def _prepare_layer_slab(lp, H, D, N, adj, agg_mode):
    """Pack one GAT layer's params + attention constants into a (R, 128) slab."""
    HD = H * D
    attn_l, attn_r = lp["attn_l"], lp["attn_r"]

    # ar_expand[h*D+d, h*N+src] = attn_r[h, d]   (er compute + lane broadcast)
    ar_expand = jnp.zeros((HD, H * N), jnp.float32)
    for hh in range(H):
        blk = jnp.broadcast_to(attn_r[hh][:, None], (D, N))
        ar_expand = ar_expand.at[hh * D:(hh + 1) * D, hh * N:(hh + 1) * N].set(blk)

    entries = [
        ("w", lp["w"]),
        ("bias", lp["bias"]),
        ("al_flat", jnp.reshape(attn_l, (1, HD))),
        ("ar_expand", ar_expand),
        ("bd_mask", np.kron(np.eye(H, dtype=np.float32),
                            np.ones((N, D), np.float32))),          # (H*N, HD)
        ("adj_bias", (jnp.tile(adj, (1, H)) - 1.0) * (-_NEG)),      # (N, H*N)
        ("block_ones", np.kron(np.eye(H, dtype=np.float32),
                               np.ones((N, N), np.float32))),       # (H*N, H*N)
    ]
    if lp["res_w"] is not None:
        entries.append(("res_w", lp["res_w"]))
    if agg_mode == "mean":
        entries.append(("mean_mat",
                        np.tile(np.eye(D, dtype=np.float32), (H, 1)) / float(H)))
    return _pack_rows(entries)


def pgnt_forward(params, cfg, node_feats, adj, seg, kpgt_features):
    G, N = seg.shape
    n_layers = len(cfg["hidden_dim"])
    out1_dim = params["mlp"]["w2"].shape[1]                 # linear_dim * 2
    slab_cols = ((out1_dim + 1 + _LANE - 1) // _LANE) * _LANE
    fp_2_dim = params["fpn"]["w1"].shape[1]

    layer_slabs, layer_offs = [], []
    for li in range(n_layers):
        slab, offs = _prepare_layer_slab(
            params["gat_layers"][li], cfg["num_heads"][li], cfg["hidden_dim"][li],
            N, adj, cfg["agg_modes"][li])
        layer_slabs.append(slab)
        layer_offs.append(offs)

    seg_neg = (jnp.transpose(seg) - 1.0) * (-_NEG)          # 0 in-graph, -1e30 else
    misc_entries = [
        ("seg", seg), ("seg_neg", seg_neg),
        ("ro_w", params["readout"]["w"]), ("ro_b", params["readout"]["b"]),
        ("fpn_b1", params["fpn"]["b1"]),
        ("fpn_w2", params["fpn"]["w2"]), ("fpn_b2", params["fpn"]["b2"]),
        ("fcgat_w", params["fc_gat"]["w"]), ("fcgat_b", params["fc_gat"]["b"]),
        ("fcfpn_w", params["fc_fpn"]["w"]), ("fcfpn_b", params["fc_fpn"]["b"]),
        ("mlp_w1", params["mlp"]["w1"]), ("mlp_b1", params["mlp"]["b1"]),
        ("mlp_w2", params["mlp"]["w2"]), ("mlp_b2", params["mlp"]["b2"]),
        ("ffn_w1", params["ffn"]["w1"]), ("ffn_b1", params["ffn"]["b1"]),
        ("ffn_w2", params["ffn"]["w2"]), ("ffn_b2", params["ffn"]["b2"]),
    ]
    misc_slab, misc_offs = _pack_rows(misc_entries)

    # bf16 halves the dominant HBM transfer; matmuls accumulate in f32.
    kpgt_bf16 = kpgt_features.astype(jnp.bfloat16)
    fw1_bf16 = params["fpn"]["w1"].astype(jnp.bfloat16)

    kern = functools.partial(
        fused_pgnt_kernel,
        n_layers=n_layers,
        num_heads=tuple(cfg["num_heads"]),
        elu_flags=tuple(cfg["elu"]),
        layer_offs=tuple(layer_offs),
        misc_offs=misc_offs,
        neg_slope=0.2,
        num_graphs=G,
        out1_dim=out1_dim,
        slab_cols=slab_cols,
    )

    inputs = [node_feats, kpgt_bf16, misc_slab] + layer_slabs + [fw1_bf16]
    in_specs = ([_vmem_spec()] * (3 + n_layers)
                + [pl.BlockSpec(memory_space=pl.ANY)])      # fc1 weight stays in HBM

    slab = pl.pallas_call(
        kern,
        out_shape=jax.ShapeDtypeStruct((G, slab_cols), jnp.float32),
        in_specs=in_specs,
        out_specs=_vmem_spec(),
        scratch_shapes=[
            pltpu.VMEM((fw1_bf16.shape[0], fp_2_dim), jnp.bfloat16),
            pltpu.SemaphoreType.DMA((1,)),
        ],
    )(*inputs)

    output = slab[:, :out1_dim]
    out = slab[:, out1_dim:out1_dim + 1]
    return output, out


# ----------------------------------------------------------------------------
# Deterministic parameter init + synthetic inputs
# ----------------------------------------------------------------------------

def _init(key, shape, scale=0.1):
    return scale * jax.random.normal(key, shape, dtype=jnp.float32)


def build_params(key, cfg):
    keys = iter(jax.random.split(key, 64))
    params = {}

    in_feats = cfg["in_feats"]
    layers = []
    for i in range(len(cfg["hidden_dim"])):
        H, D = cfg["num_heads"][i], cfg["hidden_dim"][i]
        hd = H * D
        res_w = None if in_feats == hd else _init(next(keys), (in_feats, hd))
        layers.append(dict(
            w=_init(next(keys), (in_feats, hd)),
            attn_l=_init(next(keys), (H, D)),
            attn_r=_init(next(keys), (H, D)),
            res_w=res_w,                       # None => DGL identity residual
            bias=_init(next(keys), (1, hd)),
        ))
        in_feats = hd if cfg["agg_modes"][i] == "flatten" else D
    params["gat_layers"] = layers
    gnn_out = in_feats                         # hidden_dim[-1] (mean agg last)

    params["readout"] = dict(w=_init(next(keys), (1, gnn_out)),
                             b=_init(next(keys), (1, 1)))

    linear_dim = cfg["hidden_dim"][0]
    fp_2_dim = cfg["fp_2_dim"]
    gat_dim = int(linear_dim * 2 * cfg["gat_scale"] // 1)

    params["fpn"] = dict(w1=_init(next(keys), (2304, fp_2_dim)),
                         b1=_init(next(keys), (1, fp_2_dim)),
                         w2=_init(next(keys), (fp_2_dim, linear_dim)),
                         b2=_init(next(keys), (1, linear_dim)))
    params["fc_gat"] = dict(w=_init(next(keys), (linear_dim * 2, gat_dim)),
                            b=_init(next(keys), (1, gat_dim)))
    params["fc_fpn"] = dict(w=_init(next(keys), (linear_dim, linear_dim * 2 - gat_dim)),
                            b=_init(next(keys), (1, linear_dim * 2 - gat_dim)))
    params["mlp"] = dict(w1=_init(next(keys), (linear_dim * 2, linear_dim * 4)),
                         b1=_init(next(keys), (1, linear_dim * 4)),
                         w2=_init(next(keys), (linear_dim * 4, linear_dim * 2)),
                         b2=_init(next(keys), (1, linear_dim * 2)))
    params["ffn"] = dict(w1=_init(next(keys), (linear_dim * 2, linear_dim)),
                         b1=_init(next(keys), (1, linear_dim)),
                         w2=_init(next(keys), (linear_dim, 1)),
                         b2=_init(next(keys), (1, 1)))
    return params


def build_graph(num_graphs, nodes_per_graph):
    """Block-diagonal ring graphs with self-loops.  adj[dst, src]."""
    N = num_graphs * nodes_per_graph
    adj = np.zeros((N, N), dtype=np.float32)
    seg = np.zeros((num_graphs, N), dtype=np.float32)
    for g in range(num_graphs):
        off = g * nodes_per_graph
        for n in range(nodes_per_graph):
            i = off + n
            seg[g, i] = 1.0
            adj[i, i] = 1.0                                     # self-loop
            adj[i, off + (n + 1) % nodes_per_graph] = 1.0       # ring edges
            adj[i, off + (n - 1) % nodes_per_graph] = 1.0
    return jnp.asarray(adj), jnp.asarray(seg)


if __name__ == "__main__":
    cfg = dict(
        in_feats=32,
        hidden_dim=[32, 32, 32],      # args.hidden_dim
        num_heads=[4, 4, 4],          # args.num_heads
        agg_modes=["flatten", "flatten", "mean"],
        elu=[True, True, False],
        fp_2_dim=64,                  # args.fp_2_dim
        gat_scale=0.5,                # args.gat_scale
    )

    key = jax.random.PRNGKey(0)
    k_param, k_feat, k_fp = jax.random.split(key, 3)

    params = build_params(k_param, cfg)

    num_graphs, nodes_per_graph = 2, 8
    adj, seg = build_graph(num_graphs, nodes_per_graph)          # (16,16), (2,16)
    node_feats = jax.random.normal(
        k_feat, (num_graphs * nodes_per_graph, cfg["in_feats"]), dtype=jnp.float32)
    kpgt_features = jax.random.normal(k_fp, (num_graphs, 2304), dtype=jnp.float32)

    fwd = jax.jit(lambda p, nf, a, s, kp: pgnt_forward(p, cfg, nf, a, s, kp))
    output, out = fwd(params, node_feats, adj, seg, kpgt_features)
    jax.block_until_ready((output, out))

    assert output.shape == (num_graphs, cfg["hidden_dim"][0] * 2)
    assert out.shape == (num_graphs, 1)
    assert bool(jnp.all(jnp.isfinite(output))) and bool(jnp.all(jnp.isfinite(out)))
    print("KERNEL_OK")
</pallas_src>

<mosaic_0001>
module attributes {stable_mosaic.version = 11 : i64} {
  func.func @fused_pgnt_kernel(%arg0: memref<16x32xf32, #tpu.memory_space<vmem>>, %arg1: memref<2x2304xbf16, #tpu.memory_space<vmem>>, %arg2: memref<552x128xf32, #tpu.memory_space<vmem>>, %arg3: memref<352x128xf32, #tpu.memory_space<vmem>>, %arg4: memref<416x128xf32, #tpu.memory_space<vmem>>, %arg5: memref<544x128xf32, #tpu.memory_space<vmem>>, %arg6: memref<2304x64xbf16, #tpu.memory_space<any>>, %arg7: memref<2x128xf32, #tpu.memory_space<vmem>>, %arg8: memref<2304x64xbf16, #tpu.memory_space<vmem>>, %arg9: memref<1x!tpu.dma_semaphore, #tpu.memory_space<semaphore_mem>>) attributes {dimension_semantics = [], scalar_prefetch = 0 : i64, scratch_operands = 2 : i64, tpu.core_type = #tpu.core_type<tc>} {
    %c0_i32 = arith.constant 0 : i32
    %0 = tpu.memref_slice %arg9[%c0_i32] : memref<1x!tpu.dma_semaphore, #tpu.memory_space<semaphore_mem>> -> memref<1x!tpu.dma_semaphore, #tpu.memory_space<semaphore_mem>>
    %1 = tpu.memref_squeeze %0 : memref<1x!tpu.dma_semaphore, #tpu.memory_space<semaphore_mem>> -> memref<!tpu.dma_semaphore, #tpu.memory_space<semaphore_mem>>
    tpu.enqueue_dma source(%arg6 : memref<2304x64xbf16, #tpu.memory_space<any>>) target(%arg8 : memref<2304x64xbf16, #tpu.memory_space<vmem>>) target_semaphore(%1 : memref<!tpu.dma_semaphore, #tpu.memory_space<semaphore_mem>>)
    %c0 = arith.constant 0 : index
    %c0_0 = arith.constant 0 : index
    %2 = vector.load %arg0[%c0, %c0_0] : memref<16x32xf32, #tpu.memory_space<vmem>>, vector<16x32xf32>
    %c0_1 = arith.constant 0 : index
    %c0_2 = arith.constant 0 : index
    %3 = vector.load %arg3[%c0_1, %c0_2] : memref<352x128xf32, #tpu.memory_space<vmem>>, vector<32x128xf32>
    %cst = arith.constant dense<0.000000e+00> : vector<16x128xf32>
    %4 = tpu.matmul %2, %3, %cst {dimension_numbers = #tpu.dot_dimension_numbers<[1], [0], [0], [1], [0, 0, 1, 1], [], []>} : vector<16x32xf32>, vector<32x128xf32>, vector<16x128xf32> -> vector<16x128xf32>
    %c320 = arith.constant 320 : index
    %c0_3 = arith.constant 0 : index
    %5 = vector.load %arg3[%c320, %c0_3] : memref<352x128xf32, #tpu.memory_space<vmem>>, vector<32x128xf32>
    %cst_4 = arith.constant dense<0.000000e+00> : vector<16x128xf32>
    %6 = tpu.matmul %2, %5, %cst_4 {dimension_numbers = #tpu.dot_dimension_numbers<[1], [0], [0], [1], [0, 0, 1, 1], [], []>} : vector<16x32xf32>, vector<32x128xf32>, vector<16x128xf32> -> vector<16x128xf32>
    %7 = tpu.concatenate %4, %4, %4, %4 in 0 : vector<16x128xf32>, vector<16x128xf32>, vector<16x128xf32>, vector<16x128xf32> -> vector<64x128xf32>
    %c176 = arith.constant 176 : index
    %c0_5 = arith.constant 0 : index
    %8 = vector.load %arg3[%c176, %c0_5] : memref<352x128xf32, #tpu.memory_space<vmem>>, vector<64x128xf32>
    %9 = arith.mulf %7, %8 : vector<64x128xf32>
    %c48 = arith.constant 48 : index
    %c0_6 = arith.constant 0 : index
    %10 = vector.load %arg3[%c48, %c0_6] : memref<352x128xf32, #tpu.memory_space<vmem>>, vector<128x64xf32>
    %cst_7 = arith.constant dense<0.000000e+00> : vector<16x64xf32>
    %11 = tpu.matmul %4, %10, %cst_7 {dimension_numbers = #tpu.dot_dimension_numbers<[1], [0], [0], [1], [0, 0, 1, 1], [], []>} : vector<16x128xf32>, vector<128x64xf32>, vector<16x64xf32> -> vector<16x64xf32>
    %c40 = arith.constant 40 : index
    %c0_8 = arith.constant 0 : index
    %12 = vector.load %arg3[%c40, %c0_8] : memref<352x128xf32, #tpu.memory_space<vmem>>, vector<1x128xf32>
    %cst_9 = arith.constant dense<0.000000e+00> : vector<1x64xf32>
    %13 = tpu.matmul %12, %9, %cst_9 {dimension_numbers = #tpu.dot_dimension_numbers<[1], [1], [0], [0], [0, 0, 1, 0], [], []>} : vector<1x128xf32>, vector<64x128xf32>, vector<1x64xf32> -> vector<1x64xf32>
    %14 = vector.broadcast %13 : vector<1x64xf32> to vector<16x64xf32>
    %15 = arith.addf %11, %14 : vector<16x64xf32>
    %cst_10 = arith.constant 2.000000e-01 : f32
    %16 = vector.broadcast %cst_10 : f32 to vector<16x64xf32>
    %17 = arith.mulf %16, %15 : vector<16x64xf32>
    %18 = arith.maximumf %15, %17 : vector<16x64xf32>
    %c240 = arith.constant 240 : index
    %c0_11 = arith.constant 0 : index
    %19 = vector.load %arg3[%c240, %c0_11] : memref<352x128xf32, #tpu.memory_space<vmem>>, vector<16x64xf32>
    %20 = arith.addf %18, %19 : vector<16x64xf32>
    %cst_12 = arith.constant dense<0xFF800000> : vector<16xf32>
    %21 = vector.multi_reduction <maximumf>, %20, %cst_12 [1] : vector<16x64xf32> to vector<16xf32>
    %22 = vector.shape_cast %21 : vector<16xf32> to vector<16x1xf32>
    %23 = vector.broadcast %22 : vector<16x1xf32> to vector<16x64xf32>
    %24 = arith.subf %20, %23 : vector<16x64xf32>
    %25 = math.exp %24 : vector<16x64xf32>
    %c256 = arith.constant 256 : index
    %c0_13 = arith.constant 0 : index
    %26 = vector.load %arg3[%c256, %c0_13] : memref<352x128xf32, #tpu.memory_space<vmem>>, vector<64x64xf32>
    %cst_14 = arith.constant dense<0.000000e+00> : vector<16x64xf32>
    %27 = tpu.matmul %25, %26, %cst_14 {dimension_numbers = #tpu.dot_dimension_numbers<[1], [0], [0], [1], [0, 0, 1, 1], [], []>} : vector<16x64xf32>, vector<64x64xf32>, vector<16x64xf32> -> vector<16x64xf32>
    %cst_15 = arith.constant 1.000000e-30 : f32
    %28 = vector.broadcast %cst_15 : f32 to vector<16x64xf32>
    %29 = arith.addf %27, %28 : vector<16x64xf32>
    %30 = tpu.reciprocal %29 {approx = true} : vector<16x64xf32> -> vector<16x64xf32>
    %31 = arith.mulf %25, %30 : vector<16x64xf32>
    %cst_16 = arith.constant dense<0.000000e+00> : vector<16x128xf32>
    %32 = tpu.matmul %31, %9, %cst_16 {dimension_numbers = #tpu.dot_dimension_numbers<[1], [0], [0], [1], [0, 0, 1, 1], [], []>} : vector<16x64xf32>, vector<64x128xf32>, vector<16x128xf32> -> vector<16x128xf32>
    %33 = arith.addf %32, %6 : vector<16x128xf32>
    %c32 = arith.constant 32 : index
    %c0_17 = arith.constant 0 : index
    %34 = vector.load %arg3[%c32, %c0_17] : memref<352x128xf32, #tpu.memory_space<vmem>>, vector<1x128xf32>
    %35 = vector.broadcast %34 : vector<1x128xf32> to vector<16x128xf32>
    %36 = arith.addf %33, %35 : vector<16x128xf32>
    %cst_18 = arith.constant 0.000000e+00 : f32
    %37 = vector.broadcast %cst_18 : f32 to vector<16x128xf32>
    %38 = arith.cmpf ogt, %36, %37 : vector<16x128xf32>
    %cst_19 = arith.constant 0.000000e+00 : f32
    %39 = vector.broadcast %cst_19 : f32 to vector<16x128xf32>
    %40 = arith.minimumf %36, %39 : vector<16x128xf32>
    %41 = math.exp %40 : vector<16x128xf32>
    %cst_20 = arith.constant 1.000000e+00 : f32
    %42 = vector.broadcast %cst_20 : f32 to vector<16x128xf32>
    %43 = arith.subf %41, %42 : vector<16x128xf32>
    %44 = arith.select %38, %36, %43 : vector<16x128xi1>, vector<16x128xf32>
    %c0_21 = arith.constant 0 : index
    %c0_22 = arith.constant 0 : index
    %45 = vector.load %arg4[%c0_21, %c0_22] : memref<416x128xf32, #tpu.memory_space<vmem>>, vector<128x128xf32>
    %cst_23 = arith.constant dense<0.000000e+00> : vector<16x128xf32>
    %46 = tpu.matmul %44, %45, %cst_23 {dimension_numbers = #tpu.dot_dimension_numbers<[1], [0], [0], [1], [0, 0, 1, 1], [], []>} : vector<16x128xf32>, vector<128x128xf32>, vector<16x128xf32> -> vector<16x128xf32>
    %47 = tpu.concatenate %46, %46, %46, %46 in 0 : vector<16x128xf32>, vector<16x128xf32>, vector<16x128xf32>, vector<16x128xf32> -> vector<64x128xf32>
    %c272 = arith.constant 272 : index
    %c0_24 = arith.constant 0 : index
    %48 = vector.load %arg4[%c272, %c0_24] : memref<416x128xf32, #tpu.memory_space<vmem>>, vector<64x128xf32>
    %49 = arith.mulf %47, %48 : vector<64x128xf32>
    %c144 = arith.constant 144 : index
    %c0_25 = arith.constant 0 : index
    %50 = vector.load %arg4[%c144, %c0_25] : memref<416x128xf32, #tpu.memory_space<vmem>>, vector<128x64xf32>
    %cst_26 = arith.constant dense<0.000000e+00> : vector<16x64xf32>
    %51 = tpu.matmul %46, %50, %cst_26 {dimension_numbers = #tpu.dot_dimension_numbers<[1], [0], [0], [1], [0, 0, 1, 1], [], []>} : vector<16x128xf32>, vector<128x64xf32>, vector<16x64xf32> -> vector<16x64xf32>
    %c136 = arith.constant 136 : index
    %c0_27 = arith.constant 0 : index
    %52 = vector.load %arg4[%c136, %c0_27] : memref<416x128xf32, #tpu.memory_space<vmem>>, vector<1x128xf32>
    %cst_28 = arith.constant dense<0.000000e+00> : vector<1x64xf32>
    %53 = tpu.matmul %52, %49, %cst_28 {dimension_numbers = #tpu.dot_dimension_numbers<[1], [1], [0], [0], [0, 0, 1, 0], [], []>} : vector<1x128xf32>, vector<64x128xf32>, vector<1x64xf32> -> vector<1x64xf32>
    %54 = vector.broadcast %53 : vector<1x64xf32> to vector<16x64xf32>
    %55 = arith.addf %51, %54 : vector<16x64xf32>
    %cst_29 = arith.constant 2.000000e-01 : f32
    %56 = vector.broadcast %cst_29 : f32 to vector<16x64xf32>
    %57 = arith.mulf %56, %55 : vector<16x64xf32>
    %58 = arith.maximumf %55, %57 : vector<16x64xf32>
    %c336 = arith.constant 336 : index
    %c0_30 = arith.constant 0 : index
    %59 = vector.load %arg4[%c336, %c0_30] : memref<416x128xf32, #tpu.memory_space<vmem>>, vector<16x64xf32>
    %60 = arith.addf %58, %59 : vector<16x64xf32>
    %cst_31 = arith.constant dense<0xFF800000> : vector<16xf32>
    %61 = vector.multi_reduction <maximumf>, %60, %cst_31 [1] : vector<16x64xf32> to vector<16xf32>
    %62 = vector.shape_cast %61 : vector<16xf32> to vector<16x1xf32>
    %63 = vector.broadcast %62 : vector<16x1xf32> to vector<16x64xf32>
    %64 = arith.subf %60, %63 : vector<16x64xf32>
    %65 = math.exp %64 : vector<16x64xf32>
    %c352 = arith.constant 352 : index
    %c0_32 = arith.constant 0 : index
    %66 = vector.load %arg4[%c352, %c0_32] : memref<416x128xf32, #tpu.memory_space<vmem>>, vector<64x64xf32>
    %cst_33 = arith.constant dense<0.000000e+00> : vector<16x64xf32>
    %67 = tpu.matmul %65, %66, %cst_33 {dimension_numbers = #tpu.dot_dimension_numbers<[1], [0], [0], [1], [0, 0, 1, 1], [], []>} : vector<16x64xf32>, vector<64x64xf32>, vector<16x64xf32> -> vector<16x64xf32>
    %cst_34 = arith.constant 1.000000e-30 : f32
    %68 = vector.broadcast %cst_34 : f32 to vector<16x64xf32>
    %69 = arith.addf %67, %68 : vector<16x64xf32>
    %70 = tpu.reciprocal %69 {approx = true} : vector<16x64xf32> -> vector<16x64xf32>
    %71 = arith.mulf %65, %70 : vector<16x64xf32>
    %cst_35 = arith.constant dense<0.000000e+00> : vector<16x128xf32>
    %72 = tpu.matmul %71, %49, %cst_35 {dimension_numbers = #tpu.dot_dimension_numbers<[1], [0], [0], [1], [0, 0, 1, 1], [], []>} : vector<16x64xf32>, vector<64x128xf32>, vector<16x128xf32> -> vector<16x128xf32>
    %73 = arith.addf %72, %44 : vector<16x128xf32>
    %c128 = arith.constant 128 : index
    %c0_36 = arith.constant 0 : index
    %74 = vector.load %arg4[%c128, %c0_36] : memref<416x128xf32, #tpu.memory_space<vmem>>, vector<1x128xf32>
    %75 = vector.broadcast %74 : vector<1x128xf32> to vector<16x128xf32>
    %76 = arith.addf %73, %75 : vector<16x128xf32>
    %cst_37 = arith.constant 0.000000e+00 : f32
    %77 = vector.broadcast %cst_37 : f32 to vector<16x128xf32>
    %78 = arith.cmpf ogt, %76, %77 : vector<16x128xf32>
    %cst_38 = arith.constant 0.000000e+00 : f32
    %79 = vector.broadcast %cst_38 : f32 to vector<16x128xf32>
    %80 = arith.minimumf %76, %79 : vector<16x128xf32>
    %81 = math.exp %80 : vector<16x128xf32>
    %cst_39 = arith.constant 1.000000e+00 : f32
    %82 = vector.broadcast %cst_39 : f32 to vector<16x128xf32>
    %83 = arith.subf %81, %82 : vector<16x128xf32>
    %84 = arith.select %78, %76, %83 : vector<16x128xi1>, vector<16x128xf32>
    %c0_40 = arith.constant 0 : index
    %c0_41 = arith.constant 0 : index
    %85 = vector.load %arg5[%c0_40, %c0_41] : memref<544x128xf32, #tpu.memory_space<vmem>>, vector<128x128xf32>
    %cst_42 = arith.constant dense<0.000000e+00> : vector<16x128xf32>
    %86 = tpu.matmul %84, %85, %cst_42 {dimension_numbers = #tpu.dot_dimension_numbers<[1], [0], [0], [1], [0, 0, 1, 1], [], []>} : vector<16x128xf32>, vector<128x128xf32>, vector<16x128xf32> -> vector<16x128xf32>
    %87 = tpu.concatenate %86, %86, %86, %86 in 0 : vector<16x128xf32>, vector<16x128xf32>, vector<16x128xf32>, vector<16x128xf32> -> vector<64x128xf32>
    %c272_43 = arith.constant 272 : index
    %c0_44 = arith.constant 0 : index
    %88 = vector.load %arg5[%c272_43, %c0_44] : memref<544x128xf32, #tpu.memory_space<vmem>>, vector<64x128xf32>
    %89 = arith.mulf %87, %88 : vector<64x128xf32>
    %c144_45 = arith.constant 144 : index
    %c0_46 = arith.constant 0 : index
    %90 = vector.load %arg5[%c144_45, %c0_46] : memref<544x128xf32, #tpu.memory_space<vmem>>, vector<128x64xf32>
    %cst_47 = arith.constant dense<0.000000e+00> : vector<16x64xf32>
    %91 = tpu.matmul %86, %90, %cst_47 {dimension_numbers = #tpu.dot_dimension_numbers<[1], [0], [0], [1], [0, 0, 1, 1], [], []>} : vector<16x128xf32>, vector<128x64xf32>, vector<16x64xf32> -> vector<16x64xf32>
    %c136_48 = arith.constant 136 : index
    %c0_49 = arith.constant 0 : index
    %92 = vector.load %arg5[%c136_48, %c0_49] : memref<544x128xf32, #tpu.memory_space<vmem>>, vector<1x128xf32>
    %cst_50 = arith.constant dense<0.000000e+00> : vector<1x64xf32>
    %93 = tpu.matmul %92, %89, %cst_50 {dimension_numbers = #tpu.dot_dimension_numbers<[1], [1], [0], [0], [0, 0, 1, 0], [], []>} : vector<1x128xf32>, vector<64x128xf32>, vector<1x64xf32> -> vector<1x64xf32>
    %94 = vector.broadcast %93 : vector<1x64xf32> to vector<16x64xf32>
    %95 = arith.addf %91, %94 : vector<16x64xf32>
    %cst_51 = arith.constant 2.000000e-01 : f32
    %96 = vector.broadcast %cst_51 : f32 to vector<16x64xf32>
    %97 = arith.mulf %96, %95 : vector<16x64xf32>
    %98 = arith.maximumf %95, %97 : vector<16x64xf32>
    %c336_52 = arith.constant 336 : index
    %c0_53 = arith.constant 0 : index
    %99 = vector.load %arg5[%c336_52, %c0_53] : memref<544x128xf32, #tpu.memory_space<vmem>>, vector<16x64xf32>
    %100 = arith.addf %98, %99 : vector<16x64xf32>
    %cst_54 = arith.constant dense<0xFF800000> : vector<16xf32>
    %101 = vector.multi_reduction <maximumf>, %100, %cst_54 [1] : vector<16x64xf32> to vector<16xf32>
    %102 = vector.shape_cast %101 : vector<16xf32> to vector<16x1xf32>
    %103 = vector.broadcast %102 : vector<16x1xf32> to vector<16x64xf32>
    %104 = arith.subf %100, %103 : vector<16x64xf32>
    %105 = math.exp %104 : vector<16x64xf32>
    %c352_55 = arith.constant 352 : index
    %c0_56 = arith.constant 0 : index
    %106 = vector.load %arg5[%c352_55, %c0_56] : memref<544x128xf32, #tpu.memory_space<vmem>>, vector<64x64xf32>
    %cst_57 = arith.constant dense<0.000000e+00> : vector<16x64xf32>
    %107 = tpu.matmul %105, %106, %cst_57 {dimension_numbers = #tpu.dot_dimension_numbers<[1], [0], [0], [1], [0, 0, 1, 1], [], []>} : vector<16x64xf32>, vector<64x64xf32>, vector<16x64xf32> -> vector<16x64xf32>
    %cst_58 = arith.constant 1.000000e-30 : f32
    %108 = vector.broadcast %cst_58 : f32 to vector<16x64xf32>
    %109 = arith.addf %107, %108 : vector<16x64xf32>
    %110 = tpu.reciprocal %109 {approx = true} : vector<16x64xf32> -> vector<16x64xf32>
    %111 = arith.mulf %105, %110 : vector<16x64xf32>
    %cst_59 = arith.constant dense<0.000000e+00> : vector<16x128xf32>
    %112 = tpu.matmul %111, %89, %cst_59 {dimension_numbers = #tpu.dot_dimension_numbers<[1], [0], [0], [1], [0, 0, 1, 1], [], []>} : vector<16x64xf32>, vector<64x128xf32>, vector<16x128xf32> -> vector<16x128xf32>
    %113 = arith.addf %112, %84 : vector<16x128xf32>
    %c128_60 = arith.constant 128 : index
    %c0_61 = arith.constant 0 : index
    %114 = vector.load %arg5[%c128_60, %c0_61] : memref<544x128xf32, #tpu.memory_space<vmem>>, vector<1x128xf32>
    %115 = vector.broadcast %114 : vector<1x128xf32> to vector<16x128xf32>
    %116 = arith.addf %113, %115 : vector<16x128xf32>
    %c416 = arith.constant 416 : index
    %c0_62 = arith.constant 0 : index
    %117 = vector.load %arg5[%c416, %c0_62] : memref<544x128xf32, #tpu.memory_space<vmem>>, vector<128x32xf32>
    %cst_63 = arith.constant dense<0.000000e+00> : vector<16x32xf32>
    %118 = tpu.matmul %116, %117, %cst_63 {dimension_numbers = #tpu.dot_dimension_numbers<[1], [0], [0], [1], [0, 0, 1, 1], [], []>} : vector<16x128xf32>, vector<128x32xf32>, vector<16x32xf32> -> vector<16x32xf32>
    %c0_64 = arith.constant 0 : index
    %c0_65 = arith.constant 0 : index
    %119 = vector.load %arg2[%c0_64, %c0_65] : memref<552x128xf32, #tpu.memory_space<vmem>>, vector<2x16xf32>
    %c8 = arith.constant 8 : index
    %c0_66 = arith.constant 0 : index
    %120 = vector.load %arg2[%c8, %c0_66] : memref<552x128xf32, #tpu.memory_space<vmem>>, vector<16x2xf32>
    %c24 = arith.constant 24 : index
    %c0_67 = arith.constant 0 : index
    %121 = vector.load %arg2[%c24, %c0_67] : memref<552x128xf32, #tpu.memory_space<vmem>>, vector<1x32xf32>
    %c32_68 = arith.constant 32 : index
    %c0_69 = arith.constant 0 : index
    %122 = vector.load %arg2[%c32_68, %c0_69] : memref<552x128xf32, #tpu.memory_space<vmem>>, vector<1x1xf32>
    %123 = vector.broadcast %121 : vector<1x32xf32> to vector<16x32xf32>
    %124 = arith.mulf %118, %123 : vector<16x32xf32>
    %cst_70 = arith.constant dense<0.000000e+00> : vector<16xf32>
    %125 = vector.multi_reduction <add>, %124, %cst_70 [1] : vector<16x32xf32> to vector<16xf32>
    %126 = vector.shape_cast %125 : vector<16xf32> to vector<16x1xf32>
    %127 = vector.broadcast %122 : vector<1x1xf32> to vector<16x1xf32>
    %128 = arith.addf %126, %127 : vector<16x1xf32>
    %cst_71 = arith.constant 0.000000e+00 : f32
    %129 = vector.broadcast %cst_71 : f32 to vector<16x1xf32>
    %130 = arith.subf %129, %128 : vector<16x1xf32>
    %131 = math.exp %130 : vector<16x1xf32>
    %cst_72 = arith.constant 1.000000e+00 : f32
    %132 = vector.broadcast %cst_72 : f32 to vector<16x1xf32>
    %133 = arith.addf %132, %131 : vector<16x1xf32>
    %134 = tpu.reciprocal %133 {approx = true} : vector<16x1xf32> -> vector<16x1xf32>
    %135 = vector.broadcast %134 : vector<16x1xf32> to vector<16x32xf32>
    %136 = arith.mulf %118, %135 : vector<16x32xf32>
    %cst_73 = arith.constant dense<0.000000e+00> : vector<2x32xf32>
    %137 = tpu.matmul %119, %136, %cst_73 {dimension_numbers = #tpu.dot_dimension_numbers<[1], [0], [0], [1], [0, 0, 1, 1], [], []>} : vector<2x16xf32>, vector<16x32xf32>, vector<2x32xf32> -> vector<2x32xf32>
    %138 = vector.extract_strided_slice %120 {offsets = [0, 0], sizes = [16, 1], strides = [1, 1]} : vector<16x2xf32> to vector<16x1xf32>
    %139 = vector.broadcast %138 : vector<16x1xf32> to vector<16x32xf32>
    %140 = arith.addf %118, %139 : vector<16x32xf32>
    %cst_74 = arith.constant dense<0xFF800000> : vector<32xf32>
    %141 = vector.multi_reduction <maximumf>, %140, %cst_74 [0] : vector<16x32xf32> to vector<32xf32>
    %142 = vector.shape_cast %141 : vector<32xf32> to vector<1x32xf32>
    %143 = vector.extract_strided_slice %120 {offsets = [0, 1], sizes = [16, 1], strides = [1, 1]} : vector<16x2xf32> to vector<16x1xf32>
    %144 = vector.broadcast %143 : vector<16x1xf32> to vector<16x32xf32>
    %145 = arith.addf %118, %144 : vector<16x32xf32>
    %cst_75 = arith.constant dense<0xFF800000> : vector<32xf32>
    %146 = vector.multi_reduction <maximumf>, %145, %cst_75 [0] : vector<16x32xf32> to vector<32xf32>
    %147 = vector.shape_cast %146 : vector<32xf32> to vector<1x32xf32>
    %148 = tpu.concatenate %142, %147 in 0 : vector<1x32xf32>, vector<1x32xf32> -> vector<2x32xf32>
    %149 = tpu.concatenate %137, %148 in 1 : vector<2x32xf32>, vector<2x32xf32> -> vector<2x64xf32>
    %c0_i32_76 = arith.constant 0 : i32
    %150 = tpu.memref_slice %arg9[%c0_i32_76] : memref<1x!tpu.dma_semaphore, #tpu.memory_space<semaphore_mem>> -> memref<1x!tpu.dma_semaphore, #tpu.memory_space<semaphore_mem>>
    %151 = tpu.memref_squeeze %150 : memref<1x!tpu.dma_semaphore, #tpu.memory_space<semaphore_mem>> -> memref<!tpu.dma_semaphore, #tpu.memory_space<semaphore_mem>>
    tpu.wait_dma2 semaphore(%151 : memref<!tpu.dma_semaphore, #tpu.memory_space<semaphore_mem>>) src(%arg6 : memref<2304x64xbf16, #tpu.memory_space<any>>) dst(%arg8 : memref<2304x64xbf16, #tpu.memory_space<vmem>>)
    %c0_77 = arith.constant 0 : index
    %c0_78 = arith.constant 0 : index
    %152 = vector.load %arg1[%c0_77, %c0_78] : memref<2x2304xbf16, #tpu.memory_space<vmem>>, vector<2x2304xbf16>
    %c0_79 = arith.constant 0 : index
    %c0_80 = arith.constant 0 : index
    %153 = vector.load %arg8[%c0_79, %c0_80] : memref<2304x64xbf16, #tpu.memory_space<vmem>>, vector<2304x64xbf16>
    %cst_81 = arith.constant dense<0.000000e+00> : vector<2x64xf32>
    %154 = tpu.matmul %152, %153, %cst_81 {dimension_numbers = #tpu.dot_dimension_numbers<[1], [0], [0], [1], [0, 0, 1, 1], [], []>} : vector<2x2304xbf16>, vector<2304x64xbf16>, vector<2x64xf32> -> vector<2x64xf32>
    %c40_82 = arith.constant 40 : index
    %c0_83 = arith.constant 0 : index
    %155 = vector.load %arg2[%c40_82, %c0_83] : memref<552x128xf32, #tpu.memory_space<vmem>>, vector<1x64xf32>
    %156 = vector.broadcast %155 : vector<1x64xf32> to vector<2x64xf32>
    %157 = arith.addf %154, %156 : vector<2x64xf32>
    %cst_84 = arith.constant 0.000000e+00 : f32
    %158 = vector.broadcast %cst_84 : f32 to vector<2x64xf32>
    %159 = arith.maximumf %157, %158 : vector<2x64xf32>
    %c48_85 = arith.constant 48 : index
    %c0_86 = arith.constant 0 : index
    %160 = vector.load %arg2[%c48_85, %c0_86] : memref<552x128xf32, #tpu.memory_space<vmem>>, vector<64x32xf32>
    %cst_87 = arith.constant dense<0.000000e+00> : vector<2x32xf32>
    %161 = tpu.matmul %159, %160, %cst_87 {dimension_numbers = #tpu.dot_dimension_numbers<[1], [0], [0], [1], [0, 0, 1, 1], [], []>} : vector<2x64xf32>, vector<64x32xf32>, vector<2x32xf32> -> vector<2x32xf32>
    %c112 = arith.constant 112 : index
    %c0_88 = arith.constant 0 : index
    %162 = vector.load %arg2[%c112, %c0_88] : memref<552x128xf32, #tpu.memory_space<vmem>>, vector<1x32xf32>
    %163 = vector.broadcast %162 : vector<1x32xf32> to vector<2x32xf32>
    %164 = arith.addf %161, %163 : vector<2x32xf32>
    %c120 = arith.constant 120 : index
    %c0_89 = arith.constant 0 : index
    %165 = vector.load %arg2[%c120, %c0_89] : memref<552x128xf32, #tpu.memory_space<vmem>>, vector<64x32xf32>
    %cst_90 = arith.constant dense<0.000000e+00> : vector<2x32xf32>
    %166 = tpu.matmul %149, %165, %cst_90 {dimension_numbers = #tpu.dot_dimension_numbers<[1], [0], [0], [1], [0, 0, 1, 1], [], []>} : vector<2x64xf32>, vector<64x32xf32>, vector<2x32xf32> -> vector<2x32xf32>
    %c184 = arith.constant 184 : index
    %c0_91 = arith.constant 0 : index
    %167 = vector.load %arg2[%c184, %c0_91] : memref<552x128xf32, #tpu.memory_space<vmem>>, vector<1x32xf32>
    %168 = vector.broadcast %167 : vector<1x32xf32> to vector<2x32xf32>
    %169 = arith.addf %166, %168 : vector<2x32xf32>
    %cst_92 = arith.constant 0.000000e+00 : f32
    %170 = vector.broadcast %cst_92 : f32 to vector<2x32xf32>
    %171 = arith.maximumf %169, %170 : vector<2x32xf32>
    %c192 = arith.constant 192 : index
    %c0_93 = arith.constant 0 : index
    %172 = vector.load %arg2[%c192, %c0_93] : memref<552x128xf32, #tpu.memory_space<vmem>>, vector<32x32xf32>
    %cst_94 = arith.constant dense<0.000000e+00> : vector<2x32xf32>
    %173 = tpu.matmul %164, %172, %cst_94 {dimension_numbers = #tpu.dot_dimension_numbers<[1], [0], [0], [1], [0, 0, 1, 1], [], []>} : vector<2x32xf32>, vector<32x32xf32>, vector<2x32xf32> -> vector<2x32xf32>
    %c224 = arith.constant 224 : index
    %c0_95 = arith.constant 0 : index
    %174 = vector.load %arg2[%c224, %c0_95] : memref<552x128xf32, #tpu.memory_space<vmem>>, vector<1x32xf32>
    %175 = vector.broadcast %174 : vector<1x32xf32> to vector<2x32xf32>
    %176 = arith.addf %173, %175 : vector<2x32xf32>
    %cst_96 = arith.constant 0.000000e+00 : f32
    %177 = vector.broadcast %cst_96 : f32 to vector<2x32xf32>
    %178 = arith.maximumf %176, %177 : vector<2x32xf32>
    %179 = tpu.concatenate %171, %178 in 1 : vector<2x32xf32>, vector<2x32xf32> -> vector<2x64xf32>
    %c232 = arith.constant 232 : index
    %c0_97 = arith.constant 0 : index
    %180 = vector.load %arg2[%c232, %c0_97] : memref<552x128xf32, #tpu.memory_space<vmem>>, vector<64x128xf32>
    %cst_98 = arith.constant dense<0.000000e+00> : vector<2x128xf32>
    %181 = tpu.matmul %179, %180, %cst_98 {dimension_numbers = #tpu.dot_dimension_numbers<[1], [0], [0], [1], [0, 0, 1, 1], [], []>} : vector<2x64xf32>, vector<64x128xf32>, vector<2x128xf32> -> vector<2x128xf32>
    %c296 = arith.constant 296 : index
    %c0_99 = arith.constant 0 : index
    %182 = vector.load %arg2[%c296, %c0_99] : memref<552x128xf32, #tpu.memory_space<vmem>>, vector<1x128xf32>
    %183 = vector.broadcast %182 : vector<1x128xf32> to vector<2x128xf32>
    %184 = arith.addf %181, %183 : vector<2x128xf32>
    %cst_100 = arith.constant 0.000000e+00 : f32
    %185 = vector.broadcast %cst_100 : f32 to vector<2x128xf32>
    %186 = arith.maximumf %184, %185 : vector<2x128xf32>
    %c304 = arith.constant 304 : index
    %c0_101 = arith.constant 0 : index
    %187 = vector.load %arg2[%c304, %c0_101] : memref<552x128xf32, #tpu.memory_space<vmem>>, vector<128x64xf32>
    %cst_102 = arith.constant dense<0.000000e+00> : vector<2x64xf32>
    %188 = tpu.matmul %186, %187, %cst_102 {dimension_numbers = #tpu.dot_dimension_numbers<[1], [0], [0], [1], [0, 0, 1, 1], [], []>} : vector<2x128xf32>, vector<128x64xf32>, vector<2x64xf32> -> vector<2x64xf32>
    %c432 = arith.constant 432 : index
    %c0_103 = arith.constant 0 : index
    %189 = vector.load %arg2[%c432, %c0_103] : memref<552x128xf32, #tpu.memory_space<vmem>>, vector<1x64xf32>
    %190 = vector.broadcast %189 : vector<1x64xf32> to vector<2x64xf32>
    %191 = arith.addf %188, %190 : vector<2x64xf32>
    %c440 = arith.constant 440 : index
    %c0_104 = arith.constant 0 : index
    %192 = vector.load %arg2[%c440, %c0_104] : memref<552x128xf32, #tpu.memory_space<vmem>>, vector<64x32xf32>
    %cst_105 = arith.constant dense<0.000000e+00> : vector<2x32xf32>
    %193 = tpu.matmul %191, %192, %cst_105 {dimension_numbers = #tpu.dot_dimension_numbers<[1], [0], [0], [1], [0, 0, 1, 1], [], []>} : vector<2x64xf32>, vector<64x32xf32>, vector<2x32xf32> -> vector<2x32xf32>
    %c504 = arith.constant 504 : index
    %c0_106 = arith.constant 0 : index
    %194 = vector.load %arg2[%c504, %c0_106] : memref<552x128xf32, #tpu.memory_space<vmem>>, vector<1x32xf32>
    %195 = vector.broadcast %194 : vector<1x32xf32> to vector<2x32xf32>
    %196 = arith.addf %193, %195 : vector<2x32xf32>
    %cst_107 = arith.constant 0.000000e+00 : f32
    %197 = vector.broadcast %cst_107 : f32 to vector<2x32xf32>
    %198 = arith.maximumf %196, %197 : vector<2x32xf32>
    %c512 = arith.constant 512 : index
    %c0_108 = arith.constant 0 : index
    %199 = vector.load %arg2[%c512, %c0_108] : memref<552x128xf32, #tpu.memory_space<vmem>>, vector<32x1xf32>
    %cst_109 = arith.constant dense<0.000000e+00> : vector<2x1xf32>
    %200 = tpu.matmul %198, %199, %cst_109 {dimension_numbers = #tpu.dot_dimension_numbers<[1], [0], [0], [1], [0, 0, 1, 1], [], []>} : vector<2x32xf32>, vector<32x1xf32>, vector<2x1xf32> -> vector<2x1xf32>
    %c544 = arith.constant 544 : index
    %c0_110 = arith.constant 0 : index
    %201 = vector.load %arg2[%c544, %c0_110] : memref<552x128xf32, #tpu.memory_space<vmem>>, vector<1x1xf32>
    %202 = vector.broadcast %201 : vector<1x1xf32> to vector<2x1xf32>
    %203 = arith.addf %200, %202 : vector<2x1xf32>
    %cst_111 = arith.constant 0.000000e+00 : f32
    %204 = vector.broadcast %cst_111 : f32 to vector<2x63xf32>
    %205 = tpu.concatenate %191, %203, %204 in 1 : vector<2x64xf32>, vector<2x1xf32>, vector<2x63xf32> -> vector<2x128xf32>
    %c0_112 = arith.constant 0 : index
    %c0_113 = arith.constant 0 : index
    %206 = vector.load %arg7[%c0_112, %c0_113] : memref<2x128xf32, #tpu.memory_space<vmem>>, vector<2x128xf32>
    tpu.vector_store %arg7[%c0_112, %c0_113], %205 {strides = array<i32>} : memref<2x128xf32, #tpu.memory_space<vmem>>, vector<2x128xf32>,
    return
  }
}

</mosaic_0001>

<bundles_post_ra>
// kernel: _lambda_.1
= control target key start
LH: loop header
LB: loop body
LE: loop exit
PB: predicated region body
PF: predicated region fallthrough
CT: control target
= control target key end

     0   :  { %s6781_s0 = inlined_call_operand.vmem [shape: f32[16,32], index: 0, kind: input, shape index: {}]   ;;  %s6782_s1 = inlined_call_operand.vmem [shape: bf16[2,2304], index: 1, kind: input, shape index: {}]   ;;  %s6783_s2 = inlined_call_operand.vmem [shape: f32[552,128], index: 2, kind: input, shape index: {}]   ;;  %s6784_s3 = inlined_call_operand.vmem [shape: f32[352,128], index: 3, kind: input, shape index: {}]   ;;  %s6785_s4 = inlined_call_operand.vmem [shape: f32[416,128], index: 4, kind: input, shape index: {}]   ;;  %s6786_s5 = inlined_call_operand.vmem [shape: f32[544,128], index: 5, kind: input, shape index: {}]   ;;  %s6787_s6 = inlined_call_operand.vmem [shape: bf16[2304,64], index: 6, kind: input, shape index: {}]   ;;  %s6788_s7 = inlined_call_operand.vmem [shape: f32[2,128], index: 7, kind: output, shape index: {}]  }
   0x1   :  { %v5017_v0 = vld [vmem:[%s6787_s6] sm:$0xff]  ;;  %v5022_v1 = vld [vmem:[%s6787_s6 + $0x8] sm:$0xff]  ;;  %v5027_v2 = vld [vmem:[%s6787_s6 + $0x10] sm:$0xff] }
   0x2   :  { %v5032_v3 = vld [vmem:[%s6787_s6 + $0x18] sm:$0xff]  ;;  %v5037_v4 = vld [vmem:[%s6787_s6 + $0x20] sm:$0xff]  ;;  %v5042_v5 = vld [vmem:[%s6787_s6 + $0x28] sm:$0xff] }
   0x3   :  { %v5047_v6 = vld [vmem:[%s6787_s6 + $0x30] sm:$0xff]  ;;  %v5052_v7 = vld [vmem:[%s6787_s6 + $0x38] sm:$0xff]  ;;  %v5057_v8 = vld [vmem:[%s6787_s6 + $0x40] sm:$0xff] }
   0x4   :  { %v5062_v9 = vld [vmem:[%s6787_s6 + $0x48] sm:$0xff]  ;;  %v5067_v10 = vld [vmem:[%s6787_s6 + $0x50] sm:$0xff]  ;;  %v5072_v11 = vld [vmem:[%s6787_s6 + $0x58] sm:$0xff] }
   0x5   :  { %v5077_v12 = vld [vmem:[%s6787_s6 + $0x60] sm:$0xff]  ;;  %v5082_v13 = vld [vmem:[%s6787_s6 + $0x68] sm:$0xff]  ;;  %v5087_v14 = vld [vmem:[%s6787_s6 + $0x70] sm:$0xff] }
   0x6   :  { %v5092_v15 = vld [vmem:[%s6787_s6 + $0x78] sm:$0xff]  ;;  %v5097_v16 = vld [vmem:[%s6787_s6 + $0x80] sm:$0xff]  ;;  %v5102_v17 = vld [vmem:[%s6787_s6 + $0x88] sm:$0xff] }
   0x7   :  { %v5107_v18 = vld [vmem:[%s6787_s6 + $0x90] sm:$0xff]  ;;  %v5112_v19 = vld [vmem:[%s6787_s6 + $0x98] sm:$0xff]  ;;  %v5117_v20 = vld [vmem:[%s6787_s6 + $0xa0] sm:$0xff] }
   0x8   :  { %v5122_v21 = vld [vmem:[%s6787_s6 + $0xa8] sm:$0xff]  ;;  %v5127_v22 = vld [vmem:[%s6787_s6 + $0xb0] sm:$0xff]  ;;  %v5132_v23 = vld [vmem:[%s6787_s6 + $0xb8] sm:$0xff] }
   0x9   :  { %v5137_v24 = vld [vmem:[%s6787_s6 + $0xc0] sm:$0xff]  ;;  %v5142_v25 = vld [vmem:[%s6787_s6 + $0xc8] sm:$0xff]  ;;  %v5147_v26 = vld [vmem:[%s6787_s6 + $0xd0] sm:$0xff] }
   0xa   :  { %v5152_v27 = vld [vmem:[%s6787_s6 + $0xd8] sm:$0xff]  ;;  %v5157_v28 = vld [vmem:[%s6787_s6 + $0xe0] sm:$0xff]  ;;  %v5162_v29 = vld [vmem:[%s6787_s6 + $0xe8] sm:$0xff] }
   0xb   :  { %v5167_v30 = vld [vmem:[%s6787_s6 + $0xf0] sm:$0xff]  ;;  %v5172_v31 = vld [vmem:[%s6787_s6 + $0xf8] sm:$0xff]  ;;  %v5177_v32 = vld [vmem:[%s6787_s6 + $0x100] sm:$0xff] }
   0xc   :  { %v5182_v33 = vld [vmem:[%s6787_s6 + $0x108] sm:$0xff]  ;;  %v5187_v34 = vld [vmem:[%s6787_s6 + $0x110] sm:$0xff]  ;;  %v5192_v35 = vld [vmem:[%s6787_s6 + $0x118] sm:$0xff] }
   0xd   :  { %6793 = vst [vmem:[#allocation6_spill] sm:$0xff] %v5182_v33  ;;  %6794 = vst [vmem:[#allocation7_spill] sm:$0xff] %v5187_v34  ;;  %v5197_v36 = vld [vmem:[%s6787_s6 + $0x120] sm:$0xff]  ;;  %v5202_v37 = vld [vmem:[%s6787_s6 + $0x128] sm:$0xff] }
   0xe   :  { %6795 = vst [vmem:[#allocation8_spill] sm:$0xff] %v5192_v35  ;;  %6796 = vst [vmem:[#allocation9_spill] sm:$0xff] %v5197_v36  ;;  %v5207_v38 = vld [vmem:[%s6787_s6 + $0x130] sm:$0xff]  ;;  %v5212_v39 = vld [vmem:[%s6787_s6 + $0x138] sm:$0xff] }
   0xf   :  { %6797 = vst [vmem:[#allocation10_spill] sm:$0xff] %v5202_v37  ;;  %6798 = vst [vmem:[#allocation11_spill] sm:$0xff] %v5207_v38  ;;  %v5217_v40 = vld [vmem:[%s6787_s6 + $0x140] sm:$0xff]  ;;  %v5222_v41 = vld [vmem:[%s6787_s6 + $0x148] sm:$0xff] }
  0x10   :  { %6799 = vst [vmem:[#allocation12_spill] sm:$0xff] %v5212_v39  ;;  %6800 = vst [vmem:[#allocation13_spill] sm:$0xff] %v5222_v41  ;;  %v5227_v42 = vld [vmem:[%s6787_s6 + $0x150] sm:$0xff]  ;;  %v5232_v43 = vld [vmem:[%s6787_s6 + $0x158] sm:$0xff] }
  0x11   :  { %6801 = vst [vmem:[#allocation14_spill] sm:$0xff] %v5227_v42  ;;  %6802 = vst [vmem:[#allocation15_spill] sm:$0xff] %v5232_v43  ;;  %v5237_v44 = vld [vmem:[%s6787_s6 + $0x160] sm:$0xff]  ;;  %v5242_v45 = vld [vmem:[%s6787_s6 + $0x168] sm:$0xff] }
  0x12   :  { %6803 = vst [vmem:[#allocation16_spill] sm:$0xff] %v5237_v44  ;;  %6804 = vst [vmem:[#allocation17_spill] sm:$0xff] %v5242_v45  ;;  %v5247_v46 = vld [vmem:[%s6787_s6 + $0x170] sm:$0xff]  ;;  %v5252_v47 = vld [vmem:[%s6787_s6 + $0x178] sm:$0xff] }
  0x13   :  { %6805 = vst [vmem:[#allocation18_spill] sm:$0xff] %v5247_v46  ;;  %6806 = vst [vmem:[#allocation19_spill] sm:$0xff] %v5252_v47  ;;  %v5257_v48 = vld [vmem:[%s6787_s6 + $0x180] sm:$0xff]  ;;  %v5262_v49 = vld [vmem:[%s6787_s6 + $0x188] sm:$0xff] }
  0x14   :  { %6807 = vst [vmem:[#allocation20_spill] sm:$0xff] %v5257_v48  ;;  %6808 = vst [vmem:[#allocation21_spill] sm:$0xff] %v5262_v49  ;;  %v5267_v50 = vld [vmem:[%s6787_s6 + $0x190] sm:$0xff]  ;;  %v5272_v51 = vld [vmem:[%s6787_s6 + $0x198] sm:$0xff] }
  0x15   :  { %6809 = vst [vmem:[#allocation22_spill] sm:$0xff] %v5267_v50  ;;  %6810 = vst [vmem:[#allocation23_spill] sm:$0xff] %v5272_v51  ;;  %v5277_v52 = vld [vmem:[%s6787_s6 + $0x1a0] sm:$0xff]  ;;  %v5282_v53 = vld [vmem:[%s6787_s6 + $0x1a8] sm:$0xff] }
  0x16   :  { %6811 = vst [vmem:[#allocation24_spill] sm:$0xff] %v5277_v52  ;;  %6812 = vst [vmem:[#allocation25_spill] sm:$0xff] %v5282_v53  ;;  %v5287_v54 = vld [vmem:[%s6787_s6 + $0x1b0] sm:$0xff]  ;;  %v5292_v55 = vld [vmem:[%s6787_s6 + $0x1b8] sm:$0xff] }
  0x17   :  { %6813 = vst [vmem:[#allocation26_spill] sm:$0xff] %v5287_v54  ;;  %6814 = vst [vmem:[#allocation27_spill] sm:$0xff] %v5292_v55  ;;  %v5297_v56 = vld [vmem:[%s6787_s6 + $0x1c0] sm:$0xff]  ;;  %v5302_v57 = vld [vmem:[%s6787_s6 + $0x1c8] sm:$0xff] }
  0x18   :  { %6815 = vst [vmem:[#allocation28_spill] sm:$0xff] %v5302_v57  ;;  %v5307_v58 = vld [vmem:[%s6787_s6 + $0x1d0] sm:$0xff]  ;;  %v5312_v59 = vld [vmem:[%s6787_s6 + $0x1d8] sm:$0xff]  ;;  %v5317_v60 = vld [vmem:[%s6787_s6 + $0x1e0] sm:$0xff] }
  0x19   :  { %6816 = vst [vmem:[#allocation29_spill] sm:$0xff] %v5307_v58  ;;  %6817 = vst [vmem:[#allocation30_spill] sm:$0xff] %v5312_v59  ;;  %v5322_v61 = vld [vmem:[%s6787_s6 + $0x1e8] sm:$0xff]  ;;  %v5327_v62 = vld [vmem:[%s6787_s6 + $0x1f0] sm:$0xff] }
  0x1a   :  { %6818 = vst [vmem:[#allocation31_spill] sm:$0xff] %v5317_v60  ;;  %6819 = vst [vmem:[#allocation32_spill] sm:$0xff] %v5322_v61  ;;  %v5332_v63 = vld [vmem:[%s6787_s6 + $0x1f8] sm:$0xff]  ;;  %v5337_v55 = vld [vmem:[%s6787_s6 + $0x200] sm:$0xff] }
  0x1b   :  { %6820 = vst [vmem:[#allocation33_spill] sm:$0xff] %v5327_v62  ;;  %6821 = vst [vmem:[#allocation34_spill] sm:$0xff] %v5332_v63  ;;  %v5342_v39 = vld [vmem:[%s6787_s6 + $0x208] sm:$0xff]  ;;  %v5347_v47 = vld [vmem:[%s6787_s6 + $0x210] sm:$0xff] }
  0x1c   :  { %6822 = vst [vmem:[#allocation35_spill] sm:$0xff] %v5337_v55  ;;  %6823 = vst [vmem:[#allocation36_spill] sm:$0xff] %v5342_v39  ;;  %v5352_v54 = vld [vmem:[%s6787_s6 + $0x218] sm:$0xff]  ;;  %v5357_v63 = vld [vmem:[%s6787_s6 + $0x220] sm:$0xff] }
  0x1d   :  { %6824 = vst [vmem:[#allocation37_spill] sm:$0xff] %v5347_v47  ;;  %6825 = vst [vmem:[#allocation38_spill] sm:$0xff] %v5352_v54  ;;  %v5362_v55 = vld [vmem:[%s6787_s6 + $0x228] sm:$0xff]  ;;  %v5367_v39 = vld [vmem:[%s6787_s6 + $0x230] sm:$0xff] }
  0x1e   :  { %6826 = vst [vmem:[#allocation39_spill] sm:$0xff] %v5357_v63  ;;  %6827 = vst [vmem:[#allocation40_spill] sm:$0xff] %v5362_v55  ;;  %v5372_v47 = vld [vmem:[%s6787_s6 + $0x238] sm:$0xff]  ;;  %v5377_v54 = vld [vmem:[%s6787_s6 + $0x240] sm:$0xff] }
  0x1f   :  { %6828 = vst [vmem:[#allocation41_spill] sm:$0xff] %v5367_v39  ;;  %6829 = vst [vmem:[#allocation42_spill] sm:$0xff] %v5372_v47  ;;  %v5382_v63 = vld [vmem:[%s6787_s6 + $0x248] sm:$0xff]  ;;  %v5387_v55 = vld [vmem:[%s6787_s6 + $0x250] sm:$0xff] }
  0x20   :  { %6830 = vst [vmem:[#allocation43_spill] sm:$0xff] %v5377_v54  ;;  %6831 = vst [vmem:[#allocation44_spill] sm:$0xff] %v5382_v63  ;;  %v5392_v39 = vld [vmem:[%s6787_s6 + $0x258] sm:$0xff]  ;;  %v5397_v47 = vld [vmem:[%s6787_s6 + $0x260] sm:$0xff] }
  0x21   :  { %6832 = vst [vmem:[#allocation45_spill] sm:$0xff] %v5387_v55  ;;  %6833 = vst [vmem:[#allocation46_spill] sm:$0xff] %v5392_v39  ;;  %v5402_v54 = vld [vmem:[%s6787_s6 + $0x268] sm:$0xff]  ;;  %v5407_v63 = vld [vmem:[%s6787_s6 + $0x270] sm:$0xff] }
  0x22   :  { %6834 = vst [vmem:[#allocation47_spill] sm:$0xff] %v5397_v47  ;;  %6835 = vst [vmem:[#allocation48_spill] sm:$0xff] %v5402_v54  ;;  %v5412_v55 = vld [vmem:[%s6787_s6 + $0x278] sm:$0xff]  ;;  %v5417_v39 = vld [vmem:[%s6787_s6 + $0x280] sm:$0xff] }
  0x23   :  { %6836 = vst [vmem:[#allocation49_spill] sm:$0xff] %v5407_v63  ;;  %6837 = vst [vmem:[#allocation50_spill] sm:$0xff] %v5412_v55  ;;  %v5422_v47 = vld [vmem:[%s6787_s6 + $0x288] sm:$0xff]  ;;  %v5427_v54 = vld [vmem:[%s6787_s6 + $0x290] sm:$0xff] }
  0x24   :  { %6838 = vst [vmem:[#allocation51_spill] sm:$0xff] %v5417_v39  ;;  %6839 = vst [vmem:[#allocation52_spill] sm:$0xff] %v5422_v47  ;;  %v5432_v63 = vld [vmem:[%s6787_s6 + $0x298] sm:$0xff]  ;;  %v5437_v55 = vld [vmem:[%s6787_s6 + $0x2a0] sm:$0xff] }
  0x25   :  { %6840 = vst [vmem:[#allocation53_spill] sm:$0xff] %v5427_v54  ;;  %6841 = vst [vmem:[#allocation54_spill] sm:$0xff] %v5432_v63  ;;  %v5442_v39 = vld [vmem:[%s6787_s6 + $0x2a8] sm:$0xff]  ;;  %v5447_v47 = vld [vmem:[%s6787_s6 + $0x2b0] sm:$0xff] }
  0x26   :  { %6842 = vst [vmem:[#allocation55_spill] sm:$0xff] %v5437_v55  ;;  %6843 = vst [vmem:[#allocation56_spill] sm:$0xff] %v5442_v39  ;;  %v5452_v54 = vld [vmem:[%s6787_s6 + $0x2b8] sm:$0xff]  ;;  %v5457_v63 = vld [vmem:[%s6787_s6 + $0x2c0] sm:$0xff] }
  0x27   :  { %6844 = vst [vmem:[#allocation57_spill] sm:$0xff] %v5447_v47  ;;  %6845 = vst [vmem:[#allocation58_spill] sm:$0xff] %v5452_v54  ;;  %v5462_v55 = vld [vmem:[%s6787_s6 + $0x2c8] sm:$0xff]  ;;  %v5467_v39 = vld [vmem:[%s6787_s6 + $0x2d0] sm:$0xff] }
  0x28   :  { %6846 = vst [vmem:[#allocation59_spill] sm:$0xff] %v5457_v63  ;;  %6847 = vst [vmem:[#allocation60_spill] sm:$0xff] %v5462_v55  ;;  %v5472_v47 = vld [vmem:[%s6787_s6 + $0x2d8] sm:$0xff]  ;;  %v5477_v54 = vld [vmem:[%s6787_s6 + $0x2e0] sm:$0xff] }
  0x29   :  { %6848 = vst [vmem:[#allocation61_spill] sm:$0xff] %v5467_v39  ;;  %6849 = vst [vmem:[#allocation62_spill] sm:$0xff] %v5472_v47  ;;  %v5482_v63 = vld [vmem:[%s6787_s6 + $0x2e8] sm:$0xff]  ;;  %v5487_v55 = vld [vmem:[%s6787_s6 + $0x2f0] sm:$0xff] }
  0x2a   :  { %6850 = vst [vmem:[#allocation63_spill] sm:$0xff] %v5477_v54  ;;  %6851 = vst [vmem:[#allocation64_spill] sm:$0xff] %v5482_v63  ;;  %v5492_v39 = vld [vmem:[%s6787_s6 + $0x2f8] sm:$0xff]  ;;  %v5497_v47 = vld [vmem:[%s6787_s6 + $0x300] sm:$0xff] }
  0x2b   :  { %6852 = vst [vmem:[#allocation65_spill] sm:$0xff] %v5487_v55  ;;  %6853 = vst [vmem:[#allocation66_spill] sm:$0xff] %v5492_v39  ;;  %v5502_v54 = vld [vmem:[%s6787_s6 + $0x308] sm:$0xff]  ;;  %v5507_v63 = vld [vmem:[%s6787_s6 + $0x310] sm:$0xff] }
  0x2c   :  { %6854 = vst [vmem:[#allocation67_spill] sm:$0xff] %v5497_v47  ;;  %6855 = vst [vmem:[#allocation68_spill] sm:$0xff] %v5502_v54  ;;  %v5512_v55 = vld [vmem:[%s6787_s6 + $0x318] sm:$0xff]  ;;  %v5517_v39 = vld [vmem:[%s6787_s6 + $0x320] sm:$0xff] }
  0x2d   :  { %6856 = vst [vmem:[#allocation69_spill] sm:$0xff] %v5507_v63  ;;  %6857 = vst [vmem:[#allocation70_spill] sm:$0xff] %v5512_v55  ;;  %v5522_v47 = vld [vmem:[%s6787_s6 + $0x328] sm:$0xff]  ;;  %v5527_v54 = vld [vmem:[%s6787_s6 + $0x330] sm:$0xff] }
  0x2e   :  { %6858 = vst [vmem:[#allocation71_spill] sm:$0xff] %v5517_v39  ;;  %6859 = vst [vmem:[#allocation72_spill] sm:$0xff] %v5522_v47  ;;  %v5532_v63 = vld [vmem:[%s6787_s6 + $0x338] sm:$0xff]  ;;  %v5537_v55 = vld [vmem:[%s6787_s6 + $0x340] sm:$0xff] }
  0x2f   :  { %6860 = vst [vmem:[#allocation73_spill] sm:$0xff] %v5527_v54  ;;  %6861 = vst [vmem:[#allocation74_spill] sm:$0xff] %v5532_v63  ;;  %v5542_v39 = vld [vmem:[%s6787_s6 + $0x348] sm:$0xff]  ;;  %v5547_v47 = vld [vmem:[%s6787_s6 + $0x350] sm:$0xff] }
  0x30   :  { %6862 = vst [vmem:[#allocation75_spill] sm:$0xff] %v5537_v55  ;;  %6863 = vst [vmem:[#allocation76_spill] sm:$0xff] %v5542_v39  ;;  %v5552_v54 = vld [vmem:[%s6787_s6 + $0x358] sm:$0xff]  ;;  %v5557_v63 = vld [vmem:[%s6787_s6 + $0x360] sm:$0xff] }
  0x31   :  { %6864 = vst [vmem:[#allocation77_spill] sm:$0xff] %v5547_v47  ;;  %6865 = vst [vmem:[#allocation78_spill] sm:$0xff] %v5552_v54  ;;  %v5562_v55 = vld [vmem:[%s6787_s6 + $0x368] sm:$0xff]  ;;  %v5567_v39 = vld [vmem:[%s6787_s6 + $0x370] sm:$0xff] }
  0x32   :  { %6866 = vst [vmem:[#allocation79_spill] sm:$0xff] %v5557_v63  ;;  %6867 = vst [vmem:[#allocation80_spill] sm:$0xff] %v5562_v55  ;;  %v5572_v47 = vld [vmem:[%s6787_s6 + $0x378] sm:$0xff]  ;;  %v5577_v54 = vld [vmem:[%s6787_s6 + $0x380] sm:$0xff] }
  0x33   :  { %6868 = vst [vmem:[#allocation81_spill] sm:$0xff] %v5567_v39  ;;  %6869 = vst [vmem:[#allocation82_spill] sm:$0xff] %v5572_v47  ;;  %v5582_v63 = vld [vmem:[%s6787_s6 + $0x388] sm:$0xff]  ;;  %v5587_v55 = vld [vmem:[%s6787_s6 + $0x390] sm:$0xff] }
  0x34   :  { %6870 = vst [vmem:[#allocation83_spill] sm:$0xff] %v5577_v54  ;;  %6871 = vst [vmem:[#allocation84_spill] sm:$0xff] %v5582_v63  ;;  %v5592_v39 = vld [vmem:[%s6787_s6 + $0x398] sm:$0xff]  ;;  %v5597_v47 = vld [vmem:[%s6787_s6 + $0x3a0] sm:$0xff] }
  0x35   :  { %6872 = vst [vmem:[#allocation85_spill] sm:$0xff] %v5587_v55  ;;  %6873 = vst [vmem:[#allocation86_spill] sm:$0xff] %v5592_v39  ;;  %v5602_v54 = vld [vmem:[%s6787_s6 + $0x3a8] sm:$0xff]  ;;  %v5607_v63 = vld [vmem:[%s6787_s6 + $0x3b0] sm:$0xff] }
  0x36   :  { %6874 = vst [vmem:[#allocation87_spill] sm:$0xff] %v5597_v47  ;;  %6875 = vst [vmem:[#allocation88_spill] sm:$0xff] %v5602_v54  ;;  %v5612_v55 = vld [vmem:[%s6787_s6 + $0x3b8] sm:$0xff]  ;;  %v5617_v39 = vld [vmem:[%s6787_s6 + $0x3c0] sm:$0xff] }
  0x37   :  { %6876 = vst [vmem:[#allocation89_spill] sm:$0xff] %v5607_v63  ;;  %6877 = vst [vmem:[#allocation90_spill] sm:$0xff] %v5612_v55  ;;  %v5622_v47 = vld [vmem:[%s6787_s6 + $0x3c8] sm:$0xff]  ;;  %v5627_v54 = vld [vmem:[%s6787_s6 + $0x3d0] sm:$0xff] }
  0x38   :  { %6878 = vst [vmem:[#allocation91_spill] sm:$0xff] %v5617_v39  ;;  %6879 = vst [vmem:[#allocation92_spill] sm:$0xff] %v5622_v47  ;;  %v5632_v63 = vld [vmem:[%s6787_s6 + $0x3d8] sm:$0xff]  ;;  %v5637_v55 = vld [vmem:[%s6787_s6 + $0x3e0] sm:$0xff] }
  0x39   :  { %6880 = vst [vmem:[#allocation93_spill] sm:$0xff] %v5627_v54  ;;  %6881 = vst [vmem:[#allocation94_spill] sm:$0xff] %v5632_v63  ;;  %v5642_v39 = vld [vmem:[%s6787_s6 + $0x3e8] sm:$0xff]  ;;  %v5647_v47 = vld [vmem:[%s6787_s6 + $0x3f0] sm:$0xff] }
  0x3a   :  { %6882 = vst [vmem:[#allocation95_spill] sm:$0xff] %v5637_v55  ;;  %6883 = vst [vmem:[#allocation96_spill] sm:$0xff] %v5642_v39  ;;  %v5652_v54 = vld [vmem:[%s6787_s6 + $0x3f8] sm:$0xff]  ;;  %v5657_v63 = vld [vmem:[%s6787_s6 + $0x400] sm:$0xff] }
  0x3b   :  { %6884 = vst [vmem:[#allocation97_spill] sm:$0xff] %v5647_v47  ;;  %6885 = vst [vmem:[#allocation98_spill] sm:$0xff] %v5652_v54  ;;  %v5662_v55 = vld [vmem:[%s6787_s6 + $0x408] sm:$0xff]  ;;  %v5667_v39 = vld [vmem:[%s6787_s6 + $0x410] sm:$0xff] }
  0x3c   :  { %6886 = vst [vmem:[#allocation99_spill] sm:$0xff] %v5657_v63  ;;  %6887 = vst [vmem:[#allocation100_spill] sm:$0xff] %v5662_v55  ;;  %v5672_v47 = vld [vmem:[%s6787_s6 + $0x418] sm:$0xff]  ;;  %v5677_v54 = vld [vmem:[%s6787_s6 + $0x420] sm:$0xff] }
  0x3d   :  { %6888 = vst [vmem:[#allocation101_spill] sm:$0xff] %v5667_v39  ;;  %6889 = vst [vmem:[#allocation102_spill] sm:$0xff] %v5672_v47  ;;  %v5682_v63 = vld [vmem:[%s6787_s6 + $0x428] sm:$0xff]  ;;  %v5687_v55 = vld [vmem:[%s6787_s6 + $0x430] sm:$0xff] }
  0x3e   :  { %6890 = vst [vmem:[#allocation103_spill] sm:$0xff] %v5677_v54  ;;  %6891 = vst [vmem:[#allocation104_spill] sm:$0xff] %v5682_v63  ;;  %v5692_v39 = vld [vmem:[%s6787_s6 + $0x438] sm:$0xff]  ;;  %v5697_v47 = vld [vmem:[%s6787_s6 + $0x440] sm:$0xff] }
  0x3f   :  { %6892 = vst [vmem:[#allocation105_spill] sm:$0xff] %v5687_v55  ;;  %6893 = vst [vmem:[#allocation106_spill] sm:$0xff] %v5692_v39  ;;  %v5702_v54 = vld [vmem:[%s6787_s6 + $0x448] sm:$0xff]  ;;  %v5707_v63 = vld [vmem:[%s6787_s6 + $0x450] sm:$0xff] }
  0x40   :  { %6894 = vst [vmem:[#allocation107_spill] sm:$0xff] %v5697_v47  ;;  %6895 = vst [vmem:[#allocation108_spill] sm:$0xff] %v5702_v54  ;;  %v5712_v55 = vld [vmem:[%s6787_s6 + $0x458] sm:$0xff]  ;;  %v5717_v39 = vld [vmem:[%s6787_s6 + $0x460] sm:$0xff] }
  0x41   :  { %6896 = vst [vmem:[#allocation109_spill] sm:$0xff] %v5707_v63  ;;  %6897 = vst [vmem:[#allocation110_spill] sm:$0xff] %v5712_v55  ;;  %v5722_v47 = vld [vmem:[%s6787_s6 + $0x468] sm:$0xff]  ;;  %v5727_v54 = vld [vmem:[%s6787_s6 + $0x470] sm:$0xff] }
  0x42   :  { %6898 = vst [vmem:[#allocation111_spill] sm:$0xff] %v5717_v39  ;;  %6899 = vst [vmem:[#allocation112_spill] sm:$0xff] %v5722_v47  ;;  %v5732_v63 = vld [vmem:[%s6787_s6 + $0x478] sm:$0xff] }
  0x43   :  { %6900 = vst [vmem:[#allocation113_spill] sm:$0xff] %v5727_v54  ;;  %6901 = vst [vmem:[#allocation114_spill] sm:$0xff] %v5732_v63 }
  0x44   :  { %352 = vsyncadd [#allocation3], 18432  ;;  %v355_v39 = vld [vmem:[%s6784_s3] sm:$0xff]  ;;  %v356_v55 = vld [vmem:[%s6784_s3 + $0x8] sm:$0xff]  ;;  %vm359_vm0 = vcmask 261120   ;;  %vm4967_vm1 = vmmov 0  }
  0x45   :  { %v4481_v47 = vpack.c.bf16 %v356_v55, %v355_v39  ;;  %v357_v54 = vld [vmem:[%s6784_s3 + $0x10] sm:$0xff]  ;;  %v358_v38 = vld [vmem:[%s6784_s3 + $0x18] sm:$0xff]  ;;  %v353_v63 = vld [vmem:[%s6781_s0] sm:$0xff]  ;;  %v6902_v58 = vmov 0.0|0.0   ;;  %vm710_vm2 = vcmask 523264   ;;  %vm2012_vm7 = vcmask 130048  }
  0x46   :  { %v4485_v62 = vpack.c.bf16 %v358_v38, %v357_v54  ;;  %3946 = vmatprep.mubr.msk.f32.mxu0 %vm359_vm0, %v353_v63  ;;  %v441_v46 = vld [vmem:[%s6784_s3 + $0x140] sm:$0xff]  ;;  %v442_v39 = vld [vmem:[%s6784_s3 + $0x148] sm:$0xff]  ;;  %3957 = vmatprep.mubr.msk.f32.mxu1 %vm359_vm0, %v353_v63  ;;  %v443_v53 = vld [vmem:[%s6784_s3 + $0x150] sm:$0xff]  ;;  %vm2126_vm8 = vcmask 1040384   ;;  %s4971_s18 = smov 32  }
  0x47   :  { %4482 = vmatprep.subr.bf16.mxu0 %v4481_v47  ;;  %v4489_v55 = vpack.c.bf16 %v442_v39, %v441_v46  ;;  %v444_v38 = vld [vmem:[%s6784_s3 + $0x158] sm:$0xff]  ;;  %v536_v37 = vld [vmem:[%s6784_s3 + $0x30] sm:$0xff]  ;;  %v354_v39 = vld [vmem:[%s6781_s0 + $0x8] sm:$0xff] }
  0x48   :  { %4484 = vmatpush3.bf16.msra.mxu0 %v4481_v47  ;;  %v4493_v54 = vpack.c.bf16 %v444_v38, %v443_v53  ;;  %v537_v63 = vld [vmem:[%s6784_s3 + $0x38] sm:$0xff]  ;;  %v538_v47 = vld [vmem:[%s6784_s3 + $0x40] sm:$0xff]  ;;  %v539_v53 = vld [vmem:[%s6784_s3 + $0x48] sm:$0xff] }
  0x49   :  { %4486 = vmatprep.subr.bf16.mxu0 %v4485_v62  ;;  %4490 = vmatprep.subr.bf16.mxu1 %v4489_v55  ;;  %v4509_v46 = vpack.c.bf16 %v537_v63, %v536_v37  ;;  %v540_v37 = vld [vmem:[%s6784_s3 + $0x50] sm:$0xff]  ;;  %v543_v63 = vld [vmem:[%s6784_s3 + $0x68] sm:$0xff] }
  0x4a   :  { %4492 = vmatpush3.bf16.msra.mxu1 %v4489_v55  ;;  %v4513_v55 = vpack.c.bf16 %v539_v53, %v538_v47  ;;  %v544_v53 = vld [vmem:[%s6784_s3 + $0x70] sm:$0xff] }
  0x4b   :  { %4494 = vmatprep.subr.bf16.mxu1 %v4493_v54 }
  0x4c   :  { %4488 = vmatpush3.bf16.msra.mxu0 %v4485_v62  ;;  %v541_v62 = vld [vmem:[%s6784_s3 + $0x58] sm:$0xff] }
  0x4d   :  { %v4517_v38 = vpack.c.bf16 %v541_v62, %v540_v37  ;;  %v546_v37 = vld [vmem:[%s6784_s3 + $0x80] sm:$0xff] }
  0x4e   :  { %4496 = vmatpush3.bf16.msra.mxu1 %v4493_v54  ;;  %v542_v54 = vld [vmem:[%s6784_s3 + $0x60] sm:$0xff] }
  0x4f   :  { %3947 = vmatmul.mubr.msk.f32.vlgmr.msra.gmra.mrb[0].mxu0 %vm359_vm0, %v354_v39  ;;  %4510 = vmatprep.subr.bf16.mxu1 %v4509_v46  ;;  %v4521_v47 = vpack.c.bf16 %v543_v63, %v542_v54  ;;  %v548_v54 = vld [vmem:[%s6784_s3 + $0x90] sm:$0xff] }
  0x51   :  { %3958 = vmatmul.mubr.msk.f32.vlgmr.msra.gmra.mrb[0].mxu1 %vm359_vm0, %v354_v39 }
  0x52   :  { %4512 = vmatpush3.bf16.msra.mxu1 %v4509_v46  ;;  %v545_v46 = vld [vmem:[%s6784_s3 + $0x78] sm:$0xff] }
  0x53   :  { %4514 = vmatprep.subr.bf16.mxu1 %v4513_v55  ;;  %v4525_v39 = vpack.c.bf16 %v545_v46, %v544_v53  ;;  %v550_v53 = vld [vmem:[%s6784_s3 + $0xa0] sm:$0xff] }
  0x56   :  { %4516 = vmatpush3.bf16.msra.mxu1 %v4513_v55  ;;  %v547_v55 = vld [vmem:[%s6784_s3 + $0x88] sm:$0xff] }
  0x57   :  { %4518 = vmatprep.subr.bf16.mxu1 %v4517_v38  ;;  %v4529_v62 = vpack.c.bf16 %v547_v55, %v546_v37  ;;  %v6791_v37 = vmov 0.0|0.0   ;;  %v521_v55 = vld [vmem:[%s6784_s3 + $0xb8] sm:$0xff] }
  0x58   :  { %4497 = vmatprep.subr.bf16.mxu0 %v6791_v37 }
  0x5a   :  { %4520 = vmatpush3.bf16.msra.mxu1 %v4517_v38  ;;  %v549_v38 = vld [vmem:[%s6784_s3 + $0x98] sm:$0xff] }
  0x5b   :  { %4522 = vmatprep.subr.bf16.mxu1 %v4521_v47  ;;  %v4533_v63 = vpack.c.bf16 %v549_v38, %v548_v54  ;;  %v520_v54 = vld [vmem:[%s6784_s3 + $0xb0] sm:$0xff]  ;;  %v525_v38 = vld [vmem:[%s6784_s3 + $0xd8] sm:$0xff] }
  0x5e   :  { %4524 = vmatpush3.bf16.msra.mxu1 %v4521_v47  ;;  %v551_v47 = vld [vmem:[%s6784_s3 + $0xa8] sm:$0xff] }
  0x5f   :  { %4526 = vmatprep.subr.bf16.mxu1 %v4525_v39  ;;  %v4537_v46 = vpack.c.bf16 %v551_v47, %v550_v53  ;;  %v522_v53 = vld [vmem:[%s6784_s3 + $0xc0] sm:$0xff]  ;;  %v524_v47 = vld [vmem:[%s6784_s3 + $0xd0] sm:$0xff] }
  0x62   :  { %4528 = vmatpush3.bf16.msra.mxu1 %v4525_v39  ;;  %v6789_v39 = vmov 0.0  }
  0x63   :  { %4530 = vmatprep.subr.bf16.mxu1 %v4529_v62  ;;  %3976 = vmatprep.mubr.msk.f32.mxu0 %vm4967_vm1, %v6789_v39 }
  0x66   :  { %4532 = vmatpush3.bf16.msra.mxu1 %v4529_v62  ;;  %v523_v62 = vld [vmem:[%s6784_s3 + $0xc8] sm:$0xff] }
  0x67   :  { %4534 = vmatprep.subr.bf16.mxu1 %v4533_v63 }
  0x6a   :  { %4536 = vmatpush3.bf16.msra.mxu1 %v4533_v63  ;;  %v527_v63 = vld [vmem:[%s6784_s3 + $0xe8] sm:$0xff] }
  0x6b   :  { %4538 = vmatprep.subr.bf16.mxu1 %v4537_v46 }
  0x6e   :  { %4540 = vmatpush3.bf16.msra.mxu1 %v4537_v46  ;;  %v526_v46 = vld [vmem:[%s6784_s3 + $0xe0] sm:$0xff] }
 0x122   :  { %v3948_v39 = vpop.f32.mrb[0].mxu0 }
 0x123   :  { %v529_v37 = vmul.f32 %v3948_v39, %v521_v55  ;;  %v432_v61 = vpop.f32.mrb[1].mxu0  ;;  %v531_v45 = vmul.f32 %v3948_v39, %v523_v62  ;;  %v533_v52 = vmul.f32 %v3948_v39, %v525_v38  ;;  %v535_v36 = vmul.f32 %v3948_v39, %v527_v63 }
 0x124   :  { %v528_v60 = vmul.f32 %v520_v54, %v432_v61  ;;  %4011 = vmatprep.mubr.f32.mxu1 %v432_v61  ;;  %v530_v44 = vmul.f32 %v522_v53, %v432_v61  ;;  %v532_v51 = vmul.f32 %v524_v47, %v432_v61  ;;  %v534_v35 = vmul.f32 %v526_v46, %v432_v61  ;;  %v707_v54 = vld [vmem:[%s6784_s3 + $0xf8] sm:$0xff]  ;;  %v723_v46 = vld [vmem:[%s6784_s3 + $0x100] sm:$0xff] }
 0x125   :  { %4012 = vmatmul.mubr.f32.vlgmr.msra.gmra.mrb[2].mxu1 %v3948_v39  ;;  %v706_v39 = vld [vmem:[%s6784_s3 + $0xf0] sm:$0xff] }
 0x126   :  { %v4498_v59 = vpack.c.bf16 %v529_v37, %v528_v60  ;;  %v4501_v43 = vpack.c.bf16 %v531_v45, %v530_v44  ;;  %v4504_v50 = vpack.c.bf16 %v533_v52, %v532_v51  ;;  %v4507_v34 = vpack.c.bf16 %v535_v36, %v534_v35  ;;  %v552_v35 = vld [vmem:[%s6784_s3 + $0x28] sm:$0x1] }
 0x127   :  { %v623_v45 = vlaneseq }
 0x128   :  { %4499 = vmatpush3.bf16.xpose.msra.mxu0 %v4498_v59  ;;  %4558 = vmatprep.subr.bf16.mxu1 %v4498_v59 }
 0x129   :  { %4560 = vmatpush3.bf16.msra.mxu1 %v4498_v59  ;;  %4500 = vmatprep.subr.bf16.mxu0 %v6902_v58 }
 0x12a   :  { %4562 = vmatprep.subr.bf16.mxu1 %v4501_v43 }
 0x12d   :  { %4564 = vmatpush3.bf16.msra.mxu1 %v4501_v43 }
 0x12e   :  { %4566 = vmatprep.subr.bf16.mxu1 %v4504_v50 }
 0x130   :  { %4502 = vmatpush3.bf16.xpose.msra.mxu0 %v4501_v43  ;;  %v5850_v43 = vshrl.u32 %v623_v45, 7  ;;  %v726_v45 = vld [vmem:[%s6784_s3 + $0x118] sm:$0xff] }
 0x131   :  { %4568 = vmatpush3.bf16.msra.mxu1 %v4504_v50  ;;  %4503 = vmatprep.subr.bf16.mxu0 %v6902_v58 }
 0x132   :  { %4570 = vmatprep.subr.bf16.mxu1 %v4507_v34  ;;  %v5853_v51 = vsub.s32 0, %v5850_v43 }
 0x135   :  { %4572 = vmatpush3.bf16.msra.mxu1 %v4507_v34 }
 0x136   :  { %4605 = vmatprep.subr.bf16.mxu1 %v6902_v58 }
 0x138   :  { %4505 = vmatpush3.bf16.xpose.msra.mxu0 %v4504_v50 }
 0x139   :  { %4506 = vmatprep.subr.bf16.mxu0 %v6902_v58 }
 0x140   :  { %4508 = vmatpush3.bf16.xpose.msra.mxu0 %v4507_v34 }
 0x147   :  { %3977 = vmatmul.mubr.f32.vlgmr.msra.gmra.mrb[2].mxu0 %v552_v35  ;;  %v724_v35 = vld [vmem:[%s6784_s3 + $0x108] sm:$0xff] }
 0x1f8   :  { %v4013_v36 = vpop.f32.mrb[2].mxu1 }
 0x1f9   :  { %v693_v44 = vpop.f32.mrb[3].mxu1 }
 0x21a   :  { %v619_v52 = vpop.f32.mrb[2].mxu0 }
 0x21b   :  { %v626_v59 = vrot.slane %v619_v52, %v5853_v51  ;;  %v3978_v50 = vpop.f32.mrb[3].mxu0 }
 0x21c   :  { %v728_v50 = vld [vmem:[%s6784_s3 + $0x128] sm:$0xff] }
 0x21d   :  { %v694_v60 = vadd.f32 %v693_v44, %v626_v59  ;;  %v699_v61 = vadd.f32 %v4013_v36, %v626_v59  ;;  %v4541_v36 = vpack.c.bf16 %v724_v35, %v723_v46  ;;  %v725_v44 = vld [vmem:[%s6784_s3 + $0x110] sm:$0xff]  ;;  %v727_v59 = vld [vmem:[%s6784_s3 + $0x120] sm:$0xff] }
 0x21e   :  { %v4545_v52 = vpack.c.bf16 %v726_v45, %v725_v44  ;;  %v919_v45 = vld [vmem:[%s6785_s4 + $0x18] sm:$0xff] }
 0x21f   :  { %v702_v34 = vmul.f32 0.2, %v694_v60  ;;  %v703_v37 = vmul.f32 0.2, %v699_v61  ;;  %4542 = vmatprep.subr.bf16.mxu0 %v4541_v36 }
 0x220   :  { %4544 = vmatpush3.bf16.msra.mxu0 %v4541_v36  ;;  %v916_v36 = vld [vmem:[%s6785_s4] sm:$0xff] }
 0x221   :  { %v704_v55 = vmax.f32 %v694_v60, %v702_v34  ;;  %v705_v62 = vmax.f32 %v699_v61, %v703_v37  ;;  %4546 = vmatprep.subr.bf16.mxu0 %v4545_v52  ;;  %v729_v60 = vld [vmem:[%s6784_s3 + $0x130] sm:$0xff]  ;;  %v4549_v61 = vpack.c.bf16 %v728_v50, %v727_v59  ;;  %v730_v34 = vld [vmem:[%s6784_s3 + $0x138] sm:$0xff]  ;;  %v920_v59 = vld [vmem:[%s6785_s4 + $0x20] sm:$0xff] }
 0x222   :  { %v4553_v37 = vpack.c.bf16 %v730_v34, %v729_v60  ;;  %v921_v50 = vld [vmem:[%s6785_s4 + $0x28] sm:$0xff] }
 0x223   :  { %v708_v38 = vadd.f32 %v706_v39, %v704_v55  ;;  %v709_v53 = vadd.f32 %v707_v54, %v705_v62  ;;  %v4581_v60 = vpack.c.bf16 %v921_v50, %v920_v59  ;;  %v928_v59 = vld [vmem:[%s6785_s4 + $0x60] sm:$0xff] }
 0x224   :  { %4548 = vmatpush3.bf16.msra.mxu0 %v4545_v52 }
 0x225   :  { %v711_v63 = vsel %vm710_vm2, %v708_v38, -inf  ;;  %v714_v47 = vsel %vm710_vm2, %v709_v53, -inf  ;;  %4550 = vmatprep.subr.bf16.mxu0 %v4549_v61 }
 0x226   :  { %712 = vmax.xlane.f32.xlu0 %v711_v63 }
 0x228   :  { %4552 = vmatpush3.bf16.msra.mxu0 %v4549_v61 }
 0x229   :  { %4554 = vmatprep.subr.bf16.mxu0 %v4553_v37 }
 0x22a   :  { %715 = vmax.xlane.f32.xlu0 %v714_v47 }
 0x22c   :  { %4556 = vmatpush3.bf16.msra.mxu0 %v4553_v37 }
 0x2b3   :  { %v713_v39 = vpop.xlane.xlu0 %712 }
 0x2b4   :  { %v717_v55 = vsub.f32 %v708_v38, %v713_v39  ;;  %v917_v38 = vld [vmem:[%s6785_s4 + $0x8] sm:$0xff] }
 0x2b5   :  { %v4573_v44 = vpack.c.bf16 %v917_v38, %v916_v36  ;;  %v922_v36 = vld [vmem:[%s6785_s4 + $0x30] sm:$0xff]  ;;  %v923_v38 = vld [vmem:[%s6785_s4 + $0x38] sm:$0xff] }
 0x2b6   :  { %v719_v62 = vmul.f32 1.442695, %v717_v55 }
 0x2b7   :  { %v716_v54 = vpop.xlane.xlu0 %715  ;;  %4574 = vmatprep.subr.bf16.mxu0 %v4573_v44 }
 0x2b8   :  { %4922 = vpow2.f32 %v719_v62  ;;  %v718_v63 = vsub.f32 %v709_v53, %v716_v54  ;;  %v918_v53 = vld [vmem:[%s6785_s4 + $0x10] sm:$0xff] }
 0x2b9   :  { %v4577_v52 = vpack.c.bf16 %v919_v45, %v918_v53  ;;  %v4585_v53 = vpack.c.bf16 %v923_v38, %v922_v36  ;;  %v926_v45 = vld [vmem:[%s6785_s4 + $0x50] sm:$0xff] }
 0x2ba   :  { %v721_v47 = vmul.f32 1.442695, %v718_v63 }
 0x2bc   :  { %4924 = vpow2.f32 %v721_v47  ;;  %v6903_v47 = vmov 0.0  }
 0x2c2   :  { %v4923_v46 = vpop.eup %4922 }
 0x2c3   :  { %4030 = vmatprep.mubr.msk.f32.mxu0 %vm710_vm2, %v4923_v46 }
 0x2c6   :  { %v4925_v35 = vpop.eup %4924 }
 0x2c7   :  { %4031 = vmatmul.mubr.msk.f32.vlgmr.msra.gmra.mrb[4].mxu0 %vm710_vm2, %v4925_v35 }
 0x2c8   :  { %4576 = vmatpush3.bf16.msra.mxu0 %v4573_v44 }
 0x2c9   :  { %4578 = vmatprep.subr.bf16.mxu0 %v4577_v52 }
 0x2cc   :  { %4580 = vmatpush3.bf16.msra.mxu0 %v4577_v52  ;;  %v927_v52 = vld [vmem:[%s6785_s4 + $0x58] sm:$0xff] }
 0x2cd   :  { %4582 = vmatprep.subr.bf16.mxu0 %v4581_v60  ;;  %v4593_v50 = vpack.c.bf16 %v927_v52, %v926_v45 }
 0x2d0   :  { %4584 = vmatpush3.bf16.msra.mxu0 %v4581_v60  ;;  %v929_v60 = vld [vmem:[%s6785_s4 + $0x68] sm:$0xff] }
 0x2d1   :  { %4586 = vmatprep.subr.bf16.mxu0 %v4585_v53 }
 0x2d4   :  { %4588 = vmatpush3.bf16.msra.mxu0 %v4585_v53 }
 0x39a   :  { %v4032_v61 = vpop.f32.mrb[4].mxu0 }
 0x39b   :  { %v809_v34 = vadd.f32 1e-30, %v4032_v61  ;;  %v803_v37 = vpop.f32.mrb[5].mxu0  ;;  %v4597_v61 = vpack.c.bf16 %v929_v60, %v928_v59 }
 0x39c   :  { %v804_v39 = vadd.f32 1e-30, %v803_v37  ;;  %v931_v37 = vld [vmem:[%s6785_s4 + $0x78] sm:$0xff] }
 0x39d   :  { %4926 = vrcp.f32 %v809_v34  ;;  %v930_v34 = vld [vmem:[%s6785_s4 + $0x70] sm:$0xff] }
 0x39e   :  { %4928 = vrcp.f32 %v804_v39  ;;  %v4601_v39 = vpack.c.bf16 %v931_v37, %v930_v34  ;;  %v1026_v34 = vld [vmem:[%s6785_s4 + $0xa8] sm:$0xff] }
 0x3a7   :  { %v4927_v55 = vpop.eup %4926 }
 0x3a8   :  { %v4929_v62 = vpop.eup %4928  ;;  %v815_v63 = vmul.f32 %v4927_v55, %v4925_v35  ;;  %v925_v35 = vld [vmem:[%s6785_s4 + $0x48] sm:$0xff]  ;;  %v1023_v55 = vld [vmem:[%s6785_s4 + $0x90] sm:$0xff] }
 0x3a9   :  { %v814_v54 = vmul.f32 %v4929_v62, %v4923_v46  ;;  %v924_v46 = vld [vmem:[%s6785_s4 + $0x40] sm:$0xff]  ;;  %v1024_v62 = vld [vmem:[%s6785_s4 + $0x98] sm:$0xff] }
 0x3aa   :  { %v4589_v44 = vpack.c.bf16 %v925_v35, %v924_v46 }
 0x3ab   :  { %4049 = vmatprep.mubr.msk.f32.mxu1 %vm710_vm2, %v814_v54  ;;  %v4617_v54 = vpack.c.bf16 %v1024_v62, %v1023_v55 }
 0x3ac   :  { %4050 = vmatmul.mubr.msk.f32.vlgmr.msra.gmra.mrb[0].mxu1 %vm710_vm2, %v815_v63  ;;  %4590 = vmatprep.subr.bf16.mxu0 %v4589_v44  ;;  %v3433_v63 = vld [vmem:[%s6784_s3 + $0x20] ss:$0 sm:$0xff] }
 0x3ad   :  { %4103 = vmatprep.mubr.msk.f32.mxu1 %vm4967_vm1, %v6903_v47  ;;  %4592 = vmatpush3.bf16.msra.mxu0 %v4589_v44 }
 0x3ae   :  { %4594 = vmatprep.subr.bf16.mxu0 %v4593_v50 }
 0x3b1   :  { %4596 = vmatpush3.bf16.msra.mxu0 %v4593_v50 }
 0x3b2   :  { %4598 = vmatprep.subr.bf16.mxu0 %v4597_v61 }
 0x3b5   :  { %4600 = vmatpush3.bf16.msra.mxu0 %v4597_v61  ;;  %v1025_v61 = vld [vmem:[%s6785_s4 + $0xa0] sm:$0xff] }
 0x3b6   :  { %4602 = vmatprep.subr.bf16.mxu0 %v4601_v39  ;;  %v4621_v55 = vpack.c.bf16 %v1026_v34, %v1025_v61  ;;  %v1036_v61 = vld [vmem:[%s6785_s4 + $0xf8] sm:$0xff] }
 0x3b9   :  { %4604 = vmatpush3.bf16.msra.mxu0 %v4601_v39 }
 0x3ba   :  { %4618 = vmatprep.subr.bf16.mxu0 %v4617_v54 }
 0x47f   :  { %v4051_v36 = vpop.f32.mrb[0].mxu1 }
 0x480   :  { %v903_v38 = vadd.f32 %v4051_v36, %v3433_v63  ;;  %v888_v53 = vpop.f32.mrb[1].mxu1  ;;  %v1028_v36 = vld [vmem:[%s6785_s4 + $0xb8] sm:$0xff] }
 0x481   :  { %v902_v46 = vadd.f32 %v3433_v63, %v888_v53  ;;  %v1027_v63 = vld [vmem:[%s6785_s4 + $0xb0] sm:$0xff] }
 0x482   :  { %v907_v35 = vmin.f32 %v903_v38, 0.0  ;;  %vm905_vm4 = vcmp.gt.f32.partialorder %v903_v38, 0.0  ;;  %v4625_v53 = vpack.c.bf16 %v1028_v36, %v1027_v63  ;;  %v1008_v36 = vld [vmem:[%s6785_s4 + $0x118] sm:$0xff] }
 0x483   :  { %v906_v44 = vmin.f32 %v902_v46, 0.0  ;;  %vm904_vm3 = vcmp.gt.f32.partialorder %v902_v46, 0.0 }
 0x484   :  { %v910_v45 = vmul.f32 1.442695, %v907_v35 }
 0x485   :  { %v908_v52 = vmul.f32 1.442695, %v906_v44  ;;  %v1031_v44 = vld [vmem:[%s6785_s4 + $0xd0] sm:$0xff] }
 0x486   :  { %4930 = vpow2.f32 %v910_v45 }
 0x487   :  { %4932 = vpow2.f32 %v908_v52  ;;  %v1033_v52 = vld [vmem:[%s6785_s4 + $0xe0] sm:$0xff] }
 0x490   :  { %v4931_v59 = vpop.eup %4930 }
 0x491   :  { %v4933_v50 = vpop.eup %4932  ;;  %v3435_v60 = vadd.f32 -1.0, %v4931_v59  ;;  %v1034_v59 = vld [vmem:[%s6785_s4 + $0xe8] sm:$0xff] }
 0x492   :  { %v3434_v37 = vadd.f32 -1.0, %v4933_v50  ;;  %v4637_v50 = vpack.c.bf16 %v1034_v59, %v1033_v52 }
 0x493   :  { %v5960_v62 = vsel %vm905_vm4, %v903_v38, %v3435_v60  ;;  %v1030_v38 = vld [vmem:[%s6785_s4 + $0xc8] sm:$0xff]  ;;  %v1035_v60 = vld [vmem:[%s6785_s4 + $0xf0] sm:$0xff] }
 0x494   :  { %v5957_v39 = vsel %vm904_vm3, %v902_v46, %v3434_v37  ;;  %v1029_v46 = vld [vmem:[%s6785_s4 + $0xc0] sm:$0xff]  ;;  %v4641_v34 = vpack.c.bf16 %v1036_v61, %v1035_v60 }
 0x495   :  { %4084 = vmatprep.mubr.f32.mxu0 %v5957_v39  ;;  %v4629_v35 = vpack.c.bf16 %v1030_v38, %v1029_v46  ;;  %v1037_v37 = vld [vmem:[%s6785_s4 + $0x100] sm:$0xff]  ;;  %v1012_v46 = vld [vmem:[%s6785_s4 + $0x138] sm:$0xff]  ;;  %v1014_v38 = vld [vmem:[%s6785_s4 + $0x148] sm:$0xff] }
 0x496   :  { %4085 = vmatmul.mubr.f32.vlgmr.msra.gmra.mrb[6].mxu0 %v5960_v62 }
 0x497   :  { %4620 = vmatpush3.bf16.msra.mxu0 %v4617_v54  ;;  %v1032_v54 = vld [vmem:[%s6785_s4 + $0xd8] sm:$0xff] }
 0x498   :  { %4622 = vmatprep.subr.bf16.mxu0 %v4621_v55  ;;  %v4633_v45 = vpack.c.bf16 %v1032_v54, %v1031_v44  ;;  %v1009_v44 = vld [vmem:[%s6785_s4 + $0x120] sm:$0xff]  ;;  %v1011_v54 = vld [vmem:[%s6785_s4 + $0x130] sm:$0xff] }
 0x49b   :  { %4624 = vmatpush3.bf16.msra.mxu0 %v4621_v55  ;;  %v1038_v55 = vld [vmem:[%s6785_s4 + $0x108] sm:$0xff] }
 0x49c   :  { %4626 = vmatprep.subr.bf16.mxu0 %v4625_v53  ;;  %v4645_v63 = vpack.c.bf16 %v1038_v55, %v1037_v37 }
 0x49f   :  { %4628 = vmatpush3.bf16.msra.mxu0 %v4625_v53  ;;  %v1010_v53 = vld [vmem:[%s6785_s4 + $0x128] sm:$0xff] }
 0x4a0   :  { %4630 = vmatprep.subr.bf16.mxu0 %v4629_v35 }
 0x4a3   :  { %4632 = vmatpush3.bf16.msra.mxu0 %v4629_v35  ;;  %v1007_v35 = vld [vmem:[%s6785_s4 + $0x110] sm:$0xff] }
 0x4a4   :  { %4634 = vmatprep.subr.bf16.mxu0 %v4633_v45 }
 0x4a7   :  { %4636 = vmatpush3.bf16.msra.mxu0 %v4633_v45  ;;  %v1013_v45 = vld [vmem:[%s6785_s4 + $0x140] sm:$0xff] }
 0x4a8   :  { %4638 = vmatprep.subr.bf16.mxu0 %v4637_v50 }
 0x4ab   :  { %4640 = vmatpush3.bf16.msra.mxu0 %v4637_v50 }
 0x4ac   :  { %4642 = vmatprep.subr.bf16.mxu0 %v4641_v34 }
 0x4af   :  { %4644 = vmatpush3.bf16.msra.mxu0 %v4641_v34 }
 0x4b0   :  { %4646 = vmatprep.subr.bf16.mxu0 %v4645_v63 }
 0x4b3   :  { %4648 = vmatpush3.bf16.msra.mxu0 %v4645_v63 }
 0x569   :  { %v4086_v52 = vpop.f32.mrb[6].mxu0 }
 0x56a   :  { %v1016_v59 = vmul.f32 %v4086_v52, %v1008_v36  ;;  %v1018_v50 = vmul.f32 %v4086_v52, %v1010_v53  ;;  %v1020_v60 = vmul.f32 %v4086_v52, %v1012_v46  ;;  %v1022_v61 = vmul.f32 %v4086_v52, %v1014_v38  ;;  %v998_v34 = vpop.f32.mrb[7].mxu0  ;;  %v1209_v36 = vld [vmem:[%s6785_s4 + $0x160] sm:$0xff]  ;;  %v1211_v46 = vld [vmem:[%s6785_s4 + $0x170] sm:$0xff]  ;;  %v1212_v38 = vld [vmem:[%s6785_s4 + $0x178] sm:$0xff] }
 0x56b   :  { %v1015_v37 = vmul.f32 %v1007_v35, %v998_v34  ;;  %v1017_v55 = vmul.f32 %v1009_v44, %v998_v34  ;;  %v1019_v63 = vmul.f32 %v1011_v54, %v998_v34  ;;  %v1021_v42 = vmul.f32 %v1013_v45, %v998_v34  ;;  %4138 = vmatprep.mubr.f32.mxu0 %v998_v34  ;;  %v1039_v35 = vld [vmem:[%s6785_s4 + $0x88] sm:$0x1]  ;;  %v1213_v54 = vld [vmem:[%s6785_s4 + $0x180] sm:$0xff] }
 0x56c   :  { %4139 = vmatmul.mubr.f32.vlgmr.msra.gmra.mrb[8].mxu0 %v4086_v52  ;;  %v4653_v44 = vpack.c.bf16 %v1212_v38, %v1211_v46  ;;  %v1214_v45 = vld [vmem:[%s6785_s4 + $0x188] sm:$0xff]  ;;  %v1193_v38 = vld [vmem:[%s6785_s4 + $0x150] sm:$0xff] }
 0x56d   :  { %v6023_v49 = vpack.c.bf16 %v1016_v59, %v1015_v37  ;;  %v6025_v33 = vpack.c.bf16 %v1018_v50, %v1017_v55  ;;  %v6027_v57 = vpack.c.bf16 %v1020_v60, %v1019_v63  ;;  %v6029_v41 = vpack.c.bf16 %v1022_v61, %v1021_v42  ;;  %v1210_v42 = vld [vmem:[%s6785_s4 + $0x168] sm:$0xff]  ;;  %v1215_v59 = vld [vmem:[%s6785_s4 + $0x190] sm:$0xff]  ;;  %v1216_v50 = vld [vmem:[%s6785_s4 + $0x198] sm:$0xff] }
 0x56e   :  { %v4649_v53 = vpack.c.bf16 %v1210_v42, %v1209_v36  ;;  %v4657_v52 = vpack.c.bf16 %v1214_v45, %v1213_v54  ;;  %v4661_v60 = vpack.c.bf16 %v1216_v50, %v1215_v59  ;;  %v1194_v54 = vld [vmem:[%s6785_s4 + $0x158] sm:$0xff] }
 0x56f   :  { %4607 = vmatpush3.bf16.xpose.msra.mxu1 %v6023_v49 }
 0x570   :  { %4608 = vmatprep.subr.bf16.mxu1 %v6902_v58 }
 0x577   :  { %4610 = vmatpush3.bf16.xpose.msra.mxu1 %v6025_v33 }
 0x578   :  { %4611 = vmatprep.subr.bf16.mxu1 %v6902_v58 }
 0x57f   :  { %4613 = vmatpush3.bf16.xpose.msra.mxu1 %v6027_v57 }
 0x580   :  { %4614 = vmatprep.subr.bf16.mxu1 %v6902_v58 }
 0x587   :  { %4616 = vmatpush3.bf16.xpose.msra.mxu1 %v6029_v41 }
 0x588   :  { %4650 = vmatprep.subr.bf16.mxu1 %v4649_v53 }
 0x58e   :  { %4104 = vmatmul.mubr.f32.vlgmr.msra.gmra.mrb[4].mxu1 %v1039_v35 }
 0x58f   :  { %4652 = vmatpush3.bf16.msra.mxu1 %v4649_v53 }
 0x590   :  { %4654 = vmatprep.subr.bf16.mxu1 %v4653_v44 }
 0x593   :  { %4656 = vmatpush3.bf16.msra.mxu1 %v4653_v44 }
 0x594   :  { %4658 = vmatprep.subr.bf16.mxu1 %v4657_v52 }
 0x597   :  { %4660 = vmatpush3.bf16.msra.mxu1 %v4657_v52 }
 0x598   :  { %4662 = vmatprep.subr.bf16.mxu1 %v4661_v60 }
 0x59b   :  { %4664 = vmatpush3.bf16.msra.mxu1 %v4661_v60 }
 0x59c   :  { %4666 = vmatprep.subr.bf16.mxu1 %v6023_v49 }
 0x63f   :  { %v4140_v61 = vpop.f32.mrb[8].mxu0 }
 0x640   :  { %v1180_v34 = vpop.f32.mrb[9].mxu0 }
 0x661   :  { %v1106_v37 = vpop.f32.mrb[4].mxu1 }
 0x662   :  { %v1113_v55 = vrot.slane %v1106_v37, %v5853_v51  ;;  %v4105_v63 = vpop.f32.mrb[5].mxu1 }
 0x664   :  { %v1181_v36 = vadd.f32 %v1180_v34, %v1113_v55  ;;  %v1186_v42 = vadd.f32 %v4140_v61, %v1113_v55 }
 0x666   :  { %v1189_v53 = vmul.f32 0.2, %v1181_v36  ;;  %v1190_v46 = vmul.f32 0.2, %v1186_v42 }
 0x668   :  { %v1191_v35 = vmax.f32 %v1181_v36, %v1189_v53  ;;  %v1192_v44 = vmax.f32 %v1186_v42, %v1190_v46  ;;  %v1402_v53 = vld [vmem:[%s6786_s5] sm:$0xff] }
 0x66a   :  { %v1195_v45 = vadd.f32 %v1193_v38, %v1191_v35  ;;  %v1196_v59 = vadd.f32 %v1194_v54, %v1192_v44 }
 0x66c   :  { %v1197_v52 = vsel %vm710_vm2, %v1195_v45, -inf  ;;  %v1200_v50 = vsel %vm710_vm2, %v1196_v59, -inf }
 0x66d   :  { %1198 = vmax.xlane.f32.xlu1 %v1197_v52 }
 0x671   :  { %1201 = vmax.xlane.f32.xlu1 %v1200_v50 }
 0x6fa   :  { %v1199_v60 = vpop.xlane.xlu1 %1198 }
 0x6fb   :  { %v1203_v61 = vsub.f32 %v1195_v45, %v1199_v60  ;;  %v1406_v60 = vld [vmem:[%s6786_s5 + $0x20] sm:$0xff] }
 0x6fd   :  { %v1205_v34 = vmul.f32 1.442695, %v1203_v61  ;;  %v1407_v61 = vld [vmem:[%s6786_s5 + $0x28] sm:$0xff] }
 0x6fe   :  { %v1202_v37 = vpop.xlane.xlu1 %1201 }
 0x6ff   :  { %4934 = vpow2.f32 %v1205_v34  ;;  %v1204_v55 = vsub.f32 %v1196_v59, %v1202_v37  ;;  %v4689_v34 = vpack.c.bf16 %v1407_v61, %v1406_v60  ;;  %v1408_v37 = vld [vmem:[%s6786_s5 + $0x30] sm:$0xff]  ;;  %v3440_v60 = vld [vmem:[%s6785_s4 + $0x80] ss:$0 sm:$0xff] }
 0x701   :  { %v1207_v63 = vmul.f32 1.442695, %v1204_v55  ;;  %v1409_v55 = vld [vmem:[%s6786_s5 + $0x38] sm:$0xff] }
 0x703   :  { %4936 = vpow2.f32 %v1207_v63  ;;  %v4693_v63 = vpack.c.bf16 %v1409_v55, %v1408_v37 }
 0x709   :  { %v4935_v36 = vpop.eup %4934 }
 0x70a   :  { %4157 = vmatprep.mubr.msk.f32.mxu1 %vm710_vm2, %v4935_v36 }
 0x70d   :  { %v4937_v42 = vpop.eup %4936 }
 0x70e   :  { %4158 = vmatmul.mubr.msk.f32.vlgmr.msra.gmra.mrb[6].mxu1 %vm710_vm2, %v4937_v42 }
 0x70f   :  { %4668 = vmatpush3.bf16.msra.mxu1 %v6023_v49  ;;  %v1403_v49 = vld [vmem:[%s6786_s5 + $0x8] sm:$0xff] }
 0x710   :  { %4670 = vmatprep.subr.bf16.mxu1 %v6025_v33  ;;  %v4681_v46 = vpack.c.bf16 %v1403_v49, %v1402_v53  ;;  %v1412_v49 = vld [vmem:[%s6786_s5 + $0x50] sm:$0xff] }
 0x712   :  { %4682 = vmatprep.subr.bf16.mxu0 %v4681_v46 }
 0x713   :  { %4672 = vmatpush3.bf16.msra.mxu1 %v6025_v33  ;;  %v1404_v33 = vld [vmem:[%s6786_s5 + $0x10] sm:$0xff]  ;;  %4684 = vmatpush3.bf16.msra.mxu0 %v4681_v46  ;;  %v1414_v46 = vld [vmem:[%s6786_s5 + $0x60] sm:$0xff] }
 0x714   :  { %4674 = vmatprep.subr.bf16.mxu1 %v6027_v57 }
 0x717   :  { %4676 = vmatpush3.bf16.msra.mxu1 %v6027_v57  ;;  %v1405_v57 = vld [vmem:[%s6786_s5 + $0x18] sm:$0xff] }
 0x718   :  { %4678 = vmatprep.subr.bf16.mxu1 %v6029_v41 }
 0x71b   :  { %4680 = vmatpush3.bf16.msra.mxu1 %v6029_v41  ;;  %v4685_v41 = vpack.c.bf16 %v1405_v57, %v1404_v33  ;;  %v1413_v33 = vld [vmem:[%s6786_s5 + $0x58] sm:$0xff] }
 0x71c   :  { %4713 = vmatprep.subr.bf16.mxu1 %v6902_v58  ;;  %v4701_v57 = vpack.c.bf16 %v1413_v33, %v1412_v49 }
 0x71d   :  { %4686 = vmatprep.subr.bf16.mxu0 %v4685_v41 }
 0x71e   :  { %4688 = vmatpush3.bf16.msra.mxu0 %v4685_v41  ;;  %v1415_v41 = vld [vmem:[%s6786_s5 + $0x68] sm:$0xff] }
 0x71f   :  { %4690 = vmatprep.subr.bf16.mxu0 %v4689_v34 }
 0x722   :  { %4692 = vmatpush3.bf16.msra.mxu0 %v4689_v34 }
 0x723   :  { %4694 = vmatprep.subr.bf16.mxu0 %v4693_v63 }
 0x726   :  { %4696 = vmatpush3.bf16.msra.mxu0 %v4693_v63 }
 0x7e1   :  { %v4159_v38 = vpop.f32.mrb[6].mxu1 }
 0x7e2   :  { %v1295_v35 = vadd.f32 1e-30, %v4159_v38  ;;  %v1289_v44 = vpop.f32.mrb[7].mxu1  ;;  %v4705_v38 = vpack.c.bf16 %v1415_v41, %v1414_v46  ;;  %v1511_v41 = vld [vmem:[%s6786_s5 + $0xa0] sm:$0xff] }
 0x7e3   :  { %v1290_v54 = vadd.f32 1e-30, %v1289_v44  ;;  %v1417_v44 = vld [vmem:[%s6786_s5 + $0x78] sm:$0xff] }
 0x7e4   :  { %4938 = vrcp.f32 %v1295_v35  ;;  %v1416_v35 = vld [vmem:[%s6786_s5 + $0x70] sm:$0xff] }
 0x7e5   :  { %4940 = vrcp.f32 %v1290_v54  ;;  %v4709_v54 = vpack.c.bf16 %v1417_v44, %v1416_v35 }
 0x7ee   :  { %v4939_v45 = vpop.eup %4938 }
 0x7ef   :  { %v4941_v52 = vpop.eup %4940  ;;  %v1301_v50 = vmul.f32 %v4939_v45, %v4937_v42  ;;  %v1411_v42 = vld [vmem:[%s6786_s5 + $0x48] sm:$0xff]  ;;  %v1509_v45 = vld [vmem:[%s6786_s5 + $0x90] sm:$0xff] }
 0x7f0   :  { %v1300_v59 = vmul.f32 %v4941_v52, %v4935_v36  ;;  %v1410_v36 = vld [vmem:[%s6786_s5 + $0x40] sm:$0xff]  ;;  %v1510_v52 = vld [vmem:[%s6786_s5 + $0x98] sm:$0xff] }
 0x7f1   :  { %v4697_v53 = vpack.c.bf16 %v1411_v42, %v1410_v36 }
 0x7f2   :  { %4176 = vmatprep.mubr.msk.f32.mxu1 %vm710_vm2, %v1300_v59  ;;  %v4725_v59 = vpack.c.bf16 %v1510_v52, %v1509_v45  ;;  %v1514_v45 = vld [vmem:[%s6786_s5 + $0xb8] sm:$0xff] }
 0x7f3   :  { %4177 = vmatmul.mubr.msk.f32.vlgmr.msra.gmra.mrb[8].mxu1 %vm710_vm2, %v1301_v50  ;;  %4698 = vmatprep.subr.bf16.mxu0 %v4697_v53 }
 0x7f4   :  { %4230 = vmatprep.mubr.msk.f32.mxu1 %vm4967_vm1, %v6903_v47  ;;  %4700 = vmatpush3.bf16.msra.mxu0 %v4697_v53 }
 0x7f5   :  { %4702 = vmatprep.subr.bf16.mxu0 %v4701_v57 }
 0x7f8   :  { %4704 = vmatpush3.bf16.msra.mxu0 %v4701_v57 }
 0x7f9   :  { %4706 = vmatprep.subr.bf16.mxu0 %v4705_v38 }
 0x7fc   :  { %4708 = vmatpush3.bf16.msra.mxu0 %v4705_v38 }
 0x7fd   :  { %4710 = vmatprep.subr.bf16.mxu0 %v4709_v54 }
 0x800   :  { %4712 = vmatpush3.bf16.msra.mxu0 %v4709_v54  ;;  %v1513_v54 = vld [vmem:[%s6786_s5 + $0xb0] sm:$0xff] }
 0x801   :  { %4726 = vmatprep.subr.bf16.mxu0 %v4725_v59  ;;  %v4733_v52 = vpack.c.bf16 %v1514_v45, %v1513_v54  ;;  %v1493_v54 = vld [vmem:[%s6786_s5 + $0x110] sm:$0xff]  ;;  %v1495_v45 = vld [vmem:[%s6786_s5 + $0x120] sm:$0xff] }
 0x8c6   :  { %v4178_v50 = vpop.f32.mrb[8].mxu1 }
 0x8c7   :  { %v1380_v61 = vadd.f32 %v4178_v50, %v5960_v62  ;;  %v1374_v34 = vpop.f32.mrb[9].mxu1  ;;  %v1512_v62 = vld [vmem:[%s6786_s5 + $0xa8] sm:$0xff]  ;;  %v1515_v50 = vld [vmem:[%s6786_s5 + $0xc0] sm:$0xff] }
 0x8c8   :  { %v1375_v37 = vadd.f32 %v1374_v34, %v5957_v39  ;;  %v4729_v35 = vpack.c.bf16 %v1512_v62, %v1511_v41  ;;  %v1517_v34 = vld [vmem:[%s6786_s5 + $0xd0] sm:$0xff]  ;;  %v1494_v41 = vld [vmem:[%s6786_s5 + $0x118] sm:$0xff]  ;;  %v1496_v62 = vld [vmem:[%s6786_s5 + $0x128] sm:$0xff] }
 0x8c9   :  { %v1389_v55 = vadd.f32 %v3440_v60, %v1380_v61 }
 0x8ca   :  { %v1388_v63 = vadd.f32 %v3440_v60, %v1375_v37  ;;  %v1516_v60 = vld [vmem:[%s6786_s5 + $0xc8] sm:$0xff] }
 0x8cb   :  { %v1393_v36 = vmin.f32 %v1389_v55, 0.0  ;;  %vm1391_vm6 = vcmp.gt.f32.partialorder %v1389_v55, 0.0  ;;  %v4737_v61 = vpack.c.bf16 %v1516_v60, %v1515_v50  ;;  %v1499_v50 = vld [vmem:[%s6786_s5 + $0x140] sm:$0xff] }
 0x8cc   :  { %v1392_v42 = vmin.f32 %v1388_v63, 0.0  ;;  %vm1390_vm5 = vcmp.gt.f32.partialorder %v1388_v63, 0.0 }
 0x8cd   :  { %v1396_v53 = vmul.f32 1.442695, %v1393_v36 }
 0x8ce   :  { %v1394_v49 = vmul.f32 1.442695, %v1392_v42  ;;  %v1521_v42 = vld [vmem:[%s6786_s5 + $0xf0] sm:$0xff] }
 0x8cf   :  { %4942 = vpow2.f32 %v1396_v53  ;;  %v1522_v53 = vld [vmem:[%s6786_s5 + $0xf8] sm:$0xff] }
 0x8d0   :  { %4944 = vpow2.f32 %v1394_v49  ;;  %v4749_v49 = vpack.c.bf16 %v1522_v53, %v1521_v42 }
 0x8d9   :  { %v4943_v33 = vpop.eup %4942 }
 0x8da   :  { %v4945_v46 = vpop.eup %4944  ;;  %v3442_v57 = vadd.f32 -1.0, %v4943_v33  ;;  %v1523_v33 = vld [vmem:[%s6786_s5 + $0x100] sm:$0xff] }
 0x8db   :  { %v3441_v39 = vadd.f32 -1.0, %v4945_v46  ;;  %v1524_v46 = vld [vmem:[%s6786_s5 + $0x108] sm:$0xff] }
 0x8dc   :  { %v6157_v44 = vsel %vm1391_vm6, %v1389_v55, %v3442_v57  ;;  %v1519_v55 = vld [vmem:[%s6786_s5 + $0xe0] sm:$0xff]  ;;  %v4753_v57 = vpack.c.bf16 %v1524_v46, %v1523_v33 }
 0x8dd   :  { %v6154_v38 = vsel %vm1390_vm5, %v1388_v63, %v3441_v39  ;;  %v1520_v63 = vld [vmem:[%s6786_s5 + $0xe8] sm:$0xff]  ;;  %v1498_v39 = vld [vmem:[%s6786_s5 + $0x138] sm:$0xff] }
 0x8de   :  { %4211 = vmatprep.mubr.f32.mxu0 %v6154_v38  ;;  %v4745_v36 = vpack.c.bf16 %v1520_v63, %v1519_v55 }
 0x8df   :  { %4212 = vmatmul.mubr.f32.vlgmr.msra.gmra.mrb[10].mxu0 %v6157_v44 }
 0x8e0   :  { %4728 = vmatpush3.bf16.msra.mxu0 %v4725_v59  ;;  %v1518_v59 = vld [vmem:[%s6786_s5 + $0xd8] sm:$0xff] }
 0x8e1   :  { %4730 = vmatprep.subr.bf16.mxu0 %v4729_v35  ;;  %v4741_v37 = vpack.c.bf16 %v1518_v59, %v1517_v34 }
 0x8e4   :  { %4732 = vmatpush3.bf16.msra.mxu0 %v4729_v35  ;;  %v1500_v35 = vld [vmem:[%s6786_s5 + $0x148] sm:$0xff] }
 0x8e5   :  { %4734 = vmatprep.subr.bf16.mxu0 %v4733_v52 }
 0x8e8   :  { %4736 = vmatpush3.bf16.msra.mxu0 %v4733_v52  ;;  %v1497_v52 = vld [vmem:[%s6786_s5 + $0x130] sm:$0xff] }
 0x8e9   :  { %4738 = vmatprep.subr.bf16.mxu0 %v4737_v61 }
 0x8ec   :  { %4740 = vmatpush3.bf16.msra.mxu0 %v4737_v61 }
 0x8ed   :  { %4742 = vmatprep.subr.bf16.mxu0 %v4741_v37 }
 0x8f0   :  { %4744 = vmatpush3.bf16.msra.mxu0 %v4741_v37 }
 0x8f1   :  { %4746 = vmatprep.subr.bf16.mxu0 %v4745_v36 }
 0x8f4   :  { %4748 = vmatpush3.bf16.msra.mxu0 %v4745_v36 }
 0x8f5   :  { %4750 = vmatprep.subr.bf16.mxu0 %v4749_v49 }
 0x8f8   :  { %4752 = vmatpush3.bf16.msra.mxu0 %v4749_v49 }
 0x8f9   :  { %4754 = vmatprep.subr.bf16.mxu0 %v4753_v57 }
 0x8fc   :  { %4756 = vmatpush3.bf16.msra.mxu0 %v4753_v57 }
 0x9b2   :  { %v4213_v60 = vpop.f32.mrb[10].mxu0 }
 0x9b3   :  { %v1502_v61 = vmul.f32 %v4213_v60, %v1494_v41  ;;  %v1504_v34 = vmul.f32 %v4213_v60, %v1496_v62  ;;  %v1506_v59 = vmul.f32 %v4213_v60, %v1498_v39  ;;  %v1508_v37 = vmul.f32 %v4213_v60, %v1500_v35  ;;  %v1484_v55 = vpop.f32.mrb[11].mxu0  ;;  %v1695_v41 = vld [vmem:[%s6786_s5 + $0x160] sm:$0xff]  ;;  %v1696_v62 = vld [vmem:[%s6786_s5 + $0x168] sm:$0xff]  ;;  %v1697_v35 = vld [vmem:[%s6786_s5 + $0x170] sm:$0xff] }
 0x9b4   :  { %v1501_v63 = vmul.f32 %v1493_v54, %v1484_v55  ;;  %v1503_v36 = vmul.f32 %v1495_v45, %v1484_v55  ;;  %v1505_v42 = vmul.f32 %v1497_v52, %v1484_v55  ;;  %v1507_v53 = vmul.f32 %v1499_v50, %v1484_v55  ;;  %4265 = vmatprep.mubr.f32.mxu0 %v1484_v55  ;;  %v1698_v54 = vld [vmem:[%s6786_s5 + $0x178] sm:$0xff]  ;;  %v1525_v45 = vld [vmem:[%s6786_s5 + $0x88] sm:$0x1]  ;;  %v1699_v50 = vld [vmem:[%s6786_s5 + $0x180] sm:$0xff] }
 0x9b5   :  { %4266 = vmatmul.mubr.f32.vlgmr.msra.gmra.mrb[12].mxu0 %v4213_v60  ;;  %v4757_v39 = vpack.c.bf16 %v1696_v62, %v1695_v41  ;;  %v4761_v52 = vpack.c.bf16 %v1698_v54, %v1697_v35  ;;  %v1700_v60 = vld [vmem:[%s6786_s5 + $0x188] sm:$0xff]  ;;  %v1680_v54 = vld [vmem:[%s6786_s5 + $0x158] sm:$0xff] }
 0x9b6   :  { %v6220_v49 = vpack.c.bf16 %v1502_v61, %v1501_v63  ;;  %v6222_v33 = vpack.c.bf16 %v1504_v34, %v1503_v36  ;;  %v6224_v46 = vpack.c.bf16 %v1506_v59, %v1505_v42  ;;  %v6226_v57 = vpack.c.bf16 %v1508_v37, %v1507_v53  ;;  %v1701_v34 = vld [vmem:[%s6786_s5 + $0x190] sm:$0xff]  ;;  %v1702_v59 = vld [vmem:[%s6786_s5 + $0x198] sm:$0xff] }
 0x9b7   :  { %v4765_v61 = vpack.c.bf16 %v1700_v60, %v1699_v50  ;;  %v4769_v37 = vpack.c.bf16 %v1702_v59, %v1701_v34 }
 0x9b8   :  { %4715 = vmatpush3.bf16.xpose.msra.mxu1 %v6220_v49 }
 0x9b9   :  { %4716 = vmatprep.subr.bf16.mxu1 %v6902_v58 }
 0x9c0   :  { %4718 = vmatpush3.bf16.xpose.msra.mxu1 %v6222_v33 }
 0x9c1   :  { %4719 = vmatprep.subr.bf16.mxu1 %v6902_v58 }
 0x9c8   :  { %4721 = vmatpush3.bf16.xpose.msra.mxu1 %v6224_v46 }
 0x9c9   :  { %4722 = vmatprep.subr.bf16.mxu1 %v6902_v58 }
 0x9d0   :  { %4724 = vmatpush3.bf16.xpose.msra.mxu1 %v6226_v57 }
 0x9d1   :  { %4758 = vmatprep.subr.bf16.mxu1 %v4757_v39 }
 0x9d7   :  { %4231 = vmatmul.mubr.f32.vlgmr.msra.gmra.mrb[10].mxu1 %v1525_v45  ;;  %v1679_v45 = vld [vmem:[%s6786_s5 + $0x150] sm:$0xff] }
 0x9d8   :  { %4760 = vmatpush3.bf16.msra.mxu1 %v4757_v39 }
 0x9d9   :  { %4762 = vmatprep.subr.bf16.mxu1 %v4761_v52 }
 0x9dc   :  { %4764 = vmatpush3.bf16.msra.mxu1 %v4761_v52 }
 0x9dd   :  { %4766 = vmatprep.subr.bf16.mxu1 %v4765_v61 }
 0x9e0   :  { %4768 = vmatpush3.bf16.msra.mxu1 %v4765_v61 }
 0x9e1   :  { %4770 = vmatprep.subr.bf16.mxu1 %v4769_v37 }
 0x9e4   :  { %4772 = vmatpush3.bf16.msra.mxu1 %v4769_v37 }
 0x9e5   :  { %4774 = vmatprep.subr.bf16.mxu1 %v6220_v49 }
 0xa88   :  { %v4267_v55 = vpop.f32.mrb[12].mxu0 }
 0xa89   :  { %v1666_v63 = vpop.f32.mrb[13].mxu0 }
 0xaaa   :  { %v1592_v36 = vpop.f32.mrb[10].mxu1 }
 0xaab   :  { %v1599_v42 = vrot.slane %v1592_v36, %v5853_v51  ;;  %v4232_v53 = vpop.f32.mrb[11].mxu1 }
 0xaad   :  { %v1667_v41 = vadd.f32 %v1666_v63, %v1599_v42  ;;  %v1672_v62 = vadd.f32 %v4267_v55, %v1599_v42 }
 0xaaf   :  { %v1675_v39 = vmul.f32 0.2, %v1667_v41  ;;  %v1676_v35 = vmul.f32 0.2, %v1672_v62 }
 0xab1   :  { %v1678_v52 = vmax.f32 %v1672_v62, %v1676_v35  ;;  %v1677_v50 = vmax.f32 %v1667_v41, %v1675_v39  ;;  %v1876_v41 = vld [vmem:[%s6786_s5 + $0x1a0] sm:$0xff]  ;;  %v1881_v35 = vld [vmem:[%s6786_s5 + $0x1c8] sm:$0xff] }
 0xab2   :  { %v1880_v39 = vld [vmem:[%s6786_s5 + $0x1c0] sm:$0xff] }
 0xab3   :  { %v1682_v60 = vadd.f32 %v1680_v54, %v1678_v52  ;;  %v1681_v61 = vadd.f32 %v1679_v45, %v1677_v50  ;;  %v4797_v54 = vpack.c.bf16 %v1881_v35, %v1880_v39  ;;  %v1882_v45 = vld [vmem:[%s6786_s5 + $0x1d0] sm:$0xff]  ;;  %v1883_v52 = vld [vmem:[%s6786_s5 + $0x1d8] sm:$0xff] }
 0xab4   :  { %v4801_v50 = vpack.c.bf16 %v1883_v52, %v1882_v45  ;;  %v1890_v35 = vld [vmem:[%s6786_s5 + $0x210] sm:$0xff]  ;;  %v3447_v52 = vld [vmem:[%s6786_s5 + $0x80] ss:$0 sm:$0xff] }
 0xab5   :  { %v1686_v34 = vsel %vm710_vm2, %v1682_v60, -inf  ;;  %v1683_v51 = vsel %vm710_vm2, %v1681_v61, -inf }
 0xab6   :  { %1687 = vmax.xlane.f32.xlu1 %v1686_v34  ;;  %1684 = vmax.xlane.f32.xlu0 %v1683_v51  ;;  %v1886_v51 = vld [vmem:[%s6786_s5 + $0x1f0] sm:$0xff] }
 0xb43   :  { %v1688_v59 = vpop.xlane.xlu1 %1687  ;;  %v1685_v37 = vpop.xlane.xlu0 %1684 }
 0xb44   :  { %v1690_v55 = vsub.f32 %v1682_v60, %v1688_v59  ;;  %v1689_v63 = vsub.f32 %v1681_v61, %v1685_v37  ;;  %v1884_v60 = vld [vmem:[%s6786_s5 + $0x1e0] sm:$0xff]  ;;  %v1885_v61 = vld [vmem:[%s6786_s5 + $0x1e8] sm:$0xff]  ;;  %v1887_v59 = vld [vmem:[%s6786_s5 + $0x1f8] sm:$0xff] }
 0xb45   :  { %v4805_v34 = vpack.c.bf16 %v1885_v61, %v1884_v60  ;;  %v4809_v37 = vpack.c.bf16 %v1887_v59, %v1886_v51  ;;  %v3448_v51 = vld [vmem:[%s6783_s2 + $0x18] ss:$0 sm:$0xff] }
 0xb46   :  { %v1693_v36 = vmul.f32 1.442695, %v1690_v55  ;;  %v1691_v42 = vmul.f32 1.442695, %v1689_v63  ;;  %v1888_v55 = vld [vmem:[%s6786_s5 + $0x200] sm:$0xff]  ;;  %v1889_v63 = vld [vmem:[%s6786_s5 + $0x208] sm:$0xff] }
 0xb48   :  { %4946 = vpow2.f32 %v1693_v36  ;;  %v4813_v36 = vpack.c.bf16 %v1889_v63, %v1888_v55 }
 0xb49   :  { %4948 = vpow2.f32 %v1691_v42 }
 0xb52   :  { %v4947_v53 = vpop.eup %4946 }
 0xb53   :  { %v4949_v48 = vpop.eup %4948 }
 0xb54   :  { %4284 = vmatprep.mubr.msk.f32.mxu1 %vm710_vm2, %v4949_v48 }
 0xb55   :  { %4285 = vmatmul.mubr.msk.f32.vlgmr.msra.gmra.mrb[12].mxu1 %vm710_vm2, %v4947_v53 }
 0xb56   :  { %4776 = vmatpush3.bf16.msra.mxu1 %v6220_v49  ;;  %v1877_v49 = vld [vmem:[%s6786_s5 + $0x1a8] sm:$0xff] }
 0xb57   :  { %4778 = vmatprep.subr.bf16.mxu1 %v6222_v33  ;;  %v4789_v62 = vpack.c.bf16 %v1877_v49, %v1876_v41 }
 0xb59   :  { %4790 = vmatprep.subr.bf16.mxu0 %v4789_v62 }
 0xb5a   :  { %4780 = vmatpush3.bf16.msra.mxu1 %v6222_v33  ;;  %v1878_v33 = vld [vmem:[%s6786_s5 + $0x1b0] sm:$0xff]  ;;  %4792 = vmatpush3.bf16.msra.mxu0 %v4789_v62 }
 0xb5b   :  { %4782 = vmatprep.subr.bf16.mxu1 %v6224_v46 }
 0xb5e   :  { %4784 = vmatpush3.bf16.msra.mxu1 %v6224_v46  ;;  %v1879_v46 = vld [vmem:[%s6786_s5 + $0x1b8] sm:$0xff] }
 0xb5f   :  { %4786 = vmatprep.subr.bf16.mxu1 %v6226_v57 }
 0xb62   :  { %4788 = vmatpush3.bf16.msra.mxu1 %v6226_v57  ;;  %v4793_v57 = vpack.c.bf16 %v1879_v46, %v1878_v33 }
 0xb63   :  { %4821 = vmatprep.subr.bf16.mxu1 %v6902_v58 }
 0xb64   :  { %4794 = vmatprep.subr.bf16.mxu0 %v4793_v57 }
 0xb65   :  { %4796 = vmatpush3.bf16.msra.mxu0 %v4793_v57 }
 0xb66   :  { %4798 = vmatprep.subr.bf16.mxu0 %v4797_v54 }
 0xb69   :  { %4800 = vmatpush3.bf16.msra.mxu0 %v4797_v54  ;;  %v1891_v54 = vld [vmem:[%s6786_s5 + $0x218] sm:$0xff] }
 0xb6a   :  { %4802 = vmatprep.subr.bf16.mxu0 %v4801_v50  ;;  %v4817_v45 = vpack.c.bf16 %v1891_v54, %v1890_v35 }
 0xb6d   :  { %4804 = vmatpush3.bf16.msra.mxu0 %v4801_v50 }
 0xb6e   :  { %4806 = vmatprep.subr.bf16.mxu0 %v4805_v34 }
 0xb71   :  { %4808 = vmatpush3.bf16.msra.mxu0 %v4805_v34 }
 0xb72   :  { %4810 = vmatprep.subr.bf16.mxu0 %v4809_v37 }
 0xb75   :  { %4812 = vmatpush3.bf16.msra.mxu0 %v4809_v37 }
 0xb76   :  { %4814 = vmatprep.subr.bf16.mxu0 %v4813_v36 }
 0xb79   :  { %4816 = vmatpush3.bf16.msra.mxu0 %v4813_v36 }
 0xb7a   :  { %4818 = vmatprep.subr.bf16.mxu0 %v4817_v45 }
 0xb7d   :  { %4820 = vmatpush3.bf16.msra.mxu0 %v4817_v45 }
 0xb7e   :  { %3699 = vmatprep.subr.bf16.mxu0 %v5137_v24 }
 0xc28   :  { %v4286_v42 = vpop.f32.mrb[12].mxu1 }
 0xc29   :  { %v1781_v41 = vadd.f32 1e-30, %v4286_v42  ;;  %v1775_v49 = vpop.f32.mrb[13].mxu1  ;;  %v4969_v42 = vmov 0  }
 0xc2a   :  { %v1776_v33 = vadd.f32 1e-30, %v1775_v49  ;;  %4919 = vset.pattern.permute.xlu1 %v4969_v42  ;;  %4918 = vset.pattern.permute.xlu0 %v4969_v42 }
 0xc2b   :  { %4950 = vrcp.f32 %v1781_v41 }
 0xc2c   :  { %4952 = vrcp.f32 %v1776_v33 }
 0xc35   :  { %v4951_v62 = vpop.eup %4950 }
 0xc36   :  { %v4953_v46 = vpop.eup %4952  ;;  %v1787_v39 = vmul.f32 %v4951_v62, %v4947_v53 }
 0xc37   :  { %v1786_v57 = vmul.f32 %v4953_v46, %v4949_v48 }
 0xc39   :  { %4303 = vmatprep.mubr.msk.f32.mxu1 %vm710_vm2, %v1786_v57 }
 0xc3a   :  { %4304 = vmatmul.mubr.msk.f32.vlgmr.msra.gmra.mrb[14].mxu1 %vm710_vm2, %v1787_v39 }
 0xc3b   :  { %4345 = vmatprep.mubr.msk.f32.mxu1 %vm4967_vm1, %v6903_v47 }
 0xd0d   :  { %v4305_v48 = vpop.f32.mrb[14].mxu1 }
 0xd0e   :  { %v1866_v53 = vadd.f32 %v4305_v48, %v6157_v44  ;;  %v1860_v50 = vpop.f32.mrb[15].mxu1 }
 0xd0f   :  { %v1861_v60 = vadd.f32 %v1860_v50, %v6154_v38  ;;  %v3449_v38 = vld [vmem:[%s6783_s2 + $0x20] ss:$0 sm:$0xff] }
 0xd10   :  { %v1875_v34 = vadd.f32 %v3447_v52, %v1866_v53 }
 0xd11   :  { %v1874_v61 = vadd.f32 %v3447_v52, %v1861_v60  ;;  %v1968_v60 = vld [vmem:[%s6783_s2 + $0x8] sm:$0xff] }
 0xd13   :  { %4338 = vmatprep.mubr.f32.mxu0 %v1874_v61  ;;  %v1969_v61 = vld [vmem:[%s6783_s2 + $0x10] sm:$0xff] }
 0xd14   :  { %4339 = vmatmul.mubr.f32.vlgmr.msra.gmra.mrb[14].mxu0 %v1875_v34  ;;  %v4970_v34 = vmov 1  }
 0xde7   :  { %v4340_v59 = vpop.f32.mrb[14].mxu0 }
 0xde8   :  { %v1958_v37 = vpop.f32.mrb[15].mxu0  ;;  %v1977_v55 = vmul.f32 %v4340_v59, %v3448_v51 }
 0xde9   :  { %v1976_v63 = vmul.f32 %v3448_v51, %v1958_v37 }
 0xdea   :  { %v1981_v44 = vsel %vm359_vm0, %v1977_v55, 0.0 }
 0xdeb   :  { %1982 = vadd.xlane.f32.xlu1 %v1981_v44  ;;  %v1978_v36 = vsel %vm359_vm0, %v1976_v63, 0.0 }
 0xdec   :  { %1979 = vadd.xlane.f32.xlu0 %v1978_v36 }
 0xe78   :  { %v1983_v41 = vpop.xlane.xlu1 %1982 }
 0xe79   :  { %v1989_v49 = vadd.f32 %v3449_v38, %v1983_v41  ;;  %v1980_v33 = vpop.xlane.xlu0 %1979 }
 0xe7a   :  { %v1988_v62 = vadd.f32 %v3449_v38, %v1980_v33  ;;  %v1967_v38 = vld [vmem:[%s6783_s2] sm:$0x3] }
 0xe7b   :  { %v1991_v46 = vsub.f32 0.0, %v1989_v49 }
 0xe7c   :  { %v1990_v57 = vsub.f32 0.0, %v1988_v62 }
 0xe7d   :  { %v1994_v39 = vmul.f32 1.442695, %v1991_v46 }
 0xe7e   :  { %v1992_v35 = vmul.f32 1.442695, %v1990_v57 }
 0xe7f   :  { %4954 = vpow2.f32 %v1994_v39 }
 0xe80   :  { %4956 = vpow2.f32 %v1992_v35 }
 0xe89   :  { %v4955_v54 = vpop.eup %4954 }
 0xe8a   :  { %v4957_v45 = vpop.eup %4956  ;;  %v1997_v48 = vadd.f32 1.0, %v4955_v54 }
 0xe8b   :  { %v1996_v53 = vadd.f32 1.0, %v4957_v45 }
 0xe8c   :  { %4958 = vrcp.f32 %v1997_v48 }
 0xe8d   :  { %4960 = vrcp.f32 %v1996_v53 }
 0xe96   :  { %v4959_v52 = vpop.eup %4958 }
 0xe97   :  { %v4961_v50 = vpop.eup %4960  ;;  %2007 = vperm.xlu1 %4919, %v4959_v52  }
 0xe98   :  { %2002 = vperm.xlu0 %4918, %v4961_v50  }
 0xe9b   :  { %2088 = vperm.xlu1 %4919, %v1968_v60  }
 0xe9c   :  { %4921 = vset.pattern.permute.xlu0 %v4970_v34 }
 0xe9f   :  { %2093 = vperm.xlu1 %4919, %v1969_v61  }
 0xea3   :  { %4920 = vset.pattern.permute.xlu1 %v4970_v34 }
 0xea4   :  { %2108 = vperm.xlu1 %4920, %v1968_v60  }
 0xea8   :  { %2112 = vperm.xlu1 %4920, %v1969_v61  }
 0xf16   :  { %v2008_v51 = vpop.permute.xlu1 %2007 }
 0xf17   :  { %v2011_v55 = vmul.f32 %v4340_v59, %v2008_v51  ;;  %v2003_v63 = vpop.permute.xlu0 %2002 }
 0xf18   :  { %v2010_v44 = vmul.f32 %v2003_v63, %v1958_v37 }
 0xf1a   :  { %v4822_v36 = vpack.c.bf16 %v2011_v55, %v2010_v44  ;;  %v2089_v42 = vpop.permute.xlu1 %2088 }
 0xf1b   :  { %v2096_v41 = vadd.f32 %v2089_v42, %v1958_v37 }
 0xf1c   :  { %4823 = vmatpush3.bf16.msra.mxu1 %v4822_v36 }
 0xf1d   :  { %v2098_v62 = vsel %vm359_vm0, %v2096_v41, -inf  ;;  %3677 = vmatprep.subr.bf16.mxu1 %v5057_v8 }
 0xf1e   :  { %v2094_v49 = vpop.permute.xlu1 %2093 }
 0xf1f   :  { %v2097_v33 = vadd.f32 %v4340_v59, %v2094_v49  ;;  %4346 = vmatmul.mubr.msk.f32.vlgmr.msra.gmra.mrb[16].mxu1 %vm2012_vm7, %v1967_v38 }
 0xf21   :  { %v2099_v46 = vsel %vm359_vm0, %v2097_v33, -inf }
 0xf22   :  { %v2100_v57 = vmax.f32 %v2098_v62, %v2099_v46 }
 0xf23   :  { %v2109_v39 = vpop.permute.xlu1 %2108 }
 0xf24   :  { %v2101_v35 = vrot.slane %v2100_v57, 4  ;;  %v2115_v54 = vadd.f32 %v2109_v39, %v1958_v37 }
 0xf26   :  { %v2102_v45 = vmax.f32 %v2100_v57, %v2101_v35  ;;  %v2117_v52 = vsel %vm359_vm0, %v2115_v54, -inf }
 0xf27   :  { %v2113_v48 = vpop.permute.xlu1 %2112 }
 0xf28   :  { %v2116_v53 = vadd.f32 %v4340_v59, %v2113_v48  ;;  %v2103_v60 = vrot.slane %v2102_v45, 2 }
 0xf2a   :  { %v2118_v50 = vsel %vm359_vm0, %v2116_v53, -inf  ;;  %v2104_v51 = vmax.f32 %v2102_v45, %v2103_v60 }
 0xf2b   :  { %v2119_v61 = vmax.f32 %v2117_v52, %v2118_v50 }
 0xf2c   :  { %v2105_v36 = vrot.slane %v2104_v51, 1 }
 0xf2d   :  { %v2120_v34 = vrot.slane %v2119_v61, 4 }
 0xf2e   :  { %v2106_v38 = vmax.f32 %v2104_v51, %v2105_v36 }
 0xf2f   :  { %v2121_v55 = vmax.f32 %v2119_v61, %v2120_v34 }
 0xf31   :  { %v2122_v63 = vrot.slane %v2121_v55, 2 }
 0xf33   :  { %v2123_v44 = vmax.f32 %v2121_v55, %v2122_v63 }
 0xf35   :  { %v2124_v42 = vrot.slane %v2123_v44, 1 }
 0xf37   :  { %v2125_v41 = vmax.f32 %v2123_v44, %v2124_v42 }
 0xf39   :  { %v2127_v37 = vsel %vm2126_vm8, %v2106_v38, %v2125_v41 }
 0xf3a   :  { %2129 = vrot.lane.b32.xlu1 %v2127_v37, %s4971_s18 }
 0xfac   :  { %v2130_v59 = vpop.permute.xlu1 %2129 }
 0xff2   :  { %v2082_v49 = vpop.f32.mrb[16].mxu1 }
 0xff3   :  { %v6362_v33 = vsel %vm359_vm0, %v2082_v49, %v2130_v59  ;;  %v4347_v62 = vpop.f32.mrb[17].mxu1 }
 0xff4   :  { %4964 = dma.done.wait [#allocation3], 18432 }
 0xff5   :  { %4965 = vsyncadd [#allocation3], 4294948864  ;;  %3678 = vmatpush3.bf16.msra.mxu1 %v5017_v0  ;;  %3700 = vmatpush3.bf16.msra.mxu0 %v5097_v16  ;;  %v4972_v46 = vmov 1966171168   ;;  %v2137_v0 = vld [vmem:[%s6782_s1] sm:$0xff]  ;;  %v6915_v24 = vld [vmem:[#allocation8_spill] sm:$0xff] }
 0xff6   :  { %v2294_v57 = vunpack.c.l.s4 %v4972_v46  ;;  %3679 = vmatprep.subr.bf16.mxu1 %v5062_v9  ;;  %3701 = vmatprep.subr.bf16.mxu0 %v5142_v25  ;;  %v6916_v25 = vld [vmem:[#allocation23_spill] sm:$0xff]  ;;  %v6925_v35 = vld [vmem:[#allocation18_spill] sm:$0xff]  ;;  %v6926_v54 = vld [vmem:[#allocation33_spill] sm:$0xff]  ;;  %s4973_s5 = smov 64   ;;  %vm3404_vm9 = vcmask 531456  }
 0xff7   :  { %v6927_v53 = vld [vmem:[#allocation11_spill] sm:$0xff]  ;;  %v6928_v52 = vld [vmem:[#allocation26_spill] sm:$0xff]  ;;  %v6931_v51 = vld [vmem:[#allocation12_spill] sm:$0xff] }
 0xff8   :  { %v2295_v39 = vunpack.c.0.s8 %v2294_v57  ;;  %v6929_v50 = vld [vmem:[#allocation19_spill] sm:$0xff]  ;;  %v6930_v60 = vld [vmem:[#allocation34_spill] sm:$0xff]  ;;  %v6937_v41 = vld [vmem:[#allocation44_spill] sm:$0xff] }
 0xff9   :  { %3680 = vmatpush3.bf16.msra.mxu1 %v5022_v1  ;;  %3702 = vmatpush3.bf16.msra.mxu0 %v5102_v17  ;;  %v2292_v17 = vcombine.high %v2137_v0, %v2137_v0  ;;  %v6932_v55 = vld [vmem:[#allocation27_spill] sm:$0xff]  ;;  %v6938_v37 = vld [vmem:[#allocation60_spill] sm:$0xff]  ;;  %v6941_v62 = vld [vmem:[#allocation45_spill] sm:$0xff] }
 0xffa   :  { %v6373_v8 = vsub.s32 %v2295_v39, %v5850_v43  ;;  %3681 = vmatprep.subr.bf16.mxu1 %v5067_v10  ;;  %3703 = vmatprep.subr.bf16.mxu0 %v5147_v26  ;;  %v6917_v26 = vld [vmem:[#allocation16_spill] sm:$0xff]  ;;  %v6924_v43 = vld [vmem:[#allocation25_spill] sm:$0xff]  ;;  %v6933_v63 = vld [vmem:[#allocation43_spill] sm:$0xff] }
 0xffb   :  { %v6934_v44 = vld [vmem:[#allocation59_spill] sm:$0xff]  ;;  %v6939_v59 = vld [vmem:[#allocation36_spill] sm:$0xff]  ;;  %v6942_v46 = vld [vmem:[#allocation61_spill] sm:$0xff] }
 0xffc   :  { %v2299_v9 = vrot.slane %v2137_v0, %v6373_v8  ;;  %v6935_v42 = vld [vmem:[#allocation35_spill] sm:$0xff]  ;;  %v6940_v49 = vld [vmem:[#allocation52_spill] sm:$0xff]  ;;  %v6943_v57 = vld [vmem:[#allocation37_spill] sm:$0xff] }
 0xffd   :  { %3682 = vmatpush3.bf16.msra.mxu1 %v5027_v2  ;;  %3704 = vmatpush3.bf16.msra.mxu0 %v5107_v18  ;;  %v2306_v2 = vrot.slane %v2292_v17, %v6373_v8  ;;  %v6909_v18 = vld [vmem:[#allocation14_spill] sm:$0xff]  ;;  %v6936_v38 = vld [vmem:[#allocation51_spill] sm:$0xff]  ;;  %v6944_v39 = vld [vmem:[#allocation53_spill] sm:$0xff] }
 0xffe   :  { %3683 = vmatprep.subr.bf16.mxu1 %v5072_v11  ;;  %3705 = vmatprep.subr.bf16.mxu0 %v5152_v27  ;;  %v2307_v1 = vcombine.high %v2299_v9, %v2299_v9  ;;  %v2315_v11 = vrot.slane %v2299_v9, %v6373_v8  ;;  %v6918_v27 = vld [vmem:[#allocation31_spill] sm:$0xff]  ;;  %v6945_v0 = vld [vmem:[#allocation46_spill] sm:$0xff] }
 0xfff   :  { %v2322_v48 = vrot.slane %v2306_v2, %v6373_v8  ;;  %v6946_v9 = vld [vmem:[#allocation62_spill] sm:$0xff]  ;;  %v6950_v17 = vld [vmem:[#allocation63_spill] sm:$0xff] }
0x1000   :  { %v2329_v16 = vrot.slane %v2307_v1, %v6373_v8  ;;  %v6947_v1 = vld [vmem:[#allocation38_spill] sm:$0xff] }
0x1001   :  { %3684 = vmatpush3.bf16.msra.mxu1 %v5032_v3  ;;  %3706 = vmatpush3.bf16.msra.mxu0 %v5112_v19  ;;  %v2308_v3 = vcombine.high %v2306_v2, %v2306_v2  ;;  %v6910_v19 = vld [vmem:[#allocation29_spill] sm:$0xff]  ;;  %v2338_v34 = vcombine.high %v2322_v48, %v2322_v48 }
0x1002   :  { %3685 = vmatprep.subr.bf16.mxu1 %v5077_v12  ;;  %3707 = vmatprep.subr.bf16.mxu0 %v5157_v28  ;;  %v2339_v10 = vcombine.high %v2329_v16, %v2329_v16  ;;  %v2138_v28 = vld [vmem:[%s6782_s1 + $0x8] sm:$0xff] }
0x1003   :  { %2462 = vmatprep.mubr.bf16.mxu1 %v2329_v16  ;;  %v6948_v16 = vld [vmem:[#allocation54_spill] sm:$0xff]  ;;  %v2341_v2 = vcombine.high %v2138_v28, %v2138_v28 }
0x1004   :  { %2502 = vmatprep.mubr.bf16.mxu0 %v2339_v10  ;;  %v6949_v10 = vld [vmem:[#allocation47_spill] sm:$0xff] }
0x1005   :  { %3686 = vmatpush3.bf16.msra.mxu1 %v5037_v4  ;;  %3708 = vmatpush3.bf16.msra.mxu0 %v5117_v20  ;;  %v2336_v4 = vrot.slane %v2308_v3, %v6373_v8  ;;  %v6911_v20 = vld [vmem:[#allocation7_spill] sm:$0xff] }
0x1006   :  { %3687 = vmatprep.subr.bf16.mxu1 %v5082_v13  ;;  %3709 = vmatprep.subr.bf16.mxu0 %v5162_v29  ;;  %v6905_v13 = vld [vmem:[#allocation13_spill] sm:$0xff]  ;;  %v6951_v3 = vld [vmem:[#allocation39_spill] sm:$0xff] }
0x1007   :  { %v2340_v12 = vcombine.high %v2336_v4, %v2336_v4  ;;  %v6919_v29 = vld [vmem:[#allocation9_spill] sm:$0xff] }
0x1009   :  { %3688 = vmatpush3.bf16.msra.mxu1 %v5042_v5  ;;  %3710 = vmatpush3.bf16.msra.mxu0 %v5122_v21  ;;  %v2337_v5 = vcombine.high %v2315_v11, %v2315_v11  ;;  %v6912_v21 = vld [vmem:[#allocation22_spill] sm:$0xff] }
0x100a   :  { %3689 = vmatprep.subr.bf16.mxu1 %v5087_v14  ;;  %3711 = vmatprep.subr.bf16.mxu0 %v5167_v30  ;;  %v6906_v14 = vld [vmem:[#allocation28_spill] sm:$0xff] }
0x100b   :  { %v6920_v30 = vld [vmem:[#allocation24_spill] sm:$0xff] }
0x100d   :  { %3690 = vmatpush3.bf16.msra.mxu1 %v5047_v6  ;;  %3712 = vmatpush3.bf16.msra.mxu0 %v5127_v22  ;;  %v6904_v6 = vld [vmem:[#allocation20_spill] sm:$0xff]  ;;  %v6913_v22 = vld [vmem:[#allocation15_spill] sm:$0xff] }
0x100e   :  { %3691 = vmatprep.subr.bf16.mxu1 %v5092_v15  ;;  %3713 = vmatprep.subr.bf16.mxu0 %v5172_v31  ;;  %v6908_v15 = vld [vmem:[#allocation21_spill] sm:$0xff] }
0x100f   :  { %v6921_v31 = vld [vmem:[#allocation17_spill] sm:$0xff] }
0x1011   :  { %3692 = vmatpush3.bf16.msra.mxu1 %v5052_v7  ;;  %3714 = vmatpush3.bf16.msra.mxu0 %v5132_v23  ;;  %v6907_v7 = vld [vmem:[#allocation6_spill] sm:$0xff] }
0x1012   :  { %3721 = vmatprep.subr.bf16.mxu1 %v5217_v40  ;;  %3743 = vmatprep.subr.bf16.mxu0 %v5297_v56  ;;  %v6914_v23 = vld [vmem:[#allocation30_spill] sm:$0xff]  ;;  %v2348_v40 = vrot.slane %v2138_v28, %v6373_v8  ;;  %v6966_v28 = vld [vmem:[#allocation91_spill] sm:$0xff] }
0x1013   :  { %v6923_v56 = vld [vmem:[#allocation10_spill] sm:$0xff] }
0x1014   :  { %2463 = vmatmul.mubr.bf16.vlgmr.msra.gmra.mrb[20].mxu1 %v2315_v11  ;;  %2503 = vmatmul.mubr.bf16.vlgmr.msra.gmra.mrb[16].mxu0 %v2337_v5  ;;  %v2356_v45 = vcombine.high %v2348_v40, %v2348_v40  ;;  %v6952_v11 = vld [vmem:[#allocation55_spill] sm:$0xff]  ;;  %v6954_v5 = vld [vmem:[#allocation64_spill] sm:$0xff] }
0x1015   :  { %3722 = vmatpush3.bf16.msra.mxu1 %v5177_v32  ;;  %3744 = vmatpush3.bf16.msra.mxu0 %v6904_v6  ;;  %v6922_v32 = vld [vmem:[#allocation32_spill] sm:$0xff] }
0x1016   :  { %3723 = vmatprep.subr.bf16.mxu1 %v6905_v13  ;;  %3745 = vmatprep.subr.bf16.mxu0 %v6906_v14  ;;  %v2378_v61 = vrot.slane %v2356_v45, %v6373_v8  ;;  %v6955_v6 = vld [vmem:[#allocation40_spill] sm:$0xff]  ;;  %v6957_v14 = vld [vmem:[#allocation49_spill] sm:$0xff] }
0x1017   :  { %2542 = vmatprep.mubr.bf16.mxu1 %v2336_v4  ;;  %2582 = vmatprep.mubr.bf16.mxu0 %v2340_v12  ;;  %v6953_v4 = vld [vmem:[#allocation48_spill] sm:$0xff]  ;;  %v2355_v12 = vrot.slane %v2341_v2, %v6373_v8  ;;  %v6975_v45 = vld [vmem:[#allocation69_spill] sm:$0xff] }
0x1018   :  { %v2388_v36 = vcombine.high %v2378_v61, %v2378_v61  ;;  %v6956_v13 = vld [vmem:[#allocation56_spill] sm:$0xff] }
0x1019   :  { %3724 = vmatpush3.bf16.msra.mxu1 %v6907_v7  ;;  %3746 = vmatpush3.bf16.msra.mxu0 %v6908_v15  ;;  %v6958_v7 = vld [vmem:[#allocation65_spill] sm:$0xff]  ;;  %v2357_v15 = vcombine.high %v2355_v12, %v2355_v12  ;;  %v6999_v2 = vld [vmem:[#allocation108_spill] sm:$0xff] }
0x101a   :  { %3725 = vmatprep.subr.bf16.mxu1 %v6909_v18  ;;  %3747 = vmatprep.subr.bf16.mxu0 %v6910_v19  ;;  %v2364_v18 = vrot.slane %v2348_v40, %v6373_v8  ;;  %v6959_v19 = vld [vmem:[#allocation41_spill] sm:$0xff]  ;;  %v6970_v40 = vld [vmem:[#allocation92_spill] sm:$0xff] }
0x101d   :  { %3726 = vmatpush3.bf16.msra.mxu1 %v6911_v20  ;;  %3748 = vmatpush3.bf16.msra.mxu0 %v6912_v21  ;;  %v6960_v20 = vld [vmem:[#allocation57_spill] sm:$0xff]  ;;  %v6961_v21 = vld [vmem:[#allocation50_spill] sm:$0xff] }
0x101e   :  { %3727 = vmatprep.subr.bf16.mxu1 %v6913_v22  ;;  %3749 = vmatprep.subr.bf16.mxu0 %v6914_v23  ;;  %v6962_v22 = vld [vmem:[#allocation66_spill] sm:$0xff]  ;;  %v2385_v23 = vrot.slane %v2357_v15, %v6373_v8  ;;  %v7009_v15 = vld [vmem:[#allocation113_spill] sm:$0xff] }
0x1021   :  { %3728 = vmatpush3.bf16.msra.mxu1 %v6915_v24  ;;  %3750 = vmatpush3.bf16.msra.mxu0 %v6916_v25  ;;  %v2386_v24 = vcombine.high %v2364_v18, %v2364_v18  ;;  %v6963_v25 = vld [vmem:[#allocation42_spill] sm:$0xff] }
0x1022   :  { %3729 = vmatprep.subr.bf16.mxu1 %v6917_v26  ;;  %3751 = vmatprep.subr.bf16.mxu0 %v6918_v27  ;;  %v6964_v26 = vld [vmem:[#allocation58_spill] sm:$0xff]  ;;  %v6965_v27 = vld [vmem:[#allocation75_spill] sm:$0xff] }
0x1025   :  { %3730 = vmatpush3.bf16.msra.mxu1 %v6919_v29  ;;  %3752 = vmatpush3.bf16.msra.mxu0 %v6920_v30  ;;  %v2389_v29 = vcombine.high %v2385_v23, %v2385_v23  ;;  %v6967_v30 = vld [vmem:[#allocation67_spill] sm:$0xff] }
0x1026   :  { %3731 = vmatprep.subr.bf16.mxu1 %v6921_v31  ;;  %3753 = vmatprep.subr.bf16.mxu0 %v6922_v32  ;;  %v6968_v31 = vld [vmem:[#allocation83_spill] sm:$0xff]  ;;  %v6969_v32 = vld [vmem:[#allocation76_spill] sm:$0xff] }
0x1029   :  { %3732 = vmatpush3.bf16.msra.mxu1 %v6923_v56  ;;  %3754 = vmatpush3.bf16.msra.mxu0 %v6924_v43  ;;  %v6971_v56 = vld [vmem:[#allocation68_spill] sm:$0xff] }
0x102a   :  { %3733 = vmatprep.subr.bf16.mxu1 %v6925_v35  ;;  %3755 = vmatprep.subr.bf16.mxu0 %v6926_v54  ;;  %v6972_v43 = vld [vmem:[#allocation84_spill] sm:$0xff]  ;;  %v6973_v35 = vld [vmem:[#allocation77_spill] sm:$0xff] }
0x102b   :  { %v6974_v54 = vld [vmem:[#allocation93_spill] sm:$0xff] }
0x102d   :  { %3734 = vmatpush3.bf16.msra.mxu1 %v6927_v53  ;;  %3756 = vmatpush3.bf16.msra.mxu0 %v6928_v52  ;;  %v6977_v53 = vld [vmem:[#allocation78_spill] sm:$0xff] }
0x102e   :  { %3735 = vmatprep.subr.bf16.mxu1 %v6929_v50  ;;  %3757 = vmatprep.subr.bf16.mxu0 %v6930_v60  ;;  %v6978_v52 = vld [vmem:[#allocation94_spill] sm:$0xff] }
0x102f   :  { %v6979_v50 = vld [vmem:[#allocation70_spill] sm:$0xff] }
0x1030   :  { %v6980_v60 = vld [vmem:[#allocation86_spill] sm:$0xff] }
0x1031   :  { %3736 = vmatpush3.bf16.msra.mxu1 %v6931_v51  ;;  %3758 = vmatpush3.bf16.msra.mxu0 %v6932_v55  ;;  %v6983_v51 = vld [vmem:[#allocation71_spill] sm:$0xff] }
0x1032   :  { %3765 = vmatprep.subr.bf16.mxu1 %v6933_v63  ;;  %3787 = vmatprep.subr.bf16.mxu0 %v6934_v44  ;;  %v6984_v55 = vld [vmem:[#allocation87_spill] sm:$0xff]  ;;  %v6985_v63 = vld [vmem:[#allocation80_spill] sm:$0xff] }
0x1033   :  { %v6986_v44 = vld [vmem:[#allocation96_spill] sm:$0xff] }
0x1034   :  { %2543 = vmatmul.mubr.bf16.vlgmr.msra.gmra.mrb[24].mxu1 %v2322_v48  ;;  %2583 = vmatmul.mubr.bf16.vlgmr.msra.gmra.mrb[20].mxu0 %v2338_v34  ;;  %v6976_v48 = vld [vmem:[#allocation85_spill] sm:$0xff]  ;;  %v6982_v34 = vld [vmem:[#allocation95_spill] sm:$0xff] }
0x1035   :  { %3766 = vmatpush3.bf16.msra.mxu1 %v6935_v42  ;;  %3788 = vmatpush3.bf16.msra.mxu0 %v6936_v38  ;;  %v6988_v42 = vld [vmem:[#allocation88_spill] sm:$0xff]  ;;  %v6989_v38 = vld [vmem:[#allocation81_spill] sm:$0xff] }
0x1036   :  { %3767 = vmatprep.subr.bf16.mxu1 %v6937_v41  ;;  %3789 = vmatprep.subr.bf16.mxu0 %v6938_v37  ;;  %v6990_v41 = vld [vmem:[#allocation97_spill] sm:$0xff]  ;;  %v3452_v37 = vld.sshfl [vmem:[%s6782_s1 + $0x10] sm:$0x11 pattern:$0x75316420] }
0x1037   :  { %2622 = vmatprep.mubr.bf16.mxu1 %v2378_v61  ;;  %2662 = vmatprep.mubr.bf16.mxu0 %v2388_v36  ;;  %v6981_v61 = vld [vmem:[#allocation79_spill] sm:$0xff]  ;;  %v6987_v36 = vld [vmem:[#allocation72_spill] sm:$0xff] }
0x1039   :  { %3768 = vmatpush3.bf16.msra.mxu1 %v6939_v59  ;;  %3790 = vmatpush3.bf16.msra.mxu0 %v6940_v49  ;;  %v2371_v59 = vrot.slane %v2355_v12, %v6373_v8  ;;  %v6991_v49 = vld [vmem:[#allocation73_spill] sm:$0xff]  ;;  %v7004_v12 = vld [vmem:[#allocation102_spill] sm:$0xff] }
0x103a   :  { %3769 = vmatprep.subr.bf16.mxu1 %v6941_v62  ;;  %3791 = vmatprep.subr.bf16.mxu0 %v6942_v46  ;;  %v6992_v62 = vld [vmem:[#allocation89_spill] sm:$0xff]  ;;  %v2397_v46 = vcombine.high %v3452_v37, %v3452_v37 }
0x103d   :  { %3770 = vmatpush3.bf16.msra.mxu1 %v6943_v57  ;;  %3792 = vmatpush3.bf16.msra.mxu0 %v6944_v39  ;;  %v6993_v57 = vld [vmem:[#allocation82_spill] sm:$0xff] }
0x103e   :  { %3771 = vmatprep.subr.bf16.mxu1 %v6945_v0  ;;  %3793 = vmatprep.subr.bf16.mxu0 %v6946_v9  ;;  %v6994_v39 = vld [vmem:[#allocation98_spill] sm:$0xff]  ;;  %v2387_v0 = vcombine.high %v2371_v59, %v2371_v59 }
0x103f   :  { %v6995_v9 = vld [vmem:[#allocation74_spill] sm:$0xff] }
0x1041   :  { %3772 = vmatpush3.bf16.msra.mxu1 %v6947_v1  ;;  %3794 = vmatpush3.bf16.msra.mxu0 %v6948_v16  ;;  %v6996_v1 = vld [vmem:[#allocation90_spill] sm:$0xff]  ;;  %v2411_v16 = vrot.slane %v2397_v46, %v6373_v8 }
0x1042   :  { %3773 = vmatprep.subr.bf16.mxu1 %v6949_v10  ;;  %3795 = vmatprep.subr.bf16.mxu0 %v6950_v17  ;;  %v6997_v10 = vld [vmem:[#allocation107_spill] sm:$0xff] }
0x1043   :  { %v6998_v17 = vld [vmem:[#allocation99_spill] sm:$0xff] }
0x1045   :  { %3774 = vmatpush3.bf16.msra.mxu1 %v6951_v3  ;;  %3796 = vmatpush3.bf16.msra.mxu0 %v6952_v11  ;;  %v7000_v3 = vld [vmem:[#allocation100_spill] sm:$0xff]  ;;  %v7001_v11 = vld [vmem:[#allocation109_spill] sm:$0xff] }
0x1046   :  { %3775 = vmatprep.subr.bf16.mxu1 %v6953_v4  ;;  %3797 = vmatprep.subr.bf16.mxu0 %v6954_v5  ;;  %v7002_v4 = vld [vmem:[#allocation101_spill] sm:$0xff]  ;;  %v7003_v5 = vld [vmem:[#allocation110_spill] sm:$0xff] }
0x1049   :  { %3776 = vmatpush3.bf16.msra.mxu1 %v6955_v6  ;;  %3798 = vmatpush3.bf16.msra.mxu0 %v6956_v13  ;;  %v7005_v6 = vld [vmem:[#allocation111_spill] sm:$0xff] }
0x104a   :  { %3777 = vmatprep.subr.bf16.mxu1 %v6957_v14  ;;  %3799 = vmatprep.subr.bf16.mxu0 %v6958_v7  ;;  %v7006_v13 = vld [vmem:[#allocation103_spill] sm:$0xff]  ;;  %v7007_v14 = vld [vmem:[#allocation112_spill] sm:$0xff] }
0x104b   :  { %v7008_v7 = vld [vmem:[#allocation104_spill] sm:$0xff] }
0x104d   :  { %3778 = vmatpush3.bf16.msra.mxu1 %v6959_v19  ;;  %3800 = vmatpush3.bf16.msra.mxu0 %v6960_v20  ;;  %v7011_v19 = vld [vmem:[#allocation114_spill] sm:$0xff]  ;;  %v2404_v20 = vrot.slane %v3452_v37, %v6373_v8 }
0x104e   :  { %3779 = vmatprep.subr.bf16.mxu1 %v6961_v21  ;;  %3801 = vmatprep.subr.bf16.mxu0 %v6962_v22  ;;  %v7012_v21 = vld [vmem:[#allocation106_spill] sm:$0xff]  ;;  %v2791_v22 = vld [vmem:[%s6783_s2 + $0x30] sm:$0xff] }
0x104f   :  { %v2793_v8 = vld [vmem:[%s6783_s2 + $0x40] sm:$0xff] }
0x1051   :  { %3780 = vmatpush3.bf16.msra.mxu1 %v6963_v25  ;;  %3802 = vmatpush3.bf16.msra.mxu0 %v6964_v26  ;;  %v2794_v25 = vld [vmem:[%s6783_s2 + $0x48] sm:$0xff] }
0x1052   :  { %3809 = vmatprep.subr.bf16.mxu1 %v6965_v27  ;;  %3831 = vmatprep.subr.bf16.mxu0 %v6966_v28  ;;  %v4828_v26 = vpack.c.bf16 %v2794_v25, %v2793_v8  ;;  %v2795_v27 = vld [vmem:[%s6783_s2 + $0x50] sm:$0xff]  ;;  %v2796_v28 = vld [vmem:[%s6783_s2 + $0x58] sm:$0xff]  ;;  %v2964_v25 = vld [vmem:[%s6783_s2 + $0xc0] sm:$0xff] }
0x1054   :  { %2623 = vmatmul.mubr.bf16.vlgmr.msra.gmra.mrb[28].mxu1 %v2364_v18  ;;  %2663 = vmatmul.mubr.bf16.vlgmr.msra.gmra.mrb[24].mxu0 %v2386_v24  ;;  %v7010_v18 = vld [vmem:[#allocation105_spill] sm:$0xff] }
0x1055   :  { %3810 = vmatpush3.bf16.msra.mxu1 %v6967_v30  ;;  %3832 = vmatpush3.bf16.msra.mxu0 %v6968_v31 }
0x1056   :  { %3811 = vmatprep.subr.bf16.mxu1 %v6969_v32  ;;  %3833 = vmatprep.subr.bf16.mxu0 %v6970_v40  ;;  %v3451_v32 = vld [vmem:[%s6783_s2 + $0x28] ss:$0 sm:$0xff] }
0x1057   :  { %2702 = vmatprep.mubr.bf16.mxu1 %v2385_v23  ;;  %2742 = vmatprep.mubr.bf16.mxu0 %v2389_v29  ;;  %v2792_v23 = vld [vmem:[%s6783_s2 + $0x38] sm:$0xff]  ;;  %v4831_v29 = vpack.c.bf16 %v2796_v28, %v2795_v27 }
0x1058   :  { %v4825_v24 = vpack.c.bf16 %v2792_v23, %v2791_v22 }
0x1059   :  { %3812 = vmatpush3.bf16.msra.mxu1 %v6971_v56  ;;  %3834 = vmatpush3.bf16.msra.mxu0 %v6972_v43 }
0x105a   :  { %3813 = vmatprep.subr.bf16.mxu1 %v6973_v35  ;;  %3835 = vmatprep.subr.bf16.mxu0 %v6974_v54 }
0x105d   :  { %3814 = vmatpush3.bf16.msra.mxu1 %v6975_v45  ;;  %3836 = vmatpush3.bf16.msra.mxu0 %v6976_v48  ;;  %v2797_v48 = vld [vmem:[%s6783_s2 + $0x60] sm:$0xff] }
0x105e   :  { %3815 = vmatprep.subr.bf16.mxu1 %v6977_v53  ;;  %3837 = vmatprep.subr.bf16.mxu0 %v6978_v52  ;;  %v2798_v53 = vld [vmem:[%s6783_s2 + $0x68] sm:$0xff] }
0x1061   :  { %3816 = vmatpush3.bf16.msra.mxu1 %v6979_v50  ;;  %3838 = vmatpush3.bf16.msra.mxu0 %v6980_v60  ;;  %v4834_v60 = vpack.c.bf16 %v2798_v53, %v2797_v48  ;;  %v2881_v53 = vld [vmem:[%s6783_s2 + $0x98] sm:$0xff] }
0x1062   :  { %3817 = vmatprep.subr.bf16.mxu1 %v6981_v61  ;;  %3839 = vmatprep.subr.bf16.mxu0 %v6982_v34 }
0x1065   :  { %3818 = vmatpush3.bf16.msra.mxu1 %v6983_v51  ;;  %3840 = vmatpush3.bf16.msra.mxu0 %v6984_v55 }
0x1066   :  { %3819 = vmatprep.subr.bf16.mxu1 %v6985_v63  ;;  %3841 = vmatprep.subr.bf16.mxu0 %v6986_v44 }
0x1069   :  { %3820 = vmatpush3.bf16.msra.mxu1 %v6987_v36  ;;  %3842 = vmatpush3.bf16.msra.mxu0 %v6988_v42 }
0x106a   :  { %3821 = vmatprep.subr.bf16.mxu1 %v6989_v38  ;;  %3843 = vmatprep.subr.bf16.mxu0 %v6990_v41 }
0x106d   :  { %3822 = vmatpush3.bf16.msra.mxu1 %v6991_v49  ;;  %3844 = vmatpush3.bf16.msra.mxu0 %v6992_v62 }
0x106e   :  { %3823 = vmatprep.subr.bf16.mxu1 %v6993_v57  ;;  %3845 = vmatprep.subr.bf16.mxu0 %v6994_v39 }
0x1071   :  { %3824 = vmatpush3.bf16.msra.mxu1 %v6995_v9  ;;  %3846 = vmatpush3.bf16.msra.mxu0 %v6996_v1 }
0x1072   :  { %3853 = vmatprep.subr.bf16.mxu1 %v6997_v10  ;;  %4824 = vmatprep.subr.bf16.mxu0 %v6902_v58 }
0x1074   :  { %2703 = vmatmul.mubr.bf16.vlgmr.msra.gmra.mrb[32].mxu1 %v2371_v59  ;;  %2743 = vmatmul.mubr.bf16.vlgmr.msra.gmra.mrb[28].mxu0 %v2387_v0 }
0x1075   :  { %3854 = vmatpush3.bf16.msra.mxu1 %v6998_v17  ;;  %2782 = vmatprep.mubr.bf16.mxu1 %v2411_v16 }
0x1076   :  { %3855 = vmatprep.subr.bf16.mxu1 %v6999_v2  ;;  %4364 = vmatprep.mubr.msk.f32.mxu0 %vm4967_vm1, %v6903_v47 }
0x1077   :  { %4826 = vmatpush3.bf16.msra.mxu0 %v4825_v24 }
0x1078   :  { %4827 = vmatprep.subr.bf16.mxu0 %v6902_v58 }
0x1079   :  { %3856 = vmatpush3.bf16.msra.mxu1 %v7000_v3 }
0x107a   :  { %3857 = vmatprep.subr.bf16.mxu1 %v7001_v11 }
0x107b   :  { %4829 = vmatpush3.bf16.msra.mxu0 %v4828_v26  ;;  %v2965_v26 = vld [vmem:[%s6783_s2 + $0xc8] sm:$0xff] }
0x107c   :  { %4830 = vmatprep.subr.bf16.mxu0 %v6902_v58 }
0x107d   :  { %3858 = vmatpush3.bf16.msra.mxu1 %v7002_v4 }
0x107e   :  { %3859 = vmatprep.subr.bf16.mxu1 %v7003_v5 }
0x107f   :  { %4832 = vmatpush3.bf16.msra.mxu0 %v4831_v29  ;;  %v4849_v29 = vpack.c.bf16 %v2965_v26, %v2964_v25  ;;  %v3151_v25 = vld [vmem:[%s6783_s2 + $0x190] sm:$0xff]  ;;  %v3152_v26 = vld [vmem:[%s6783_s2 + $0x198] sm:$0xff] }
0x1080   :  { %4833 = vmatprep.subr.bf16.mxu0 %v6902_v58 }
0x1081   :  { %3860 = vmatpush3.bf16.msra.mxu1 %v7004_v12 }
0x1082   :  { %3861 = vmatprep.subr.bf16.mxu1 %v7005_v6 }
0x1083   :  { %4835 = vmatpush3.bf16.msra.mxu0 %v4834_v60  ;;  %v2883_v60 = vld [vmem:[%s6783_s2 + $0xa8] sm:$0xff] }
0x1084   :  { %4848 = vmatprep.subr.bf16.mxu0 %v6902_v58 }
0x1085   :  { %3862 = vmatpush3.bf16.msra.mxu1 %v7006_v13 }
0x1086   :  { %3863 = vmatprep.subr.bf16.mxu1 %v7007_v14 }
0x1089   :  { %3864 = vmatpush3.bf16.msra.mxu1 %v7008_v7 }
0x108a   :  { %3865 = vmatprep.subr.bf16.mxu1 %v7009_v15 }
0x108d   :  { %3866 = vmatpush3.bf16.msra.mxu1 %v7010_v18 }
0x108e   :  { %3867 = vmatprep.subr.bf16.mxu1 %v7011_v19 }
0x1091   :  { %3868 = vmatpush3.bf16.msra.mxu1 %v7012_v21 }
0x1092   :  { %4836 = vmatprep.subr.bf16.mxu1 %v6902_v58 }
0x1094   :  { %2783 = vmatmul.mubr.bf16.vlgmr.msra.gmra.mrb[36].mxu1 %v2404_v20 }
0x1095   :  { %4383 = vmatprep.mubr.msk.f32.mxu1 %vm4967_vm1, %v6903_v47 }
0x10e7   :  { %v3693_v30 = vpop.f32.mrb[20].mxu1  ;;  %v3715_v31 = vpop.f32.mrb[16].mxu0 }
0x10e8   :  { %v3694_v40 = vpop.f32.mrb[21].mxu1  ;;  %v3716_v56 = vpop.f32.mrb[17].mxu0 }
0x10e9   :  { %v3695_v43 = vadd.f32 %v3694_v40, %v3693_v30  ;;  %v3696_v35 = vpop.f32.mrb[22].mxu1  ;;  %v3717_v54 = vadd.f32 %v3716_v56, %v3715_v31  ;;  %v3718_v45 = vpop.f32.mrb[18].mxu0  ;;  %v2966_v31 = vld [vmem:[%s6783_s2 + $0xd0] sm:$0xff]  ;;  %v2877_v56 = vld [vmem:[%s6783_s2 + $0x78] sm:$0xff] }
0x10ea   :  { %v3697_v52 = vpop.f32.mrb[23].mxu1  ;;  %v3719_v50 = vpop.f32.mrb[19].mxu0  ;;  %v2879_v35 = vld [vmem:[%s6783_s2 + $0x88] sm:$0xff]  ;;  %v2880_v45 = vld [vmem:[%s6783_s2 + $0x90] sm:$0xff] }
0x10eb   :  { %v2465_v61 = vadd.f32 %v3695_v43, %v3451_v32  ;;  %v2967_v32 = vld [vmem:[%s6783_s2 + $0xd8] sm:$0xff]  ;;  %v2878_v43 = vld [vmem:[%s6783_s2 + $0x80] sm:$0xff]  ;;  %v4840_v48 = vpack.c.bf16 %v2880_v45, %v2879_v35  ;;  %v3232_v45 = vld [vmem:[%s6783_s2 + $0x1c8] sm:$0xff] }
0x10ec   :  { %v4852_v40 = vpack.c.bf16 %v2967_v32, %v2966_v31  ;;  %v2882_v52 = vld [vmem:[%s6783_s2 + $0xa0] sm:$0xff]  ;;  %v3230_v35 = vld [vmem:[%s6783_s2 + $0x1b8] sm:$0xff] }
0x10ed   :  { %v2505_v34 = vadd.f32 %v3717_v54, %v2465_v61  ;;  %v4837_v54 = vpack.c.bf16 %v2878_v43, %v2877_v56  ;;  %v4843_v50 = vpack.c.bf16 %v2882_v52, %v2881_v53  ;;  %v2884_v61 = vld [vmem:[%s6783_s2 + $0xb0] sm:$0xff]  ;;  %v3154_v56 = vld [vmem:[%s6783_s2 + $0x1a8] sm:$0xff] }
0x10ee   :  { %v3233_v53 = vld [vmem:[%s6783_s2 + $0x1d0] sm:$0xff] }
0x10ef   :  { %4838 = vmatpush3.bf16.msra.mxu1 %v4837_v54  ;;  %v3231_v54 = vld [vmem:[%s6783_s2 + $0x1c0] sm:$0xff]  ;;  %v4894_v52 = vpack.c.bf16 %v3233_v53, %v3232_v45 }
0x10f0   :  { %4839 = vmatprep.subr.bf16.mxu1 %v6902_v58 }
0x10f3   :  { %4841 = vmatpush3.bf16.msra.mxu1 %v4840_v48  ;;  %v4891_v48 = vpack.c.bf16 %v3231_v54, %v3230_v35 }
0x10f4   :  { %4842 = vmatprep.subr.bf16.mxu1 %v6902_v58 }
0x10f7   :  { %4844 = vmatpush3.bf16.msra.mxu1 %v4843_v50  ;;  %v3234_v50 = vld [vmem:[%s6783_s2 + $0x1d8] sm:$0xff] }
0x10f8   :  { %4845 = vmatprep.subr.bf16.mxu1 %v6902_v58 }
0x1107   :  { %v3737_v51 = vpop.f32.mrb[24].mxu1  ;;  %v3759_v55 = vpop.f32.mrb[20].mxu0 }
0x1108   :  { %v3738_v63 = vpop.f32.mrb[25].mxu1  ;;  %v3760_v44 = vpop.f32.mrb[21].mxu0 }
0x1109   :  { %v3739_v36 = vadd.f32 %v3738_v63, %v3737_v51  ;;  %v3740_v42 = vpop.f32.mrb[26].mxu1  ;;  %v3761_v38 = vadd.f32 %v3760_v44, %v3759_v55  ;;  %v3762_v41 = vpop.f32.mrb[22].mxu0  ;;  %v3453_v51 = vld [vmem:[%s6783_s2 + $0x70] ss:$0 sm:$0xff] }
0x110a   :  { %v3741_v37 = vpop.f32.mrb[27].mxu1  ;;  %v3763_v59 = vpop.f32.mrb[23].mxu0  ;;  %v3054_v42 = vld [vmem:[%s6783_s2 + $0xf8] sm:$0xff]  ;;  %v3055_v41 = vld [vmem:[%s6783_s2 + $0x100] sm:$0xff] }
0x110b   :  { %v2545_v49 = vadd.f32 %v3739_v36, %v2505_v34  ;;  %v4846_v34 = vpack.c.bf16 %v2884_v61, %v2883_v60  ;;  %v3052_v36 = vld [vmem:[%s6783_s2 + $0xe8] sm:$0xff]  ;;  %v4858_v37 = vpack.c.bf16 %v3055_v41, %v3054_v42  ;;  %v3235_v60 = vld [vmem:[%s6783_s2 + $0x1e0] sm:$0xff] }
0x110c   :  { %v3056_v59 = vld [vmem:[%s6783_s2 + $0x108] sm:$0xff]  ;;  %v4897_v61 = vpack.c.bf16 %v3235_v60, %v3234_v50 }
0x110d   :  { %v2585_v62 = vadd.f32 %v3761_v38, %v2545_v49  ;;  %4847 = vmatpush3.bf16.msra.mxu1 %v4846_v34  ;;  %v3057_v49 = vld [vmem:[%s6783_s2 + $0x110] sm:$0xff]  ;;  %v3459_v34 = vld [vmem:[%s6783_s2 + $0x128] ss:$0 sm:$0xff] }
0x110e   :  { %4854 = vmatprep.subr.bf16.mxu1 %v6902_v58  ;;  %v3318_v41 = vld [vmem:[%s6783_s2 + $0x208] sm:$0xff] }
0x1110   :  { %4384 = vmatmul.mubr.msk.f32.vlgmr.msra.gmra.mrb[18].mxu1 %vm710_vm2, %v6362_v33  ;;  %v3053_v33 = vld [vmem:[%s6783_s2 + $0xf0] sm:$0xff] }
0x1111   :  { %4413 = vmatprep.mubr.msk.f32.mxu1 %vm4967_vm1, %v6903_v47  ;;  %v4855_v38 = vpack.c.bf16 %v3053_v33, %v3052_v36  ;;  %v3236_v36 = vld [vmem:[%s6783_s2 + $0x1e8] sm:$0xff]  ;;  %v3237_v33 = vld [vmem:[%s6783_s2 + $0x1f0] sm:$0xff] }
0x1112   :  { %v4900_v42 = vpack.c.bf16 %v3237_v33, %v3236_v36 }
0x1113   :  { %4856 = vmatpush3.bf16.msra.mxu1 %v4855_v38  ;;  %v3317_v38 = vld [vmem:[%s6783_s2 + $0x200] sm:$0xff] }
0x1114   :  { %4857 = vmatprep.subr.bf16.mxu1 %v6902_v58 }
0x1117   :  { %4859 = vmatpush3.bf16.msra.mxu1 %v4858_v37  ;;  %v3461_v37 = vld [vmem:[%s6783_s2 + $0x1b0] ss:$0 sm:$0xff] }
0x1118   :  { %4860 = vmatprep.subr.bf16.mxu1 %v6902_v58 }
0x1127   :  { %v3781_v46 = vpop.f32.mrb[28].mxu1  ;;  %v3803_v57 = vpop.f32.mrb[24].mxu0 }
0x1128   :  { %v3782_v39 = vpop.f32.mrb[29].mxu1  ;;  %v3804_v0 = vpop.f32.mrb[25].mxu0 }
0x1129   :  { %v3783_v9 = vadd.f32 %v3782_v39, %v3781_v46  ;;  %v3784_v1 = vpop.f32.mrb[30].mxu1  ;;  %v3805_v16 = vadd.f32 %v3804_v0, %v3803_v57  ;;  %v3806_v10 = vpop.f32.mrb[26].mxu0  ;;  %v3058_v46 = vld [vmem:[%s6783_s2 + $0x118] sm:$0xff]  ;;  %v3059_v57 = vld [vmem:[%s6783_s2 + $0x120] sm:$0xff] }
0x112a   :  { %v3785_v17 = vpop.f32.mrb[31].mxu1  ;;  %v3807_v2 = vpop.f32.mrb[27].mxu0  ;;  %v4864_v39 = vpack.c.bf16 %v3059_v57, %v3058_v46  ;;  %v3139_v1 = vld [vmem:[%s6783_s2 + $0x130] sm:$0xff]  ;;  %v3141_v10 = vld [vmem:[%s6783_s2 + $0x140] sm:$0xff] }
0x112b   :  { %v2625_v3 = vadd.f32 %v3783_v9, %v2585_v62  ;;  %v4861_v62 = vpack.c.bf16 %v3057_v49, %v3056_v59  ;;  %v3142_v2 = vld [vmem:[%s6783_s2 + $0x148] sm:$0xff]  ;;  %v4903_v49 = vpack.c.bf16 %v3318_v41, %v3317_v38  ;;  %v3319_v57 = vld [vmem:[%s6783_s2 + $0x210] sm:$0xff] }
0x112d   :  { %v2665_v11 = vadd.f32 %v3805_v16, %v2625_v3  ;;  %4862 = vmatpush3.bf16.msra.mxu1 %v4861_v62  ;;  %v3140_v16 = vld [vmem:[%s6783_s2 + $0x138] sm:$0xff]  ;;  %v4870_v3 = vpack.c.bf16 %v3142_v2, %v3141_v10 }
0x112e   :  { %4863 = vmatprep.subr.bf16.mxu1 %v6902_v58  ;;  %v4867_v17 = vpack.c.bf16 %v3140_v16, %v3139_v1 }
0x1131   :  { %4865 = vmatpush3.bf16.msra.mxu1 %v4864_v39  ;;  %v3320_v39 = vld [vmem:[%s6783_s2 + $0x218] sm:$0xff] }
0x1132   :  { %4890 = vmatprep.subr.bf16.mxu1 %v6902_v58 }
0x1147   :  { %v3825_v4 = vpop.f32.mrb[32].mxu1  ;;  %v3847_v5 = vpop.f32.mrb[28].mxu0 }
0x1148   :  { %v3826_v12 = vpop.f32.mrb[33].mxu1  ;;  %v3848_v6 = vpop.f32.mrb[29].mxu0 }
0x1149   :  { %v3827_v13 = vadd.f32 %v3826_v12, %v3825_v4  ;;  %v3828_v14 = vpop.f32.mrb[34].mxu1  ;;  %v3849_v7 = vadd.f32 %v3848_v6, %v3847_v5  ;;  %v3850_v15 = vpop.f32.mrb[30].mxu0  ;;  %v3144_v4 = vld [vmem:[%s6783_s2 + $0x158] sm:$0xff]  ;;  %v3457_v5 = vld [vmem:[%s6783_s2 + $0xe0] ss:$0 sm:$0xff] }
0x114a   :  { %v3829_v18 = vpop.f32.mrb[35].mxu1  ;;  %v3851_v19 = vpop.f32.mrb[31].mxu0  ;;  %v3146_v15 = vld [vmem:[%s6783_s2 + $0x168] sm:$0xff] }
0x114b   :  { %v2705_v20 = vadd.f32 %v3827_v13, %v2665_v11  ;;  %v3143_v11 = vld [vmem:[%s6783_s2 + $0x150] sm:$0xff] }
0x114c   :  { %v4873_v6 = vpack.c.bf16 %v3144_v4, %v3143_v11 }
0x114d   :  { %v2745_v21 = vadd.f32 %v3849_v7, %v2705_v20  ;;  %v3145_v7 = vld [vmem:[%s6783_s2 + $0x160] sm:$0xff]  ;;  %v3147_v20 = vld [vmem:[%s6783_s2 + $0x170] sm:$0xff] }
0x114e   :  { %v4876_v19 = vpack.c.bf16 %v3146_v15, %v3145_v7 }
0x1167   :  { %v3869_v22 = vpop.f32.mrb[36].mxu1 }
0x1168   :  { %v3870_v23 = vpop.f32.mrb[37].mxu1 }
0x1169   :  { %v3871_v8 = vadd.f32 %v3870_v23, %v3869_v22  ;;  %v3872_v24 = vpop.f32.mrb[38].mxu1  ;;  %v3149_v23 = vld [vmem:[%s6783_s2 + $0x180] sm:$0xff] }
0x116a   :  { %v3873_v27 = vpop.f32.mrb[39].mxu1 }
0x116b   :  { %v2785_v28 = vadd.f32 %v3871_v8, %v2745_v21  ;;  %v3148_v21 = vld [vmem:[%s6783_s2 + $0x178] sm:$0xff]  ;;  %v3150_v8 = vld [vmem:[%s6783_s2 + $0x188] sm:$0xff]  ;;  %v4885_v27 = vpack.c.bf16 %v3152_v26, %v3151_v25 }
0x116c   :  { %v4879_v22 = vpack.c.bf16 %v3148_v21, %v3147_v20  ;;  %v4882_v24 = vpack.c.bf16 %v3150_v8, %v3149_v23 }
0x116d   :  { %v2790_v30 = vmax.f32 %v2785_v28, 0.0  ;;  %v3455_v28 = vld [vmem:[%s6783_s2 + $0xb8] ss:$0 sm:$0xff] }
0x116f   :  { %4365 = vmatmul.mubr.msk.f32.vlgmr.msra.gmra.mrb[32].mxu0 %vm710_vm2, %v2790_v30 }
0x1170   :  { %4850 = vmatpush3.bf16.msra.mxu0 %v4849_v29  ;;  %4394 = vmatprep.mubr.msk.f32.mxu0 %vm4967_vm1, %v6903_v47 }
0x1171   :  { %4851 = vmatprep.subr.bf16.mxu0 %v6902_v58 }
0x1174   :  { %4853 = vmatpush3.bf16.msra.mxu0 %v4852_v40  ;;  %v3153_v40 = vld [vmem:[%s6783_s2 + $0x1a0] sm:$0xff] }
0x1175   :  { %4866 = vmatprep.subr.bf16.mxu0 %v6902_v58  ;;  %v4888_v43 = vpack.c.bf16 %v3154_v56, %v3153_v40 }
0x11e3   :  { %v2959_v0 = vpop.f32.mrb[18].mxu1 }
0x11e4   :  { %v4385_v9 = vpop.f32.mrb[19].mxu1  ;;  %v2960_v29 = vadd.f32 %v3455_v28, %v2959_v0  ;;  %v4906_v0 = vpack.c.bf16 %v3320_v39, %v3319_v57 }
0x11e5   :  { %v3462_v9 = vld [vmem:[%s6783_s2 + $0x1f8] ss:$0 sm:$0xff] }
0x11e6   :  { %v2963_v30 = vmax.f32 %v2960_v29, 0.0 }
0x1242   :  { %v2873_v55 = vpop.f32.mrb[32].mxu0 }
0x1243   :  { %v2874_v63 = vadd.f32 %v3453_v51, %v2873_v55  ;;  %v4366_v44 = vpop.f32.mrb[33].mxu0 }
0x1245   :  { %4395 = vmatmul.mubr.msk.f32.vlgmr.msra.gmra.mrb[34].mxu0 %vm359_vm0, %v2874_v63 }
0x1246   :  { %4448 = vmatprep.mubr.msk.f32.mxu0 %vm4967_vm1, %v6903_v47  ;;  %4868 = vmatpush3.bf16.msra.mxu0 %v4867_v17 }
0x1247   :  { %4869 = vmatprep.subr.bf16.mxu0 %v6902_v58 }
0x124a   :  { %4871 = vmatpush3.bf16.msra.mxu0 %v4870_v3 }
0x124b   :  { %4872 = vmatprep.subr.bf16.mxu0 %v6902_v58 }
0x124e   :  { %4874 = vmatpush3.bf16.msra.mxu0 %v4873_v6 }
0x124f   :  { %4875 = vmatprep.subr.bf16.mxu0 %v6902_v58 }
0x1252   :  { %4877 = vmatpush3.bf16.msra.mxu0 %v4876_v19 }
0x1253   :  { %4878 = vmatprep.subr.bf16.mxu0 %v6902_v58 }
0x1256   :  { %4880 = vmatpush3.bf16.msra.mxu0 %v4879_v22 }
0x1257   :  { %4881 = vmatprep.subr.bf16.mxu0 %v6902_v58 }
0x125a   :  { %4883 = vmatpush3.bf16.msra.mxu0 %v4882_v24 }
0x125b   :  { %4884 = vmatprep.subr.bf16.mxu0 %v6902_v58 }
0x125e   :  { %4886 = vmatpush3.bf16.msra.mxu0 %v4885_v27 }
0x125f   :  { %4887 = vmatprep.subr.bf16.mxu0 %v6902_v58 }
0x1262   :  { %4889 = vmatpush3.bf16.msra.mxu0 %v4888_v43 }
0x1318   :  { %v3042_v12 = vpop.f32.mrb[34].mxu0 }
0x1319   :  { %v4396_v13 = vpop.f32.mrb[35].mxu0  ;;  %v3043_v14 = vadd.f32 %v3457_v5, %v3042_v12 }
0x131b   :  { %v3046_v18 = vmax.f32 %v3043_v14, 0.0 }
0x131d   :  { %3048 = vrot.lane.b32.xlu0 %v3046_v18, %s4971_s18 }
0x138f   :  { %v3049_v31 = vpop.permute.xlu0 %3048 }
0x1390   :  { %v3051_v32 = vsel %vm359_vm0, %v2963_v30, %v3049_v31 }
0x1391   :  { %4414 = vmatmul.mubr.msk.f32.vlgmr.msra.gmra.mrb[40].mxu1 %vm710_vm2, %v3051_v32 }
0x1392   :  { %4467 = vmatprep.mubr.msk.f32.mxu1 %vm4967_vm1, %v6903_v47  ;;  %4892 = vmatpush3.bf16.msra.mxu1 %v4891_v48 }
0x1393   :  { %4893 = vmatprep.subr.bf16.mxu1 %v6902_v58 }
0x1396   :  { %4895 = vmatpush3.bf16.msra.mxu1 %v4894_v52 }
0x1397   :  { %4896 = vmatprep.subr.bf16.mxu1 %v6902_v58 }
0x139a   :  { %4898 = vmatpush3.bf16.msra.mxu1 %v4897_v61 }
0x139b   :  { %4899 = vmatprep.subr.bf16.mxu1 %v6902_v58 }
0x139e   :  { %4901 = vmatpush3.bf16.msra.mxu1 %v4900_v42 }
0x139f   :  { %4902 = vmatprep.subr.bf16.mxu1 %v6902_v58 }
0x1464   :  { %v3134_v51 = vpop.f32.mrb[40].mxu1 }
0x1465   :  { %v3135_v55 = vadd.f32 %v3459_v34, %v3134_v51  ;;  %v4415_v63 = vpop.f32.mrb[41].mxu1 }
0x1467   :  { %v3138_v44 = vmax.f32 %v3135_v55, 0.0 }
0x1469   :  { %4449 = vmatmul.mubr.f32.vlgmr.msra.gmra.mrb[36].mxu0 %v3138_v44 }
0x153c   :  { %v3226_v59 = vpop.f32.mrb[36].mxu0 }
0x153d   :  { %v3227_v62 = vadd.f32 %v3461_v37, %v3226_v59  ;;  %v4450_v46 = vpop.f32.mrb[37].mxu0 }
0x153f   :  { %4468 = vmatmul.mubr.msk.f32.vlgmr.msra.gmra.mrb[42].mxu1 %vm710_vm2, %v3227_v62 }
0x1540   :  { %4904 = vmatpush3.bf16.msra.mxu1 %v4903_v49  ;;  %4478 = vmatprep.mubr.msk.f32.mxu1 %vm4967_vm1, %v6903_v47 }
0x1541   :  { %4905 = vmatprep.subr.bf16.mxu1 %v6902_v58  ;;  %v3464_v58 = vld [vmem:[%s6783_s2 + $0x220] ss:$0 sm:$0xff] }
0x1544   :  { %4907 = vmatpush3.bf16.msra.mxu1 %v4906_v0 }
0x1612   :  { %v3312_v1 = vpop.f32.mrb[42].mxu1 }
0x1613   :  { %v3313_v16 = vadd.f32 %v3462_v9, %v3312_v1  ;;  %v4469_v10 = vpop.f32.mrb[43].mxu1 }
0x1615   :  { %v3316_v47 = vmax.f32 %v3313_v16, 0.0 }
0x1617   :  { %4479 = vmatmul.mubr.msk.f32.vlgmr.msra.gmra.mrb[44].mxu1 %vm359_vm0, %v3316_v47 }
0x16ea   :  { %v3395_v17 = vpop.f32.mrb[44].mxu1 }
0x16eb   :  { %v3396_v2 = vadd.f32 %v3464_v58, %v3395_v17  ;;  %v4480_v3 = vpop.f32.mrb[45].mxu1 }
0x16ed   :  { %3400 = vrot.lane.b32.xlu0 %v3396_v2, %s4973_s5 }
0x175f   :  { %v3401_v11 = vpop.permute.xlu0 %3400 }
0x1760   :  { %v3403_v4 = vsel %vm710_vm2, %v3227_v62, %v3401_v11 }
0x1761   :  { %v3405_v5 = vsel %vm3404_vm9, %v3403_v4, 0.0 }
0x1762   :  { %3406 = vst [vmem:[%s6788_s7] sm:$0x3] %v3405_v5 }
0x1763   :  { %3411 = vsyncmov [#allocation3] }
0x1766   :  { %s3412_s13 = vpop.sfrf %3411 }
0x1767   :  { %p3466_p0 = scmp.ne.s32.totalorder %s3412_s13, 0 }
0x1769   :  { %3416 = shalt.err (%p3466_p0)  }

</bundles_post_ra>
